<compile_context>
chip_gen: v5e
topology: v5e:2x2
jax: 0.10.0
libtpu: 0.0.40
codegen_flags: <defaults>
</compile_context>

<pallas_src>
import functools

import jax
import jax.numpy as jnp
import numpy as np
from jax import lax
from jax.experimental import pallas as pl
from jax.experimental.pallas import tpu as pltpu

BN_EPS = 1e-5


# --------------------------------------------------------------------------
# Fused Pallas kernel: whole BlockSrc7 for one lane-packed batch group
# --------------------------------------------------------------------------
def _block_src7_kernel(x_ref,
                       w11_ref, b11_ref,
                       wa1_ref, ba1_ref, wa2_ref, ba2_ref,
                       wb1_ref, bb1_ref, wb2_ref, bb2_ref,
                       o_ref, *, Cin, Cout, W):
    """x_ref: (Cin, H, L) VMEM with the batch packed into the lane axis
    (L = B*W, lane = b*W + w).  o_ref: (Cout, H, L) VMEM.

    w*_ref: flattened BN-folded conv weights in SMEM (f32), layout [co, ci]
            for the 1x1 conv and [co, ci, k] for the 1x3 / 3x1 convs.
    b*_ref: folded BN bias per output channel in SMEM (f32).
    """
    _, H, L = x_ref.shape

    # Boundary masks, hoisted once and reused across every shift below.  The
    # per-image column mask (lane % W) also masks the seams between the images
    # packed into the lane axis, so pltpu.roll wrap-around never leaks data.
    lane = lax.broadcasted_iota(jnp.int32, (H, L), 1)
    col = jnp.bitwise_and(lane, W - 1) if (W & (W - 1)) == 0 else lane % W
    row = lax.broadcasted_iota(jnp.int32, (H, L), 0)
    valid_w = {+1: col != (W - 1), -1: col != 0}   # neighbour at w+d exists
    valid_h = {+1: row != (H - 1), -1: row != 0}   # neighbour at h+d exists

    def shift(p, d, axis):
        # q[h, w] = p[h, w + d] (axis=1) or p[h + d, w] (axis=0),
        # zero outside the image (== conv zero padding).
        if d == 0:
            return p
        size = L if axis == 1 else H
        rolled = pltpu.roll(p, (-d) % size, axis=axis)   # XLU slot
        mask = valid_w[d] if axis == 1 else valid_h[d]
        return jnp.where(mask, rolled, 0.0)

    def conv1x1_bn(planes, w_ref, b_ref, cin, cout):
        # 1x1 conv + folded BN (no activation) as VPU broadcast-FMAs.
        outs = [jnp.full((H, L), b_ref[co], jnp.float32) for co in range(cout)]
        for ci in range(cin):
            p = planes[ci]
            for co in range(cout):
                outs[co] = outs[co] + p * w_ref[co * cin + ci]
        return outs

    def conv3_bn_relu6(planes, w_ref, b_ref, cin, cout, axis):
        # (1,3) conv along W (axis=1) or (3,1) conv along H (axis=0), padding 1
        # on that axis, + folded BN + ReLU6.  Loop order (ci, k, co) so each
        # shifted plane is consumed immediately (small live vreg set).
        outs = [jnp.full((H, L), b_ref[co], jnp.float32) for co in range(cout)]
        for ci in range(cin):
            p = planes[ci]
            for k in range(3):
                s = shift(p, k - 1, axis)
                for co in range(cout):
                    outs[co] = outs[co] + s * w_ref[(co * cin + ci) * 3 + k]
        return [jnp.clip(o, 0.0, 6.0) for o in outs]

    xin = [x_ref[ci].astype(jnp.float32) for ci in range(Cin)]
    y0 = conv1x1_bn(xin, w11_ref, b11_ref, Cin, Cout)            # conv11
    t = conv3_bn_relu6(y0, wa1_ref, ba1_ref, Cout, Cout, 1)      # s_1 conv(1,3)
    t = conv3_bn_relu6(t, wa2_ref, ba2_ref, Cout, Cout, 0)       # s_1 conv(3,1)
    t = conv3_bn_relu6(t, wb1_ref, bb1_ref, Cout, Cout, 1)       # s_2 conv(1,3)
    t = conv3_bn_relu6(t, wb2_ref, bb2_ref, Cout, Cout, 0)       # s_2 conv(3,1)

    out = jnp.stack([jnp.maximum(y0[co] + t[co], 0.0) for co in range(Cout)],
                    axis=0)                                      # (Cout, H, L)
    o_ref[...] = out.astype(o_ref.dtype)


# --------------------------------------------------------------------------
# Wrapper
# --------------------------------------------------------------------------
def _choose_images_per_step(N, W):
    """Images packed per grid step.

    Prefer the largest split that (a) divides N, (b) keeps the packed minor
    dim (b*W) a multiple of 128 (full-width, unmasked vector stores) and
    (c) leaves >= 2 grid steps so both v7x TensorCores get work.  Otherwise
    process the whole batch in one step (on a single-TC part the grid is a
    serial loop and per-step overhead is pure cost; the whole problem fits
    trivially in VMEM either way).
    """
    for b in range(N - 1, 0, -1):
        if N % b == 0 and (b * W) % 128 == 0:
            return b
    return N


def block_src7(x_nchw, packed, *, C_in, C_out, stride=1):
    """x_nchw: (N, C_in, H, W).  packed: tuple of 10 folded weight/bias arrays."""
    N, C, H, W = x_nchw.shape
    assert C == C_in
    if stride > 1:
        # conv11 is 1x1 / stride s / pad 0: identical to subsample-then-1x1.
        x_nchw = x_nchw[:, :, ::stride, ::stride]
        H, W = x_nchw.shape[2], x_nchw.shape[3]

    b = _choose_images_per_step(N, W)        # images per grid step
    n_steps = N // b
    L = b * W

    # Lane-dense packing: (N, C, H, W) -> (C, H, N*W), lane = n*W + w.
    xp = jnp.transpose(x_nchw, (1, 2, 0, 3)).reshape(C_in, H, N * W)

    kernel = functools.partial(_block_src7_kernel, Cin=C_in, Cout=C_out, W=W)
    smem = pl.BlockSpec(memory_space=pltpu.MemorySpace.SMEM)
    out_packed = pl.pallas_call(
        kernel,
        out_shape=jax.ShapeDtypeStruct((C_out, H, N * W), x_nchw.dtype),
        grid=(n_steps,),
        in_specs=[pl.BlockSpec((C_in, H, L), lambda n: (0, 0, n))] + [smem] * 10,
        out_specs=pl.BlockSpec((C_out, H, L), lambda n: (0, 0, n)),
        compiler_params=pltpu.CompilerParams(
            dimension_semantics=("parallel",)),
    )(xp, *packed)

    # Unpack: (C_out, H, N*W) -> (N, C_out, H, W)
    return out_packed.reshape(C_out, H, N, W).transpose(2, 0, 1, 3)


# --------------------------------------------------------------------------
# Parameters: synthetic init (PyTorch layouts) + eval-mode BN folding / packing
# --------------------------------------------------------------------------
def init_params(key, C_in, C_out):
    """Raw params: conv weights in OIHW + BatchNorm (gamma, beta, mean, var)."""
    shapes = {
        "c11": (C_out, C_in, 1, 1),   # conv11
        "a1": (C_out, C_out, 1, 3),   # inception_s_1 conv(1,3)
        "a2": (C_out, C_out, 3, 1),   # inception_s_1 conv(3,1)
        "b1": (C_out, C_out, 1, 3),   # inception_s_2 conv(1,3)
        "b2": (C_out, C_out, 3, 1),   # inception_s_2 conv(3,1)
    }
    ks = jax.random.split(key, len(shapes))
    p = {}
    for k, (name, shp) in zip(ks, shapes.items()):
        kw, k1, k2, k3, k4 = jax.random.split(k, 5)
        c = shp[0]
        p[name + "_w"] = 0.2 * jax.random.normal(kw, shp, jnp.float32)
        p[name + "_g"] = 1.0 + 0.1 * jax.random.normal(k1, (c,), jnp.float32)
        p[name + "_b"] = 0.1 * jax.random.normal(k2, (c,), jnp.float32)
        p[name + "_m"] = 0.1 * jax.random.normal(k3, (c,), jnp.float32)
        p[name + "_v"] = 1.0 + 0.1 * jax.random.uniform(k4, (c,), jnp.float32)
    return p


def _fold(w, gamma, beta, mean, var, eps=BN_EPS):
    scale = gamma / jnp.sqrt(var + eps)               # (Cout,)
    w_folded = w * scale[:, None, None, None]         # scale folded into weights
    bias = beta - mean * scale
    return (jnp.asarray(w_folded, jnp.float32).reshape(-1),
            jnp.asarray(bias, jnp.float32))


def pack_params(p):
    """Fold BN into conv weights and flatten for SMEM (kernel argument order)."""
    out = []
    for name in ("c11", "a1", "a2", "b1", "b2"):
        wf, bf = _fold(p[name + "_w"], p[name + "_g"], p[name + "_b"],
                       p[name + "_m"], p[name + "_v"])
        out += [wf, bf]
    return tuple(out)


# --------------------------------------------------------------------------
# Pure-JAX reference (eval-mode BN) for the correctness check
# --------------------------------------------------------------------------
def _ref_convbn(x, w, g, b, m, v, stride, padding, act):
    y = lax.conv_general_dilated(
        x, w, (stride, stride),
        ((padding[0], padding[0]), (padding[1], padding[1])),
        dimension_numbers=("NCHW", "OIHW", "NCHW"),
        precision=lax.Precision.HIGHEST)
    scale = g / jnp.sqrt(v + BN_EPS)
    y = y * scale[None, :, None, None] + (b - m * scale)[None, :, None, None]
    if act == "relu6":
        y = jnp.clip(y, 0.0, 6.0)
    return y


def block_src7_ref(x, p, *, stride=1):
    y0 = _ref_convbn(x, p["c11_w"], p["c11_g"], p["c11_b"], p["c11_m"],
                     p["c11_v"], stride, (0, 0), "none")
    t = _ref_convbn(y0, p["a1_w"], p["a1_g"], p["a1_b"], p["a1_m"], p["a1_v"],
                    1, (0, 1), "relu6")
    t = _ref_convbn(t, p["a2_w"], p["a2_g"], p["a2_b"], p["a2_m"], p["a2_v"],
                    1, (1, 0), "relu6")
    t = _ref_convbn(t, p["b1_w"], p["b1_g"], p["b1_b"], p["b1_m"], p["b1_v"],
                    1, (0, 1), "relu6")
    t = _ref_convbn(t, p["b2_w"], p["b2_g"], p["b2_b"], p["b2_m"], p["b2_v"],
                    1, (1, 0), "relu6")
    return jnp.maximum(y0 + t, 0.0)


# --------------------------------------------------------------------------
if __name__ == "__main__":
    key = jax.random.PRNGKey(0)
    k_x, k_p = jax.random.split(key)

    N, C_in, C_out, H, W = 2, 4, 4, 16, 16
    x = jax.random.normal(k_x, (N, C_in, H, W), jnp.float32)   # NCHW, like PyTorch
    params = init_params(k_p, C_in, C_out)
    packed = pack_params(params)        # BN folded outside the jitted path

    fwd = jax.jit(functools.partial(block_src7, C_in=C_in, C_out=C_out, stride=1))
    out = jax.block_until_ready(fwd(x, packed))

    ref = block_src7_ref(x, params, stride=1)
    np.testing.assert_allclose(np.asarray(out), np.asarray(ref),
                               atol=1e-4, rtol=1e-4)

    print("KERNEL_OK")
</pallas_src>

<mosaic_0001>
module attributes {stable_mosaic.version = 11 : i64} {
  func.func @_block_src7_kernel(%arg0: i32, %arg1: memref<4x16x32xf32, #tpu.memory_space<vmem>>, %arg2: memref<16xf32, #tpu.memory_space<smem>>, %arg3: memref<4xf32, #tpu.memory_space<smem>>, %arg4: memref<48xf32, #tpu.memory_space<smem>>, %arg5: memref<4xf32, #tpu.memory_space<smem>>, %arg6: memref<48xf32, #tpu.memory_space<smem>>, %arg7: memref<4xf32, #tpu.memory_space<smem>>, %arg8: memref<48xf32, #tpu.memory_space<smem>>, %arg9: memref<4xf32, #tpu.memory_space<smem>>, %arg10: memref<48xf32, #tpu.memory_space<smem>>, %arg11: memref<4xf32, #tpu.memory_space<smem>>, %arg12: memref<4x16x32xf32, #tpu.memory_space<vmem>>) attributes {dimension_semantics = [#tpu.dimension_semantics<parallel>], iteration_bounds = array<i64: 1>, scalar_prefetch = 0 : i64, scratch_operands = 0 : i64, tpu.core_type = #tpu.core_type<tc>, window_params = [{transform_indices = @transform_0, window_bounds = array<i64: 4, 16, 32>}, {transform_indices = @transform_1, window_bounds = array<i64: 16>}, {transform_indices = @transform_2, window_bounds = array<i64: 4>}, {transform_indices = @transform_3, window_bounds = array<i64: 48>}, {transform_indices = @transform_4, window_bounds = array<i64: 4>}, {transform_indices = @transform_5, window_bounds = array<i64: 48>}, {transform_indices = @transform_6, window_bounds = array<i64: 4>}, {transform_indices = @transform_7, window_bounds = array<i64: 48>}, {transform_indices = @transform_8, window_bounds = array<i64: 4>}, {transform_indices = @transform_9, window_bounds = array<i64: 48>}, {transform_indices = @transform_10, window_bounds = array<i64: 4>}, {transform_indices = @transform_11, window_bounds = array<i64: 4, 16, 32>}]} {
    %0 = tpu.iota {dimensions = array<i32: 1>} : vector<16x32xi32>
    %c15_i32 = arith.constant 15 : i32
    %1 = vector.broadcast %c15_i32 : i32 to vector<16x32xi32>
    %2 = arith.andi %0, %1 : vector<16x32xi32>
    %3 = tpu.iota {dimensions = array<i32: 0>} : vector<16x32xi32>
    %c15_i32_0 = arith.constant 15 : i32
    %4 = vector.broadcast %c15_i32_0 : i32 to vector<16x32xi32>
    %5 = arith.cmpi ne, %2, %4 : vector<16x32xi32>
    %c0_i32 = arith.constant 0 : i32
    %6 = vector.broadcast %c0_i32 : i32 to vector<16x32xi32>
    %7 = arith.cmpi ne, %2, %6 : vector<16x32xi32>
    %c15_i32_1 = arith.constant 15 : i32
    %8 = vector.broadcast %c15_i32_1 : i32 to vector<16x32xi32>
    %9 = arith.cmpi ne, %3, %8 : vector<16x32xi32>
    %c0_i32_2 = arith.constant 0 : i32
    %10 = vector.broadcast %c0_i32_2 : i32 to vector<16x32xi32>
    %11 = arith.cmpi ne, %3, %10 : vector<16x32xi32>
    %c0 = arith.constant 0 : index
    %c0_3 = arith.constant 0 : index
    %c0_4 = arith.constant 0 : index
    %12 = vector.load %arg1[%c0, %c0_3, %c0_4] : memref<4x16x32xf32, #tpu.memory_space<vmem>>, vector<1x16x32xf32>
    %13 = vector.shape_cast %12 : vector<1x16x32xf32> to vector<16x32xf32>
    %c1 = arith.constant 1 : index
    %c0_5 = arith.constant 0 : index
    %c0_6 = arith.constant 0 : index
    %14 = vector.load %arg1[%c1, %c0_5, %c0_6] : memref<4x16x32xf32, #tpu.memory_space<vmem>>, vector<1x16x32xf32>
    %15 = vector.shape_cast %14 : vector<1x16x32xf32> to vector<16x32xf32>
    %c2 = arith.constant 2 : index
    %c0_7 = arith.constant 0 : index
    %c0_8 = arith.constant 0 : index
    %16 = vector.load %arg1[%c2, %c0_7, %c0_8] : memref<4x16x32xf32, #tpu.memory_space<vmem>>, vector<1x16x32xf32>
    %17 = vector.shape_cast %16 : vector<1x16x32xf32> to vector<16x32xf32>
    %c3 = arith.constant 3 : index
    %c0_9 = arith.constant 0 : index
    %c0_10 = arith.constant 0 : index
    %18 = vector.load %arg1[%c3, %c0_9, %c0_10] : memref<4x16x32xf32, #tpu.memory_space<vmem>>, vector<1x16x32xf32>
    %19 = vector.shape_cast %18 : vector<1x16x32xf32> to vector<16x32xf32>
    %c0_11 = arith.constant 0 : index
    %20 = memref.load %arg3[%c0_11] : memref<4xf32, #tpu.memory_space<smem>>
    %21 = vector.broadcast %20 : f32 to vector<16x32xf32>
    %c1_12 = arith.constant 1 : index
    %22 = memref.load %arg3[%c1_12] : memref<4xf32, #tpu.memory_space<smem>>
    %23 = vector.broadcast %22 : f32 to vector<16x32xf32>
    %c2_13 = arith.constant 2 : index
    %24 = memref.load %arg3[%c2_13] : memref<4xf32, #tpu.memory_space<smem>>
    %25 = vector.broadcast %24 : f32 to vector<16x32xf32>
    %c3_14 = arith.constant 3 : index
    %26 = memref.load %arg3[%c3_14] : memref<4xf32, #tpu.memory_space<smem>>
    %27 = vector.broadcast %26 : f32 to vector<16x32xf32>
    %c0_15 = arith.constant 0 : index
    %28 = memref.load %arg2[%c0_15] : memref<16xf32, #tpu.memory_space<smem>>
    %29 = vector.broadcast %28 : f32 to vector<16x32xf32>
    %30 = arith.mulf %13, %29 : vector<16x32xf32>
    %31 = arith.addf %21, %30 : vector<16x32xf32>
    %c4 = arith.constant 4 : index
    %32 = memref.load %arg2[%c4] : memref<16xf32, #tpu.memory_space<smem>>
    %33 = vector.broadcast %32 : f32 to vector<16x32xf32>
    %34 = arith.mulf %13, %33 : vector<16x32xf32>
    %35 = arith.addf %23, %34 : vector<16x32xf32>
    %c8 = arith.constant 8 : index
    %36 = memref.load %arg2[%c8] : memref<16xf32, #tpu.memory_space<smem>>
    %37 = vector.broadcast %36 : f32 to vector<16x32xf32>
    %38 = arith.mulf %13, %37 : vector<16x32xf32>
    %39 = arith.addf %25, %38 : vector<16x32xf32>
    %c12 = arith.constant 12 : index
    %40 = memref.load %arg2[%c12] : memref<16xf32, #tpu.memory_space<smem>>
    %41 = vector.broadcast %40 : f32 to vector<16x32xf32>
    %42 = arith.mulf %13, %41 : vector<16x32xf32>
    %43 = arith.addf %27, %42 : vector<16x32xf32>
    %c1_16 = arith.constant 1 : index
    %44 = memref.load %arg2[%c1_16] : memref<16xf32, #tpu.memory_space<smem>>
    %45 = vector.broadcast %44 : f32 to vector<16x32xf32>
    %46 = arith.mulf %15, %45 : vector<16x32xf32>
    %47 = arith.addf %31, %46 : vector<16x32xf32>
    %c5 = arith.constant 5 : index
    %48 = memref.load %arg2[%c5] : memref<16xf32, #tpu.memory_space<smem>>
    %49 = vector.broadcast %48 : f32 to vector<16x32xf32>
    %50 = arith.mulf %15, %49 : vector<16x32xf32>
    %51 = arith.addf %35, %50 : vector<16x32xf32>
    %c9 = arith.constant 9 : index
    %52 = memref.load %arg2[%c9] : memref<16xf32, #tpu.memory_space<smem>>
    %53 = vector.broadcast %52 : f32 to vector<16x32xf32>
    %54 = arith.mulf %15, %53 : vector<16x32xf32>
    %55 = arith.addf %39, %54 : vector<16x32xf32>
    %c13 = arith.constant 13 : index
    %56 = memref.load %arg2[%c13] : memref<16xf32, #tpu.memory_space<smem>>
    %57 = vector.broadcast %56 : f32 to vector<16x32xf32>
    %58 = arith.mulf %15, %57 : vector<16x32xf32>
    %59 = arith.addf %43, %58 : vector<16x32xf32>
    %c2_17 = arith.constant 2 : index
    %60 = memref.load %arg2[%c2_17] : memref<16xf32, #tpu.memory_space<smem>>
    %61 = vector.broadcast %60 : f32 to vector<16x32xf32>
    %62 = arith.mulf %17, %61 : vector<16x32xf32>
    %63 = arith.addf %47, %62 : vector<16x32xf32>
    %c6 = arith.constant 6 : index
    %64 = memref.load %arg2[%c6] : memref<16xf32, #tpu.memory_space<smem>>
    %65 = vector.broadcast %64 : f32 to vector<16x32xf32>
    %66 = arith.mulf %17, %65 : vector<16x32xf32>
    %67 = arith.addf %51, %66 : vector<16x32xf32>
    %c10 = arith.constant 10 : index
    %68 = memref.load %arg2[%c10] : memref<16xf32, #tpu.memory_space<smem>>
    %69 = vector.broadcast %68 : f32 to vector<16x32xf32>
    %70 = arith.mulf %17, %69 : vector<16x32xf32>
    %71 = arith.addf %55, %70 : vector<16x32xf32>
    %c14 = arith.constant 14 : index
    %72 = memref.load %arg2[%c14] : memref<16xf32, #tpu.memory_space<smem>>
    %73 = vector.broadcast %72 : f32 to vector<16x32xf32>
    %74 = arith.mulf %17, %73 : vector<16x32xf32>
    %75 = arith.addf %59, %74 : vector<16x32xf32>
    %c3_18 = arith.constant 3 : index
    %76 = memref.load %arg2[%c3_18] : memref<16xf32, #tpu.memory_space<smem>>
    %77 = vector.broadcast %76 : f32 to vector<16x32xf32>
    %78 = arith.mulf %19, %77 : vector<16x32xf32>
    %79 = arith.addf %63, %78 : vector<16x32xf32>
    %c7 = arith.constant 7 : index
    %80 = memref.load %arg2[%c7] : memref<16xf32, #tpu.memory_space<smem>>
    %81 = vector.broadcast %80 : f32 to vector<16x32xf32>
    %82 = arith.mulf %19, %81 : vector<16x32xf32>
    %83 = arith.addf %67, %82 : vector<16x32xf32>
    %c11 = arith.constant 11 : index
    %84 = memref.load %arg2[%c11] : memref<16xf32, #tpu.memory_space<smem>>
    %85 = vector.broadcast %84 : f32 to vector<16x32xf32>
    %86 = arith.mulf %19, %85 : vector<16x32xf32>
    %87 = arith.addf %71, %86 : vector<16x32xf32>
    %c15 = arith.constant 15 : index
    %88 = memref.load %arg2[%c15] : memref<16xf32, #tpu.memory_space<smem>>
    %89 = vector.broadcast %88 : f32 to vector<16x32xf32>
    %90 = arith.mulf %19, %89 : vector<16x32xf32>
    %91 = arith.addf %75, %90 : vector<16x32xf32>
    %c0_19 = arith.constant 0 : index
    %92 = memref.load %arg5[%c0_19] : memref<4xf32, #tpu.memory_space<smem>>
    %93 = vector.broadcast %92 : f32 to vector<16x32xf32>
    %c1_20 = arith.constant 1 : index
    %94 = memref.load %arg5[%c1_20] : memref<4xf32, #tpu.memory_space<smem>>
    %95 = vector.broadcast %94 : f32 to vector<16x32xf32>
    %c2_21 = arith.constant 2 : index
    %96 = memref.load %arg5[%c2_21] : memref<4xf32, #tpu.memory_space<smem>>
    %97 = vector.broadcast %96 : f32 to vector<16x32xf32>
    %c3_22 = arith.constant 3 : index
    %98 = memref.load %arg5[%c3_22] : memref<4xf32, #tpu.memory_space<smem>>
    %99 = vector.broadcast %98 : f32 to vector<16x32xf32>
    %c1_i32 = arith.constant 1 : i32
    %100 = tpu.dynamic_rotate %79 by %c1_i32 dim 1 : vector<16x32xf32>, i32 -> vector<16x32xf32>
    %cst = arith.constant 0.000000e+00 : f32
    %101 = vector.broadcast %cst : f32 to vector<16x32xf32>
    %102 = arith.select %7, %100, %101 : vector<16x32xi1>, vector<16x32xf32>
    %c0_23 = arith.constant 0 : index
    %103 = memref.load %arg4[%c0_23] : memref<48xf32, #tpu.memory_space<smem>>
    %104 = vector.broadcast %103 : f32 to vector<16x32xf32>
    %105 = arith.mulf %102, %104 : vector<16x32xf32>
    %106 = arith.addf %93, %105 : vector<16x32xf32>
    %c12_24 = arith.constant 12 : index
    %107 = memref.load %arg4[%c12_24] : memref<48xf32, #tpu.memory_space<smem>>
    %108 = vector.broadcast %107 : f32 to vector<16x32xf32>
    %109 = arith.mulf %102, %108 : vector<16x32xf32>
    %110 = arith.addf %95, %109 : vector<16x32xf32>
    %c24 = arith.constant 24 : index
    %111 = memref.load %arg4[%c24] : memref<48xf32, #tpu.memory_space<smem>>
    %112 = vector.broadcast %111 : f32 to vector<16x32xf32>
    %113 = arith.mulf %102, %112 : vector<16x32xf32>
    %114 = arith.addf %97, %113 : vector<16x32xf32>
    %c36 = arith.constant 36 : index
    %115 = memref.load %arg4[%c36] : memref<48xf32, #tpu.memory_space<smem>>
    %116 = vector.broadcast %115 : f32 to vector<16x32xf32>
    %117 = arith.mulf %102, %116 : vector<16x32xf32>
    %118 = arith.addf %99, %117 : vector<16x32xf32>
    %c1_25 = arith.constant 1 : index
    %119 = memref.load %arg4[%c1_25] : memref<48xf32, #tpu.memory_space<smem>>
    %120 = vector.broadcast %119 : f32 to vector<16x32xf32>
    %121 = arith.mulf %79, %120 : vector<16x32xf32>
    %122 = arith.addf %106, %121 : vector<16x32xf32>
    %c13_26 = arith.constant 13 : index
    %123 = memref.load %arg4[%c13_26] : memref<48xf32, #tpu.memory_space<smem>>
    %124 = vector.broadcast %123 : f32 to vector<16x32xf32>
    %125 = arith.mulf %79, %124 : vector<16x32xf32>
    %126 = arith.addf %110, %125 : vector<16x32xf32>
    %c25 = arith.constant 25 : index
    %127 = memref.load %arg4[%c25] : memref<48xf32, #tpu.memory_space<smem>>
    %128 = vector.broadcast %127 : f32 to vector<16x32xf32>
    %129 = arith.mulf %79, %128 : vector<16x32xf32>
    %130 = arith.addf %114, %129 : vector<16x32xf32>
    %c37 = arith.constant 37 : index
    %131 = memref.load %arg4[%c37] : memref<48xf32, #tpu.memory_space<smem>>
    %132 = vector.broadcast %131 : f32 to vector<16x32xf32>
    %133 = arith.mulf %79, %132 : vector<16x32xf32>
    %134 = arith.addf %118, %133 : vector<16x32xf32>
    %c31_i32 = arith.constant 31 : i32
    %135 = tpu.dynamic_rotate %79 by %c31_i32 dim 1 : vector<16x32xf32>, i32 -> vector<16x32xf32>
    %cst_27 = arith.constant 0.000000e+00 : f32
    %136 = vector.broadcast %cst_27 : f32 to vector<16x32xf32>
    %137 = arith.select %5, %135, %136 : vector<16x32xi1>, vector<16x32xf32>
    %c2_28 = arith.constant 2 : index
    %138 = memref.load %arg4[%c2_28] : memref<48xf32, #tpu.memory_space<smem>>
    %139 = vector.broadcast %138 : f32 to vector<16x32xf32>
    %140 = arith.mulf %137, %139 : vector<16x32xf32>
    %141 = arith.addf %122, %140 : vector<16x32xf32>
    %c14_29 = arith.constant 14 : index
    %142 = memref.load %arg4[%c14_29] : memref<48xf32, #tpu.memory_space<smem>>
    %143 = vector.broadcast %142 : f32 to vector<16x32xf32>
    %144 = arith.mulf %137, %143 : vector<16x32xf32>
    %145 = arith.addf %126, %144 : vector<16x32xf32>
    %c26 = arith.constant 26 : index
    %146 = memref.load %arg4[%c26] : memref<48xf32, #tpu.memory_space<smem>>
    %147 = vector.broadcast %146 : f32 to vector<16x32xf32>
    %148 = arith.mulf %137, %147 : vector<16x32xf32>
    %149 = arith.addf %130, %148 : vector<16x32xf32>
    %c38 = arith.constant 38 : index
    %150 = memref.load %arg4[%c38] : memref<48xf32, #tpu.memory_space<smem>>
    %151 = vector.broadcast %150 : f32 to vector<16x32xf32>
    %152 = arith.mulf %137, %151 : vector<16x32xf32>
    %153 = arith.addf %134, %152 : vector<16x32xf32>
    %c1_i32_30 = arith.constant 1 : i32
    %154 = tpu.dynamic_rotate %83 by %c1_i32_30 dim 1 : vector<16x32xf32>, i32 -> vector<16x32xf32>
    %cst_31 = arith.constant 0.000000e+00 : f32
    %155 = vector.broadcast %cst_31 : f32 to vector<16x32xf32>
    %156 = arith.select %7, %154, %155 : vector<16x32xi1>, vector<16x32xf32>
    %c3_32 = arith.constant 3 : index
    %157 = memref.load %arg4[%c3_32] : memref<48xf32, #tpu.memory_space<smem>>
    %158 = vector.broadcast %157 : f32 to vector<16x32xf32>
    %159 = arith.mulf %156, %158 : vector<16x32xf32>
    %160 = arith.addf %141, %159 : vector<16x32xf32>
    %c15_33 = arith.constant 15 : index
    %161 = memref.load %arg4[%c15_33] : memref<48xf32, #tpu.memory_space<smem>>
    %162 = vector.broadcast %161 : f32 to vector<16x32xf32>
    %163 = arith.mulf %156, %162 : vector<16x32xf32>
    %164 = arith.addf %145, %163 : vector<16x32xf32>
    %c27 = arith.constant 27 : index
    %165 = memref.load %arg4[%c27] : memref<48xf32, #tpu.memory_space<smem>>
    %166 = vector.broadcast %165 : f32 to vector<16x32xf32>
    %167 = arith.mulf %156, %166 : vector<16x32xf32>
    %168 = arith.addf %149, %167 : vector<16x32xf32>
    %c39 = arith.constant 39 : index
    %169 = memref.load %arg4[%c39] : memref<48xf32, #tpu.memory_space<smem>>
    %170 = vector.broadcast %169 : f32 to vector<16x32xf32>
    %171 = arith.mulf %156, %170 : vector<16x32xf32>
    %172 = arith.addf %153, %171 : vector<16x32xf32>
    %c4_34 = arith.constant 4 : index
    %173 = memref.load %arg4[%c4_34] : memref<48xf32, #tpu.memory_space<smem>>
    %174 = vector.broadcast %173 : f32 to vector<16x32xf32>
    %175 = arith.mulf %83, %174 : vector<16x32xf32>
    %176 = arith.addf %160, %175 : vector<16x32xf32>
    %c16 = arith.constant 16 : index
    %177 = memref.load %arg4[%c16] : memref<48xf32, #tpu.memory_space<smem>>
    %178 = vector.broadcast %177 : f32 to vector<16x32xf32>
    %179 = arith.mulf %83, %178 : vector<16x32xf32>
    %180 = arith.addf %164, %179 : vector<16x32xf32>
    %c28 = arith.constant 28 : index
    %181 = memref.load %arg4[%c28] : memref<48xf32, #tpu.memory_space<smem>>
    %182 = vector.broadcast %181 : f32 to vector<16x32xf32>
    %183 = arith.mulf %83, %182 : vector<16x32xf32>
    %184 = arith.addf %168, %183 : vector<16x32xf32>
    %c40 = arith.constant 40 : index
    %185 = memref.load %arg4[%c40] : memref<48xf32, #tpu.memory_space<smem>>
    %186 = vector.broadcast %185 : f32 to vector<16x32xf32>
    %187 = arith.mulf %83, %186 : vector<16x32xf32>
    %188 = arith.addf %172, %187 : vector<16x32xf32>
    %c31_i32_35 = arith.constant 31 : i32
    %189 = tpu.dynamic_rotate %83 by %c31_i32_35 dim 1 : vector<16x32xf32>, i32 -> vector<16x32xf32>
    %cst_36 = arith.constant 0.000000e+00 : f32
    %190 = vector.broadcast %cst_36 : f32 to vector<16x32xf32>
    %191 = arith.select %5, %189, %190 : vector<16x32xi1>, vector<16x32xf32>
    %c5_37 = arith.constant 5 : index
    %192 = memref.load %arg4[%c5_37] : memref<48xf32, #tpu.memory_space<smem>>
    %193 = vector.broadcast %192 : f32 to vector<16x32xf32>
    %194 = arith.mulf %191, %193 : vector<16x32xf32>
    %195 = arith.addf %176, %194 : vector<16x32xf32>
    %c17 = arith.constant 17 : index
    %196 = memref.load %arg4[%c17] : memref<48xf32, #tpu.memory_space<smem>>
    %197 = vector.broadcast %196 : f32 to vector<16x32xf32>
    %198 = arith.mulf %191, %197 : vector<16x32xf32>
    %199 = arith.addf %180, %198 : vector<16x32xf32>
    %c29 = arith.constant 29 : index
    %200 = memref.load %arg4[%c29] : memref<48xf32, #tpu.memory_space<smem>>
    %201 = vector.broadcast %200 : f32 to vector<16x32xf32>
    %202 = arith.mulf %191, %201 : vector<16x32xf32>
    %203 = arith.addf %184, %202 : vector<16x32xf32>
    %c41 = arith.constant 41 : index
    %204 = memref.load %arg4[%c41] : memref<48xf32, #tpu.memory_space<smem>>
    %205 = vector.broadcast %204 : f32 to vector<16x32xf32>
    %206 = arith.mulf %191, %205 : vector<16x32xf32>
    %207 = arith.addf %188, %206 : vector<16x32xf32>
    %c1_i32_38 = arith.constant 1 : i32
    %208 = tpu.dynamic_rotate %87 by %c1_i32_38 dim 1 : vector<16x32xf32>, i32 -> vector<16x32xf32>
    %cst_39 = arith.constant 0.000000e+00 : f32
    %209 = vector.broadcast %cst_39 : f32 to vector<16x32xf32>
    %210 = arith.select %7, %208, %209 : vector<16x32xi1>, vector<16x32xf32>
    %c6_40 = arith.constant 6 : index
    %211 = memref.load %arg4[%c6_40] : memref<48xf32, #tpu.memory_space<smem>>
    %212 = vector.broadcast %211 : f32 to vector<16x32xf32>
    %213 = arith.mulf %210, %212 : vector<16x32xf32>
    %214 = arith.addf %195, %213 : vector<16x32xf32>
    %c18 = arith.constant 18 : index
    %215 = memref.load %arg4[%c18] : memref<48xf32, #tpu.memory_space<smem>>
    %216 = vector.broadcast %215 : f32 to vector<16x32xf32>
    %217 = arith.mulf %210, %216 : vector<16x32xf32>
    %218 = arith.addf %199, %217 : vector<16x32xf32>
    %c30 = arith.constant 30 : index
    %219 = memref.load %arg4[%c30] : memref<48xf32, #tpu.memory_space<smem>>
    %220 = vector.broadcast %219 : f32 to vector<16x32xf32>
    %221 = arith.mulf %210, %220 : vector<16x32xf32>
    %222 = arith.addf %203, %221 : vector<16x32xf32>
    %c42 = arith.constant 42 : index
    %223 = memref.load %arg4[%c42] : memref<48xf32, #tpu.memory_space<smem>>
    %224 = vector.broadcast %223 : f32 to vector<16x32xf32>
    %225 = arith.mulf %210, %224 : vector<16x32xf32>
    %226 = arith.addf %207, %225 : vector<16x32xf32>
    %c7_41 = arith.constant 7 : index
    %227 = memref.load %arg4[%c7_41] : memref<48xf32, #tpu.memory_space<smem>>
    %228 = vector.broadcast %227 : f32 to vector<16x32xf32>
    %229 = arith.mulf %87, %228 : vector<16x32xf32>
    %230 = arith.addf %214, %229 : vector<16x32xf32>
    %c19 = arith.constant 19 : index
    %231 = memref.load %arg4[%c19] : memref<48xf32, #tpu.memory_space<smem>>
    %232 = vector.broadcast %231 : f32 to vector<16x32xf32>
    %233 = arith.mulf %87, %232 : vector<16x32xf32>
    %234 = arith.addf %218, %233 : vector<16x32xf32>
    %c31 = arith.constant 31 : index
    %235 = memref.load %arg4[%c31] : memref<48xf32, #tpu.memory_space<smem>>
    %236 = vector.broadcast %235 : f32 to vector<16x32xf32>
    %237 = arith.mulf %87, %236 : vector<16x32xf32>
    %238 = arith.addf %222, %237 : vector<16x32xf32>
    %c43 = arith.constant 43 : index
    %239 = memref.load %arg4[%c43] : memref<48xf32, #tpu.memory_space<smem>>
    %240 = vector.broadcast %239 : f32 to vector<16x32xf32>
    %241 = arith.mulf %87, %240 : vector<16x32xf32>
    %242 = arith.addf %226, %241 : vector<16x32xf32>
    %c31_i32_42 = arith.constant 31 : i32
    %243 = tpu.dynamic_rotate %87 by %c31_i32_42 dim 1 : vector<16x32xf32>, i32 -> vector<16x32xf32>
    %cst_43 = arith.constant 0.000000e+00 : f32
    %244 = vector.broadcast %cst_43 : f32 to vector<16x32xf32>
    %245 = arith.select %5, %243, %244 : vector<16x32xi1>, vector<16x32xf32>
    %c8_44 = arith.constant 8 : index
    %246 = memref.load %arg4[%c8_44] : memref<48xf32, #tpu.memory_space<smem>>
    %247 = vector.broadcast %246 : f32 to vector<16x32xf32>
    %248 = arith.mulf %245, %247 : vector<16x32xf32>
    %249 = arith.addf %230, %248 : vector<16x32xf32>
    %c20 = arith.constant 20 : index
    %250 = memref.load %arg4[%c20] : memref<48xf32, #tpu.memory_space<smem>>
    %251 = vector.broadcast %250 : f32 to vector<16x32xf32>
    %252 = arith.mulf %245, %251 : vector<16x32xf32>
    %253 = arith.addf %234, %252 : vector<16x32xf32>
    %c32 = arith.constant 32 : index
    %254 = memref.load %arg4[%c32] : memref<48xf32, #tpu.memory_space<smem>>
    %255 = vector.broadcast %254 : f32 to vector<16x32xf32>
    %256 = arith.mulf %245, %255 : vector<16x32xf32>
    %257 = arith.addf %238, %256 : vector<16x32xf32>
    %c44 = arith.constant 44 : index
    %258 = memref.load %arg4[%c44] : memref<48xf32, #tpu.memory_space<smem>>
    %259 = vector.broadcast %258 : f32 to vector<16x32xf32>
    %260 = arith.mulf %245, %259 : vector<16x32xf32>
    %261 = arith.addf %242, %260 : vector<16x32xf32>
    %c1_i32_45 = arith.constant 1 : i32
    %262 = tpu.dynamic_rotate %91 by %c1_i32_45 dim 1 : vector<16x32xf32>, i32 -> vector<16x32xf32>
    %cst_46 = arith.constant 0.000000e+00 : f32
    %263 = vector.broadcast %cst_46 : f32 to vector<16x32xf32>
    %264 = arith.select %7, %262, %263 : vector<16x32xi1>, vector<16x32xf32>
    %c9_47 = arith.constant 9 : index
    %265 = memref.load %arg4[%c9_47] : memref<48xf32, #tpu.memory_space<smem>>
    %266 = vector.broadcast %265 : f32 to vector<16x32xf32>
    %267 = arith.mulf %264, %266 : vector<16x32xf32>
    %268 = arith.addf %249, %267 : vector<16x32xf32>
    %c21 = arith.constant 21 : index
    %269 = memref.load %arg4[%c21] : memref<48xf32, #tpu.memory_space<smem>>
    %270 = vector.broadcast %269 : f32 to vector<16x32xf32>
    %271 = arith.mulf %264, %270 : vector<16x32xf32>
    %272 = arith.addf %253, %271 : vector<16x32xf32>
    %c33 = arith.constant 33 : index
    %273 = memref.load %arg4[%c33] : memref<48xf32, #tpu.memory_space<smem>>
    %274 = vector.broadcast %273 : f32 to vector<16x32xf32>
    %275 = arith.mulf %264, %274 : vector<16x32xf32>
    %276 = arith.addf %257, %275 : vector<16x32xf32>
    %c45 = arith.constant 45 : index
    %277 = memref.load %arg4[%c45] : memref<48xf32, #tpu.memory_space<smem>>
    %278 = vector.broadcast %277 : f32 to vector<16x32xf32>
    %279 = arith.mulf %264, %278 : vector<16x32xf32>
    %280 = arith.addf %261, %279 : vector<16x32xf32>
    %c10_48 = arith.constant 10 : index
    %281 = memref.load %arg4[%c10_48] : memref<48xf32, #tpu.memory_space<smem>>
    %282 = vector.broadcast %281 : f32 to vector<16x32xf32>
    %283 = arith.mulf %91, %282 : vector<16x32xf32>
    %284 = arith.addf %268, %283 : vector<16x32xf32>
    %c22 = arith.constant 22 : index
    %285 = memref.load %arg4[%c22] : memref<48xf32, #tpu.memory_space<smem>>
    %286 = vector.broadcast %285 : f32 to vector<16x32xf32>
    %287 = arith.mulf %91, %286 : vector<16x32xf32>
    %288 = arith.addf %272, %287 : vector<16x32xf32>
    %c34 = arith.constant 34 : index
    %289 = memref.load %arg4[%c34] : memref<48xf32, #tpu.memory_space<smem>>
    %290 = vector.broadcast %289 : f32 to vector<16x32xf32>
    %291 = arith.mulf %91, %290 : vector<16x32xf32>
    %292 = arith.addf %276, %291 : vector<16x32xf32>
    %c46 = arith.constant 46 : index
    %293 = memref.load %arg4[%c46] : memref<48xf32, #tpu.memory_space<smem>>
    %294 = vector.broadcast %293 : f32 to vector<16x32xf32>
    %295 = arith.mulf %91, %294 : vector<16x32xf32>
    %296 = arith.addf %280, %295 : vector<16x32xf32>
    %c31_i32_49 = arith.constant 31 : i32
    %297 = tpu.dynamic_rotate %91 by %c31_i32_49 dim 1 : vector<16x32xf32>, i32 -> vector<16x32xf32>
    %cst_50 = arith.constant 0.000000e+00 : f32
    %298 = vector.broadcast %cst_50 : f32 to vector<16x32xf32>
    %299 = arith.select %5, %297, %298 : vector<16x32xi1>, vector<16x32xf32>
    %c11_51 = arith.constant 11 : index
    %300 = memref.load %arg4[%c11_51] : memref<48xf32, #tpu.memory_space<smem>>
    %301 = vector.broadcast %300 : f32 to vector<16x32xf32>
    %302 = arith.mulf %299, %301 : vector<16x32xf32>
    %303 = arith.addf %284, %302 : vector<16x32xf32>
    %c23 = arith.constant 23 : index
    %304 = memref.load %arg4[%c23] : memref<48xf32, #tpu.memory_space<smem>>
    %305 = vector.broadcast %304 : f32 to vector<16x32xf32>
    %306 = arith.mulf %299, %305 : vector<16x32xf32>
    %307 = arith.addf %288, %306 : vector<16x32xf32>
    %c35 = arith.constant 35 : index
    %308 = memref.load %arg4[%c35] : memref<48xf32, #tpu.memory_space<smem>>
    %309 = vector.broadcast %308 : f32 to vector<16x32xf32>
    %310 = arith.mulf %299, %309 : vector<16x32xf32>
    %311 = arith.addf %292, %310 : vector<16x32xf32>
    %c47 = arith.constant 47 : index
    %312 = memref.load %arg4[%c47] : memref<48xf32, #tpu.memory_space<smem>>
    %313 = vector.broadcast %312 : f32 to vector<16x32xf32>
    %314 = arith.mulf %299, %313 : vector<16x32xf32>
    %315 = arith.addf %296, %314 : vector<16x32xf32>
    %cst_52 = arith.constant 0.000000e+00 : f32
    %cst_53 = arith.constant 6.000000e+00 : f32
    %316 = vector.broadcast %cst_52 : f32 to vector<16x32xf32>
    %317 = arith.maximumf %316, %303 : vector<16x32xf32>
    %318 = vector.broadcast %cst_53 : f32 to vector<16x32xf32>
    %319 = arith.minimumf %318, %317 : vector<16x32xf32>
    %cst_54 = arith.constant 0.000000e+00 : f32
    %cst_55 = arith.constant 6.000000e+00 : f32
    %320 = vector.broadcast %cst_54 : f32 to vector<16x32xf32>
    %321 = arith.maximumf %320, %307 : vector<16x32xf32>
    %322 = vector.broadcast %cst_55 : f32 to vector<16x32xf32>
    %323 = arith.minimumf %322, %321 : vector<16x32xf32>
    %cst_56 = arith.constant 0.000000e+00 : f32
    %cst_57 = arith.constant 6.000000e+00 : f32
    %324 = vector.broadcast %cst_56 : f32 to vector<16x32xf32>
    %325 = arith.maximumf %324, %311 : vector<16x32xf32>
    %326 = vector.broadcast %cst_57 : f32 to vector<16x32xf32>
    %327 = arith.minimumf %326, %325 : vector<16x32xf32>
    %cst_58 = arith.constant 0.000000e+00 : f32
    %cst_59 = arith.constant 6.000000e+00 : f32
    %328 = vector.broadcast %cst_58 : f32 to vector<16x32xf32>
    %329 = arith.maximumf %328, %315 : vector<16x32xf32>
    %330 = vector.broadcast %cst_59 : f32 to vector<16x32xf32>
    %331 = arith.minimumf %330, %329 : vector<16x32xf32>
    %c0_60 = arith.constant 0 : index
    %332 = memref.load %arg7[%c0_60] : memref<4xf32, #tpu.memory_space<smem>>
    %333 = vector.broadcast %332 : f32 to vector<16x32xf32>
    %c1_61 = arith.constant 1 : index
    %334 = memref.load %arg7[%c1_61] : memref<4xf32, #tpu.memory_space<smem>>
    %335 = vector.broadcast %334 : f32 to vector<16x32xf32>
    %c2_62 = arith.constant 2 : index
    %336 = memref.load %arg7[%c2_62] : memref<4xf32, #tpu.memory_space<smem>>
    %337 = vector.broadcast %336 : f32 to vector<16x32xf32>
    %c3_63 = arith.constant 3 : index
    %338 = memref.load %arg7[%c3_63] : memref<4xf32, #tpu.memory_space<smem>>
    %339 = vector.broadcast %338 : f32 to vector<16x32xf32>
    %c1_i32_64 = arith.constant 1 : i32
    %340 = tpu.dynamic_rotate %319 by %c1_i32_64 dim 0 : vector<16x32xf32>, i32 -> vector<16x32xf32>
    %cst_65 = arith.constant 0.000000e+00 : f32
    %341 = vector.broadcast %cst_65 : f32 to vector<16x32xf32>
    %342 = arith.select %11, %340, %341 : vector<16x32xi1>, vector<16x32xf32>
    %c0_66 = arith.constant 0 : index
    %343 = memref.load %arg6[%c0_66] : memref<48xf32, #tpu.memory_space<smem>>
    %344 = vector.broadcast %343 : f32 to vector<16x32xf32>
    %345 = arith.mulf %342, %344 : vector<16x32xf32>
    %346 = arith.addf %333, %345 : vector<16x32xf32>
    %c12_67 = arith.constant 12 : index
    %347 = memref.load %arg6[%c12_67] : memref<48xf32, #tpu.memory_space<smem>>
    %348 = vector.broadcast %347 : f32 to vector<16x32xf32>
    %349 = arith.mulf %342, %348 : vector<16x32xf32>
    %350 = arith.addf %335, %349 : vector<16x32xf32>
    %c24_68 = arith.constant 24 : index
    %351 = memref.load %arg6[%c24_68] : memref<48xf32, #tpu.memory_space<smem>>
    %352 = vector.broadcast %351 : f32 to vector<16x32xf32>
    %353 = arith.mulf %342, %352 : vector<16x32xf32>
    %354 = arith.addf %337, %353 : vector<16x32xf32>
    %c36_69 = arith.constant 36 : index
    %355 = memref.load %arg6[%c36_69] : memref<48xf32, #tpu.memory_space<smem>>
    %356 = vector.broadcast %355 : f32 to vector<16x32xf32>
    %357 = arith.mulf %342, %356 : vector<16x32xf32>
    %358 = arith.addf %339, %357 : vector<16x32xf32>
    %c1_70 = arith.constant 1 : index
    %359 = memref.load %arg6[%c1_70] : memref<48xf32, #tpu.memory_space<smem>>
    %360 = vector.broadcast %359 : f32 to vector<16x32xf32>
    %361 = arith.mulf %319, %360 : vector<16x32xf32>
    %362 = arith.addf %346, %361 : vector<16x32xf32>
    %c13_71 = arith.constant 13 : index
    %363 = memref.load %arg6[%c13_71] : memref<48xf32, #tpu.memory_space<smem>>
    %364 = vector.broadcast %363 : f32 to vector<16x32xf32>
    %365 = arith.mulf %319, %364 : vector<16x32xf32>
    %366 = arith.addf %350, %365 : vector<16x32xf32>
    %c25_72 = arith.constant 25 : index
    %367 = memref.load %arg6[%c25_72] : memref<48xf32, #tpu.memory_space<smem>>
    %368 = vector.broadcast %367 : f32 to vector<16x32xf32>
    %369 = arith.mulf %319, %368 : vector<16x32xf32>
    %370 = arith.addf %354, %369 : vector<16x32xf32>
    %c37_73 = arith.constant 37 : index
    %371 = memref.load %arg6[%c37_73] : memref<48xf32, #tpu.memory_space<smem>>
    %372 = vector.broadcast %371 : f32 to vector<16x32xf32>
    %373 = arith.mulf %319, %372 : vector<16x32xf32>
    %374 = arith.addf %358, %373 : vector<16x32xf32>
    %c15_i32_74 = arith.constant 15 : i32
    %375 = tpu.dynamic_rotate %319 by %c15_i32_74 dim 0 : vector<16x32xf32>, i32 -> vector<16x32xf32>
    %cst_75 = arith.constant 0.000000e+00 : f32
    %376 = vector.broadcast %cst_75 : f32 to vector<16x32xf32>
    %377 = arith.select %9, %375, %376 : vector<16x32xi1>, vector<16x32xf32>
    %c2_76 = arith.constant 2 : index
    %378 = memref.load %arg6[%c2_76] : memref<48xf32, #tpu.memory_space<smem>>
    %379 = vector.broadcast %378 : f32 to vector<16x32xf32>
    %380 = arith.mulf %377, %379 : vector<16x32xf32>
    %381 = arith.addf %362, %380 : vector<16x32xf32>
    %c14_77 = arith.constant 14 : index
    %382 = memref.load %arg6[%c14_77] : memref<48xf32, #tpu.memory_space<smem>>
    %383 = vector.broadcast %382 : f32 to vector<16x32xf32>
    %384 = arith.mulf %377, %383 : vector<16x32xf32>
    %385 = arith.addf %366, %384 : vector<16x32xf32>
    %c26_78 = arith.constant 26 : index
    %386 = memref.load %arg6[%c26_78] : memref<48xf32, #tpu.memory_space<smem>>
    %387 = vector.broadcast %386 : f32 to vector<16x32xf32>
    %388 = arith.mulf %377, %387 : vector<16x32xf32>
    %389 = arith.addf %370, %388 : vector<16x32xf32>
    %c38_79 = arith.constant 38 : index
    %390 = memref.load %arg6[%c38_79] : memref<48xf32, #tpu.memory_space<smem>>
    %391 = vector.broadcast %390 : f32 to vector<16x32xf32>
    %392 = arith.mulf %377, %391 : vector<16x32xf32>
    %393 = arith.addf %374, %392 : vector<16x32xf32>
    %c1_i32_80 = arith.constant 1 : i32
    %394 = tpu.dynamic_rotate %323 by %c1_i32_80 dim 0 : vector<16x32xf32>, i32 -> vector<16x32xf32>
    %cst_81 = arith.constant 0.000000e+00 : f32
    %395 = vector.broadcast %cst_81 : f32 to vector<16x32xf32>
    %396 = arith.select %11, %394, %395 : vector<16x32xi1>, vector<16x32xf32>
    %c3_82 = arith.constant 3 : index
    %397 = memref.load %arg6[%c3_82] : memref<48xf32, #tpu.memory_space<smem>>
    %398 = vector.broadcast %397 : f32 to vector<16x32xf32>
    %399 = arith.mulf %396, %398 : vector<16x32xf32>
    %400 = arith.addf %381, %399 : vector<16x32xf32>
    %c15_83 = arith.constant 15 : index
    %401 = memref.load %arg6[%c15_83] : memref<48xf32, #tpu.memory_space<smem>>
    %402 = vector.broadcast %401 : f32 to vector<16x32xf32>
    %403 = arith.mulf %396, %402 : vector<16x32xf32>
    %404 = arith.addf %385, %403 : vector<16x32xf32>
    %c27_84 = arith.constant 27 : index
    %405 = memref.load %arg6[%c27_84] : memref<48xf32, #tpu.memory_space<smem>>
    %406 = vector.broadcast %405 : f32 to vector<16x32xf32>
    %407 = arith.mulf %396, %406 : vector<16x32xf32>
    %408 = arith.addf %389, %407 : vector<16x32xf32>
    %c39_85 = arith.constant 39 : index
    %409 = memref.load %arg6[%c39_85] : memref<48xf32, #tpu.memory_space<smem>>
    %410 = vector.broadcast %409 : f32 to vector<16x32xf32>
    %411 = arith.mulf %396, %410 : vector<16x32xf32>
    %412 = arith.addf %393, %411 : vector<16x32xf32>
    %c4_86 = arith.constant 4 : index
    %413 = memref.load %arg6[%c4_86] : memref<48xf32, #tpu.memory_space<smem>>
    %414 = vector.broadcast %413 : f32 to vector<16x32xf32>
    %415 = arith.mulf %323, %414 : vector<16x32xf32>
    %416 = arith.addf %400, %415 : vector<16x32xf32>
    %c16_87 = arith.constant 16 : index
    %417 = memref.load %arg6[%c16_87] : memref<48xf32, #tpu.memory_space<smem>>
    %418 = vector.broadcast %417 : f32 to vector<16x32xf32>
    %419 = arith.mulf %323, %418 : vector<16x32xf32>
    %420 = arith.addf %404, %419 : vector<16x32xf32>
    %c28_88 = arith.constant 28 : index
    %421 = memref.load %arg6[%c28_88] : memref<48xf32, #tpu.memory_space<smem>>
    %422 = vector.broadcast %421 : f32 to vector<16x32xf32>
    %423 = arith.mulf %323, %422 : vector<16x32xf32>
    %424 = arith.addf %408, %423 : vector<16x32xf32>
    %c40_89 = arith.constant 40 : index
    %425 = memref.load %arg6[%c40_89] : memref<48xf32, #tpu.memory_space<smem>>
    %426 = vector.broadcast %425 : f32 to vector<16x32xf32>
    %427 = arith.mulf %323, %426 : vector<16x32xf32>
    %428 = arith.addf %412, %427 : vector<16x32xf32>
    %c15_i32_90 = arith.constant 15 : i32
    %429 = tpu.dynamic_rotate %323 by %c15_i32_90 dim 0 : vector<16x32xf32>, i32 -> vector<16x32xf32>
    %cst_91 = arith.constant 0.000000e+00 : f32
    %430 = vector.broadcast %cst_91 : f32 to vector<16x32xf32>
    %431 = arith.select %9, %429, %430 : vector<16x32xi1>, vector<16x32xf32>
    %c5_92 = arith.constant 5 : index
    %432 = memref.load %arg6[%c5_92] : memref<48xf32, #tpu.memory_space<smem>>
    %433 = vector.broadcast %432 : f32 to vector<16x32xf32>
    %434 = arith.mulf %431, %433 : vector<16x32xf32>
    %435 = arith.addf %416, %434 : vector<16x32xf32>
    %c17_93 = arith.constant 17 : index
    %436 = memref.load %arg6[%c17_93] : memref<48xf32, #tpu.memory_space<smem>>
    %437 = vector.broadcast %436 : f32 to vector<16x32xf32>
    %438 = arith.mulf %431, %437 : vector<16x32xf32>
    %439 = arith.addf %420, %438 : vector<16x32xf32>
    %c29_94 = arith.constant 29 : index
    %440 = memref.load %arg6[%c29_94] : memref<48xf32, #tpu.memory_space<smem>>
    %441 = vector.broadcast %440 : f32 to vector<16x32xf32>
    %442 = arith.mulf %431, %441 : vector<16x32xf32>
    %443 = arith.addf %424, %442 : vector<16x32xf32>
    %c41_95 = arith.constant 41 : index
    %444 = memref.load %arg6[%c41_95] : memref<48xf32, #tpu.memory_space<smem>>
    %445 = vector.broadcast %444 : f32 to vector<16x32xf32>
    %446 = arith.mulf %431, %445 : vector<16x32xf32>
    %447 = arith.addf %428, %446 : vector<16x32xf32>
    %c1_i32_96 = arith.constant 1 : i32
    %448 = tpu.dynamic_rotate %327 by %c1_i32_96 dim 0 : vector<16x32xf32>, i32 -> vector<16x32xf32>
    %cst_97 = arith.constant 0.000000e+00 : f32
    %449 = vector.broadcast %cst_97 : f32 to vector<16x32xf32>
    %450 = arith.select %11, %448, %449 : vector<16x32xi1>, vector<16x32xf32>
    %c6_98 = arith.constant 6 : index
    %451 = memref.load %arg6[%c6_98] : memref<48xf32, #tpu.memory_space<smem>>
    %452 = vector.broadcast %451 : f32 to vector<16x32xf32>
    %453 = arith.mulf %450, %452 : vector<16x32xf32>
    %454 = arith.addf %435, %453 : vector<16x32xf32>
    %c18_99 = arith.constant 18 : index
    %455 = memref.load %arg6[%c18_99] : memref<48xf32, #tpu.memory_space<smem>>
    %456 = vector.broadcast %455 : f32 to vector<16x32xf32>
    %457 = arith.mulf %450, %456 : vector<16x32xf32>
    %458 = arith.addf %439, %457 : vector<16x32xf32>
    %c30_100 = arith.constant 30 : index
    %459 = memref.load %arg6[%c30_100] : memref<48xf32, #tpu.memory_space<smem>>
    %460 = vector.broadcast %459 : f32 to vector<16x32xf32>
    %461 = arith.mulf %450, %460 : vector<16x32xf32>
    %462 = arith.addf %443, %461 : vector<16x32xf32>
    %c42_101 = arith.constant 42 : index
    %463 = memref.load %arg6[%c42_101] : memref<48xf32, #tpu.memory_space<smem>>
    %464 = vector.broadcast %463 : f32 to vector<16x32xf32>
    %465 = arith.mulf %450, %464 : vector<16x32xf32>
    %466 = arith.addf %447, %465 : vector<16x32xf32>
    %c7_102 = arith.constant 7 : index
    %467 = memref.load %arg6[%c7_102] : memref<48xf32, #tpu.memory_space<smem>>
    %468 = vector.broadcast %467 : f32 to vector<16x32xf32>
    %469 = arith.mulf %327, %468 : vector<16x32xf32>
    %470 = arith.addf %454, %469 : vector<16x32xf32>
    %c19_103 = arith.constant 19 : index
    %471 = memref.load %arg6[%c19_103] : memref<48xf32, #tpu.memory_space<smem>>
    %472 = vector.broadcast %471 : f32 to vector<16x32xf32>
    %473 = arith.mulf %327, %472 : vector<16x32xf32>
    %474 = arith.addf %458, %473 : vector<16x32xf32>
    %c31_104 = arith.constant 31 : index
    %475 = memref.load %arg6[%c31_104] : memref<48xf32, #tpu.memory_space<smem>>
    %476 = vector.broadcast %475 : f32 to vector<16x32xf32>
    %477 = arith.mulf %327, %476 : vector<16x32xf32>
    %478 = arith.addf %462, %477 : vector<16x32xf32>
    %c43_105 = arith.constant 43 : index
    %479 = memref.load %arg6[%c43_105] : memref<48xf32, #tpu.memory_space<smem>>
    %480 = vector.broadcast %479 : f32 to vector<16x32xf32>
    %481 = arith.mulf %327, %480 : vector<16x32xf32>
    %482 = arith.addf %466, %481 : vector<16x32xf32>
    %c15_i32_106 = arith.constant 15 : i32
    %483 = tpu.dynamic_rotate %327 by %c15_i32_106 dim 0 : vector<16x32xf32>, i32 -> vector<16x32xf32>
    %cst_107 = arith.constant 0.000000e+00 : f32
    %484 = vector.broadcast %cst_107 : f32 to vector<16x32xf32>
    %485 = arith.select %9, %483, %484 : vector<16x32xi1>, vector<16x32xf32>
    %c8_108 = arith.constant 8 : index
    %486 = memref.load %arg6[%c8_108] : memref<48xf32, #tpu.memory_space<smem>>
    %487 = vector.broadcast %486 : f32 to vector<16x32xf32>
    %488 = arith.mulf %485, %487 : vector<16x32xf32>
    %489 = arith.addf %470, %488 : vector<16x32xf32>
    %c20_109 = arith.constant 20 : index
    %490 = memref.load %arg6[%c20_109] : memref<48xf32, #tpu.memory_space<smem>>
    %491 = vector.broadcast %490 : f32 to vector<16x32xf32>
    %492 = arith.mulf %485, %491 : vector<16x32xf32>
    %493 = arith.addf %474, %492 : vector<16x32xf32>
    %c32_110 = arith.constant 32 : index
    %494 = memref.load %arg6[%c32_110] : memref<48xf32, #tpu.memory_space<smem>>
    %495 = vector.broadcast %494 : f32 to vector<16x32xf32>
    %496 = arith.mulf %485, %495 : vector<16x32xf32>
    %497 = arith.addf %478, %496 : vector<16x32xf32>
    %c44_111 = arith.constant 44 : index
    %498 = memref.load %arg6[%c44_111] : memref<48xf32, #tpu.memory_space<smem>>
    %499 = vector.broadcast %498 : f32 to vector<16x32xf32>
    %500 = arith.mulf %485, %499 : vector<16x32xf32>
    %501 = arith.addf %482, %500 : vector<16x32xf32>
    %c1_i32_112 = arith.constant 1 : i32
    %502 = tpu.dynamic_rotate %331 by %c1_i32_112 dim 0 : vector<16x32xf32>, i32 -> vector<16x32xf32>
    %cst_113 = arith.constant 0.000000e+00 : f32
    %503 = vector.broadcast %cst_113 : f32 to vector<16x32xf32>
    %504 = arith.select %11, %502, %503 : vector<16x32xi1>, vector<16x32xf32>
    %c9_114 = arith.constant 9 : index
    %505 = memref.load %arg6[%c9_114] : memref<48xf32, #tpu.memory_space<smem>>
    %506 = vector.broadcast %505 : f32 to vector<16x32xf32>
    %507 = arith.mulf %504, %506 : vector<16x32xf32>
    %508 = arith.addf %489, %507 : vector<16x32xf32>
    %c21_115 = arith.constant 21 : index
    %509 = memref.load %arg6[%c21_115] : memref<48xf32, #tpu.memory_space<smem>>
    %510 = vector.broadcast %509 : f32 to vector<16x32xf32>
    %511 = arith.mulf %504, %510 : vector<16x32xf32>
    %512 = arith.addf %493, %511 : vector<16x32xf32>
    %c33_116 = arith.constant 33 : index
    %513 = memref.load %arg6[%c33_116] : memref<48xf32, #tpu.memory_space<smem>>
    %514 = vector.broadcast %513 : f32 to vector<16x32xf32>
    %515 = arith.mulf %504, %514 : vector<16x32xf32>
    %516 = arith.addf %497, %515 : vector<16x32xf32>
    %c45_117 = arith.constant 45 : index
    %517 = memref.load %arg6[%c45_117] : memref<48xf32, #tpu.memory_space<smem>>
    %518 = vector.broadcast %517 : f32 to vector<16x32xf32>
    %519 = arith.mulf %504, %518 : vector<16x32xf32>
    %520 = arith.addf %501, %519 : vector<16x32xf32>
    %c10_118 = arith.constant 10 : index
    %521 = memref.load %arg6[%c10_118] : memref<48xf32, #tpu.memory_space<smem>>
    %522 = vector.broadcast %521 : f32 to vector<16x32xf32>
    %523 = arith.mulf %331, %522 : vector<16x32xf32>
    %524 = arith.addf %508, %523 : vector<16x32xf32>
    %c22_119 = arith.constant 22 : index
    %525 = memref.load %arg6[%c22_119] : memref<48xf32, #tpu.memory_space<smem>>
    %526 = vector.broadcast %525 : f32 to vector<16x32xf32>
    %527 = arith.mulf %331, %526 : vector<16x32xf32>
    %528 = arith.addf %512, %527 : vector<16x32xf32>
    %c34_120 = arith.constant 34 : index
    %529 = memref.load %arg6[%c34_120] : memref<48xf32, #tpu.memory_space<smem>>
    %530 = vector.broadcast %529 : f32 to vector<16x32xf32>
    %531 = arith.mulf %331, %530 : vector<16x32xf32>
    %532 = arith.addf %516, %531 : vector<16x32xf32>
    %c46_121 = arith.constant 46 : index
    %533 = memref.load %arg6[%c46_121] : memref<48xf32, #tpu.memory_space<smem>>
    %534 = vector.broadcast %533 : f32 to vector<16x32xf32>
    %535 = arith.mulf %331, %534 : vector<16x32xf32>
    %536 = arith.addf %520, %535 : vector<16x32xf32>
    %c15_i32_122 = arith.constant 15 : i32
    %537 = tpu.dynamic_rotate %331 by %c15_i32_122 dim 0 : vector<16x32xf32>, i32 -> vector<16x32xf32>
    %cst_123 = arith.constant 0.000000e+00 : f32
    %538 = vector.broadcast %cst_123 : f32 to vector<16x32xf32>
    %539 = arith.select %9, %537, %538 : vector<16x32xi1>, vector<16x32xf32>
    %c11_124 = arith.constant 11 : index
    %540 = memref.load %arg6[%c11_124] : memref<48xf32, #tpu.memory_space<smem>>
    %541 = vector.broadcast %540 : f32 to vector<16x32xf32>
    %542 = arith.mulf %539, %541 : vector<16x32xf32>
    %543 = arith.addf %524, %542 : vector<16x32xf32>
    %c23_125 = arith.constant 23 : index
    %544 = memref.load %arg6[%c23_125] : memref<48xf32, #tpu.memory_space<smem>>
    %545 = vector.broadcast %544 : f32 to vector<16x32xf32>
    %546 = arith.mulf %539, %545 : vector<16x32xf32>
    %547 = arith.addf %528, %546 : vector<16x32xf32>
    %c35_126 = arith.constant 35 : index
    %548 = memref.load %arg6[%c35_126] : memref<48xf32, #tpu.memory_space<smem>>
    %549 = vector.broadcast %548 : f32 to vector<16x32xf32>
    %550 = arith.mulf %539, %549 : vector<16x32xf32>
    %551 = arith.addf %532, %550 : vector<16x32xf32>
    %c47_127 = arith.constant 47 : index
    %552 = memref.load %arg6[%c47_127] : memref<48xf32, #tpu.memory_space<smem>>
    %553 = vector.broadcast %552 : f32 to vector<16x32xf32>
    %554 = arith.mulf %539, %553 : vector<16x32xf32>
    %555 = arith.addf %536, %554 : vector<16x32xf32>
    %cst_128 = arith.constant 0.000000e+00 : f32
    %cst_129 = arith.constant 6.000000e+00 : f32
    %556 = vector.broadcast %cst_128 : f32 to vector<16x32xf32>
    %557 = arith.maximumf %556, %543 : vector<16x32xf32>
    %558 = vector.broadcast %cst_129 : f32 to vector<16x32xf32>
    %559 = arith.minimumf %558, %557 : vector<16x32xf32>
    %cst_130 = arith.constant 0.000000e+00 : f32
    %cst_131 = arith.constant 6.000000e+00 : f32
    %560 = vector.broadcast %cst_130 : f32 to vector<16x32xf32>
    %561 = arith.maximumf %560, %547 : vector<16x32xf32>
    %562 = vector.broadcast %cst_131 : f32 to vector<16x32xf32>
    %563 = arith.minimumf %562, %561 : vector<16x32xf32>
    %cst_132 = arith.constant 0.000000e+00 : f32
    %cst_133 = arith.constant 6.000000e+00 : f32
    %564 = vector.broadcast %cst_132 : f32 to vector<16x32xf32>
    %565 = arith.maximumf %564, %551 : vector<16x32xf32>
    %566 = vector.broadcast %cst_133 : f32 to vector<16x32xf32>
    %567 = arith.minimumf %566, %565 : vector<16x32xf32>
    %cst_134 = arith.constant 0.000000e+00 : f32
    %cst_135 = arith.constant 6.000000e+00 : f32
    %568 = vector.broadcast %cst_134 : f32 to vector<16x32xf32>
    %569 = arith.maximumf %568, %555 : vector<16x32xf32>
    %570 = vector.broadcast %cst_135 : f32 to vector<16x32xf32>
    %571 = arith.minimumf %570, %569 : vector<16x32xf32>
    %c0_136 = arith.constant 0 : index
    %572 = memref.load %arg9[%c0_136] : memref<4xf32, #tpu.memory_space<smem>>
    %573 = vector.broadcast %572 : f32 to vector<16x32xf32>
    %c1_137 = arith.constant 1 : index
    %574 = memref.load %arg9[%c1_137] : memref<4xf32, #tpu.memory_space<smem>>
    %575 = vector.broadcast %574 : f32 to vector<16x32xf32>
    %c2_138 = arith.constant 2 : index
    %576 = memref.load %arg9[%c2_138] : memref<4xf32, #tpu.memory_space<smem>>
    %577 = vector.broadcast %576 : f32 to vector<16x32xf32>
    %c3_139 = arith.constant 3 : index
    %578 = memref.load %arg9[%c3_139] : memref<4xf32, #tpu.memory_space<smem>>
    %579 = vector.broadcast %578 : f32 to vector<16x32xf32>
    %c1_i32_140 = arith.constant 1 : i32
    %580 = tpu.dynamic_rotate %559 by %c1_i32_140 dim 1 : vector<16x32xf32>, i32 -> vector<16x32xf32>
    %cst_141 = arith.constant 0.000000e+00 : f32
    %581 = vector.broadcast %cst_141 : f32 to vector<16x32xf32>
    %582 = arith.select %7, %580, %581 : vector<16x32xi1>, vector<16x32xf32>
    %c0_142 = arith.constant 0 : index
    %583 = memref.load %arg8[%c0_142] : memref<48xf32, #tpu.memory_space<smem>>
    %584 = vector.broadcast %583 : f32 to vector<16x32xf32>
    %585 = arith.mulf %582, %584 : vector<16x32xf32>
    %586 = arith.addf %573, %585 : vector<16x32xf32>
    %c12_143 = arith.constant 12 : index
    %587 = memref.load %arg8[%c12_143] : memref<48xf32, #tpu.memory_space<smem>>
    %588 = vector.broadcast %587 : f32 to vector<16x32xf32>
    %589 = arith.mulf %582, %588 : vector<16x32xf32>
    %590 = arith.addf %575, %589 : vector<16x32xf32>
    %c24_144 = arith.constant 24 : index
    %591 = memref.load %arg8[%c24_144] : memref<48xf32, #tpu.memory_space<smem>>
    %592 = vector.broadcast %591 : f32 to vector<16x32xf32>
    %593 = arith.mulf %582, %592 : vector<16x32xf32>
    %594 = arith.addf %577, %593 : vector<16x32xf32>
    %c36_145 = arith.constant 36 : index
    %595 = memref.load %arg8[%c36_145] : memref<48xf32, #tpu.memory_space<smem>>
    %596 = vector.broadcast %595 : f32 to vector<16x32xf32>
    %597 = arith.mulf %582, %596 : vector<16x32xf32>
    %598 = arith.addf %579, %597 : vector<16x32xf32>
    %c1_146 = arith.constant 1 : index
    %599 = memref.load %arg8[%c1_146] : memref<48xf32, #tpu.memory_space<smem>>
    %600 = vector.broadcast %599 : f32 to vector<16x32xf32>
    %601 = arith.mulf %559, %600 : vector<16x32xf32>
    %602 = arith.addf %586, %601 : vector<16x32xf32>
    %c13_147 = arith.constant 13 : index
    %603 = memref.load %arg8[%c13_147] : memref<48xf32, #tpu.memory_space<smem>>
    %604 = vector.broadcast %603 : f32 to vector<16x32xf32>
    %605 = arith.mulf %559, %604 : vector<16x32xf32>
    %606 = arith.addf %590, %605 : vector<16x32xf32>
    %c25_148 = arith.constant 25 : index
    %607 = memref.load %arg8[%c25_148] : memref<48xf32, #tpu.memory_space<smem>>
    %608 = vector.broadcast %607 : f32 to vector<16x32xf32>
    %609 = arith.mulf %559, %608 : vector<16x32xf32>
    %610 = arith.addf %594, %609 : vector<16x32xf32>
    %c37_149 = arith.constant 37 : index
    %611 = memref.load %arg8[%c37_149] : memref<48xf32, #tpu.memory_space<smem>>
    %612 = vector.broadcast %611 : f32 to vector<16x32xf32>
    %613 = arith.mulf %559, %612 : vector<16x32xf32>
    %614 = arith.addf %598, %613 : vector<16x32xf32>
    %c31_i32_150 = arith.constant 31 : i32
    %615 = tpu.dynamic_rotate %559 by %c31_i32_150 dim 1 : vector<16x32xf32>, i32 -> vector<16x32xf32>
    %cst_151 = arith.constant 0.000000e+00 : f32
    %616 = vector.broadcast %cst_151 : f32 to vector<16x32xf32>
    %617 = arith.select %5, %615, %616 : vector<16x32xi1>, vector<16x32xf32>
    %c2_152 = arith.constant 2 : index
    %618 = memref.load %arg8[%c2_152] : memref<48xf32, #tpu.memory_space<smem>>
    %619 = vector.broadcast %618 : f32 to vector<16x32xf32>
    %620 = arith.mulf %617, %619 : vector<16x32xf32>
    %621 = arith.addf %602, %620 : vector<16x32xf32>
    %c14_153 = arith.constant 14 : index
    %622 = memref.load %arg8[%c14_153] : memref<48xf32, #tpu.memory_space<smem>>
    %623 = vector.broadcast %622 : f32 to vector<16x32xf32>
    %624 = arith.mulf %617, %623 : vector<16x32xf32>
    %625 = arith.addf %606, %624 : vector<16x32xf32>
    %c26_154 = arith.constant 26 : index
    %626 = memref.load %arg8[%c26_154] : memref<48xf32, #tpu.memory_space<smem>>
    %627 = vector.broadcast %626 : f32 to vector<16x32xf32>
    %628 = arith.mulf %617, %627 : vector<16x32xf32>
    %629 = arith.addf %610, %628 : vector<16x32xf32>
    %c38_155 = arith.constant 38 : index
    %630 = memref.load %arg8[%c38_155] : memref<48xf32, #tpu.memory_space<smem>>
    %631 = vector.broadcast %630 : f32 to vector<16x32xf32>
    %632 = arith.mulf %617, %631 : vector<16x32xf32>
    %633 = arith.addf %614, %632 : vector<16x32xf32>
    %c1_i32_156 = arith.constant 1 : i32
    %634 = tpu.dynamic_rotate %563 by %c1_i32_156 dim 1 : vector<16x32xf32>, i32 -> vector<16x32xf32>
    %cst_157 = arith.constant 0.000000e+00 : f32
    %635 = vector.broadcast %cst_157 : f32 to vector<16x32xf32>
    %636 = arith.select %7, %634, %635 : vector<16x32xi1>, vector<16x32xf32>
    %c3_158 = arith.constant 3 : index
    %637 = memref.load %arg8[%c3_158] : memref<48xf32, #tpu.memory_space<smem>>
    %638 = vector.broadcast %637 : f32 to vector<16x32xf32>
    %639 = arith.mulf %636, %638 : vector<16x32xf32>
    %640 = arith.addf %621, %639 : vector<16x32xf32>
    %c15_159 = arith.constant 15 : index
    %641 = memref.load %arg8[%c15_159] : memref<48xf32, #tpu.memory_space<smem>>
    %642 = vector.broadcast %641 : f32 to vector<16x32xf32>
    %643 = arith.mulf %636, %642 : vector<16x32xf32>
    %644 = arith.addf %625, %643 : vector<16x32xf32>
    %c27_160 = arith.constant 27 : index
    %645 = memref.load %arg8[%c27_160] : memref<48xf32, #tpu.memory_space<smem>>
    %646 = vector.broadcast %645 : f32 to vector<16x32xf32>
    %647 = arith.mulf %636, %646 : vector<16x32xf32>
    %648 = arith.addf %629, %647 : vector<16x32xf32>
    %c39_161 = arith.constant 39 : index
    %649 = memref.load %arg8[%c39_161] : memref<48xf32, #tpu.memory_space<smem>>
    %650 = vector.broadcast %649 : f32 to vector<16x32xf32>
    %651 = arith.mulf %636, %650 : vector<16x32xf32>
    %652 = arith.addf %633, %651 : vector<16x32xf32>
    %c4_162 = arith.constant 4 : index
    %653 = memref.load %arg8[%c4_162] : memref<48xf32, #tpu.memory_space<smem>>
    %654 = vector.broadcast %653 : f32 to vector<16x32xf32>
    %655 = arith.mulf %563, %654 : vector<16x32xf32>
    %656 = arith.addf %640, %655 : vector<16x32xf32>
    %c16_163 = arith.constant 16 : index
    %657 = memref.load %arg8[%c16_163] : memref<48xf32, #tpu.memory_space<smem>>
    %658 = vector.broadcast %657 : f32 to vector<16x32xf32>
    %659 = arith.mulf %563, %658 : vector<16x32xf32>
    %660 = arith.addf %644, %659 : vector<16x32xf32>
    %c28_164 = arith.constant 28 : index
    %661 = memref.load %arg8[%c28_164] : memref<48xf32, #tpu.memory_space<smem>>
    %662 = vector.broadcast %661 : f32 to vector<16x32xf32>
    %663 = arith.mulf %563, %662 : vector<16x32xf32>
    %664 = arith.addf %648, %663 : vector<16x32xf32>
    %c40_165 = arith.constant 40 : index
    %665 = memref.load %arg8[%c40_165] : memref<48xf32, #tpu.memory_space<smem>>
    %666 = vector.broadcast %665 : f32 to vector<16x32xf32>
    %667 = arith.mulf %563, %666 : vector<16x32xf32>
    %668 = arith.addf %652, %667 : vector<16x32xf32>
    %c31_i32_166 = arith.constant 31 : i32
    %669 = tpu.dynamic_rotate %563 by %c31_i32_166 dim 1 : vector<16x32xf32>, i32 -> vector<16x32xf32>
    %cst_167 = arith.constant 0.000000e+00 : f32
    %670 = vector.broadcast %cst_167 : f32 to vector<16x32xf32>
    %671 = arith.select %5, %669, %670 : vector<16x32xi1>, vector<16x32xf32>
    %c5_168 = arith.constant 5 : index
    %672 = memref.load %arg8[%c5_168] : memref<48xf32, #tpu.memory_space<smem>>
    %673 = vector.broadcast %672 : f32 to vector<16x32xf32>
    %674 = arith.mulf %671, %673 : vector<16x32xf32>
    %675 = arith.addf %656, %674 : vector<16x32xf32>
    %c17_169 = arith.constant 17 : index
    %676 = memref.load %arg8[%c17_169] : memref<48xf32, #tpu.memory_space<smem>>
    %677 = vector.broadcast %676 : f32 to vector<16x32xf32>
    %678 = arith.mulf %671, %677 : vector<16x32xf32>
    %679 = arith.addf %660, %678 : vector<16x32xf32>
    %c29_170 = arith.constant 29 : index
    %680 = memref.load %arg8[%c29_170] : memref<48xf32, #tpu.memory_space<smem>>
    %681 = vector.broadcast %680 : f32 to vector<16x32xf32>
    %682 = arith.mulf %671, %681 : vector<16x32xf32>
    %683 = arith.addf %664, %682 : vector<16x32xf32>
    %c41_171 = arith.constant 41 : index
    %684 = memref.load %arg8[%c41_171] : memref<48xf32, #tpu.memory_space<smem>>
    %685 = vector.broadcast %684 : f32 to vector<16x32xf32>
    %686 = arith.mulf %671, %685 : vector<16x32xf32>
    %687 = arith.addf %668, %686 : vector<16x32xf32>
    %c1_i32_172 = arith.constant 1 : i32
    %688 = tpu.dynamic_rotate %567 by %c1_i32_172 dim 1 : vector<16x32xf32>, i32 -> vector<16x32xf32>
    %cst_173 = arith.constant 0.000000e+00 : f32
    %689 = vector.broadcast %cst_173 : f32 to vector<16x32xf32>
    %690 = arith.select %7, %688, %689 : vector<16x32xi1>, vector<16x32xf32>
    %c6_174 = arith.constant 6 : index
    %691 = memref.load %arg8[%c6_174] : memref<48xf32, #tpu.memory_space<smem>>
    %692 = vector.broadcast %691 : f32 to vector<16x32xf32>
    %693 = arith.mulf %690, %692 : vector<16x32xf32>
    %694 = arith.addf %675, %693 : vector<16x32xf32>
    %c18_175 = arith.constant 18 : index
    %695 = memref.load %arg8[%c18_175] : memref<48xf32, #tpu.memory_space<smem>>
    %696 = vector.broadcast %695 : f32 to vector<16x32xf32>
    %697 = arith.mulf %690, %696 : vector<16x32xf32>
    %698 = arith.addf %679, %697 : vector<16x32xf32>
    %c30_176 = arith.constant 30 : index
    %699 = memref.load %arg8[%c30_176] : memref<48xf32, #tpu.memory_space<smem>>
    %700 = vector.broadcast %699 : f32 to vector<16x32xf32>
    %701 = arith.mulf %690, %700 : vector<16x32xf32>
    %702 = arith.addf %683, %701 : vector<16x32xf32>
    %c42_177 = arith.constant 42 : index
    %703 = memref.load %arg8[%c42_177] : memref<48xf32, #tpu.memory_space<smem>>
    %704 = vector.broadcast %703 : f32 to vector<16x32xf32>
    %705 = arith.mulf %690, %704 : vector<16x32xf32>
    %706 = arith.addf %687, %705 : vector<16x32xf32>
    %c7_178 = arith.constant 7 : index
    %707 = memref.load %arg8[%c7_178] : memref<48xf32, #tpu.memory_space<smem>>
    %708 = vector.broadcast %707 : f32 to vector<16x32xf32>
    %709 = arith.mulf %567, %708 : vector<16x32xf32>
    %710 = arith.addf %694, %709 : vector<16x32xf32>
    %c19_179 = arith.constant 19 : index
    %711 = memref.load %arg8[%c19_179] : memref<48xf32, #tpu.memory_space<smem>>
    %712 = vector.broadcast %711 : f32 to vector<16x32xf32>
    %713 = arith.mulf %567, %712 : vector<16x32xf32>
    %714 = arith.addf %698, %713 : vector<16x32xf32>
    %c31_180 = arith.constant 31 : index
    %715 = memref.load %arg8[%c31_180] : memref<48xf32, #tpu.memory_space<smem>>
    %716 = vector.broadcast %715 : f32 to vector<16x32xf32>
    %717 = arith.mulf %567, %716 : vector<16x32xf32>
    %718 = arith.addf %702, %717 : vector<16x32xf32>
    %c43_181 = arith.constant 43 : index
    %719 = memref.load %arg8[%c43_181] : memref<48xf32, #tpu.memory_space<smem>>
    %720 = vector.broadcast %719 : f32 to vector<16x32xf32>
    %721 = arith.mulf %567, %720 : vector<16x32xf32>
    %722 = arith.addf %706, %721 : vector<16x32xf32>
    %c31_i32_182 = arith.constant 31 : i32
    %723 = tpu.dynamic_rotate %567 by %c31_i32_182 dim 1 : vector<16x32xf32>, i32 -> vector<16x32xf32>
    %cst_183 = arith.constant 0.000000e+00 : f32
    %724 = vector.broadcast %cst_183 : f32 to vector<16x32xf32>
    %725 = arith.select %5, %723, %724 : vector<16x32xi1>, vector<16x32xf32>
    %c8_184 = arith.constant 8 : index
    %726 = memref.load %arg8[%c8_184] : memref<48xf32, #tpu.memory_space<smem>>
    %727 = vector.broadcast %726 : f32 to vector<16x32xf32>
    %728 = arith.mulf %725, %727 : vector<16x32xf32>
    %729 = arith.addf %710, %728 : vector<16x32xf32>
    %c20_185 = arith.constant 20 : index
    %730 = memref.load %arg8[%c20_185] : memref<48xf32, #tpu.memory_space<smem>>
    %731 = vector.broadcast %730 : f32 to vector<16x32xf32>
    %732 = arith.mulf %725, %731 : vector<16x32xf32>
    %733 = arith.addf %714, %732 : vector<16x32xf32>
    %c32_186 = arith.constant 32 : index
    %734 = memref.load %arg8[%c32_186] : memref<48xf32, #tpu.memory_space<smem>>
    %735 = vector.broadcast %734 : f32 to vector<16x32xf32>
    %736 = arith.mulf %725, %735 : vector<16x32xf32>
    %737 = arith.addf %718, %736 : vector<16x32xf32>
    %c44_187 = arith.constant 44 : index
    %738 = memref.load %arg8[%c44_187] : memref<48xf32, #tpu.memory_space<smem>>
    %739 = vector.broadcast %738 : f32 to vector<16x32xf32>
    %740 = arith.mulf %725, %739 : vector<16x32xf32>
    %741 = arith.addf %722, %740 : vector<16x32xf32>
    %c1_i32_188 = arith.constant 1 : i32
    %742 = tpu.dynamic_rotate %571 by %c1_i32_188 dim 1 : vector<16x32xf32>, i32 -> vector<16x32xf32>
    %cst_189 = arith.constant 0.000000e+00 : f32
    %743 = vector.broadcast %cst_189 : f32 to vector<16x32xf32>
    %744 = arith.select %7, %742, %743 : vector<16x32xi1>, vector<16x32xf32>
    %c9_190 = arith.constant 9 : index
    %745 = memref.load %arg8[%c9_190] : memref<48xf32, #tpu.memory_space<smem>>
    %746 = vector.broadcast %745 : f32 to vector<16x32xf32>
    %747 = arith.mulf %744, %746 : vector<16x32xf32>
    %748 = arith.addf %729, %747 : vector<16x32xf32>
    %c21_191 = arith.constant 21 : index
    %749 = memref.load %arg8[%c21_191] : memref<48xf32, #tpu.memory_space<smem>>
    %750 = vector.broadcast %749 : f32 to vector<16x32xf32>
    %751 = arith.mulf %744, %750 : vector<16x32xf32>
    %752 = arith.addf %733, %751 : vector<16x32xf32>
    %c33_192 = arith.constant 33 : index
    %753 = memref.load %arg8[%c33_192] : memref<48xf32, #tpu.memory_space<smem>>
    %754 = vector.broadcast %753 : f32 to vector<16x32xf32>
    %755 = arith.mulf %744, %754 : vector<16x32xf32>
    %756 = arith.addf %737, %755 : vector<16x32xf32>
    %c45_193 = arith.constant 45 : index
    %757 = memref.load %arg8[%c45_193] : memref<48xf32, #tpu.memory_space<smem>>
    %758 = vector.broadcast %757 : f32 to vector<16x32xf32>
    %759 = arith.mulf %744, %758 : vector<16x32xf32>
    %760 = arith.addf %741, %759 : vector<16x32xf32>
    %c10_194 = arith.constant 10 : index
    %761 = memref.load %arg8[%c10_194] : memref<48xf32, #tpu.memory_space<smem>>
    %762 = vector.broadcast %761 : f32 to vector<16x32xf32>
    %763 = arith.mulf %571, %762 : vector<16x32xf32>
    %764 = arith.addf %748, %763 : vector<16x32xf32>
    %c22_195 = arith.constant 22 : index
    %765 = memref.load %arg8[%c22_195] : memref<48xf32, #tpu.memory_space<smem>>
    %766 = vector.broadcast %765 : f32 to vector<16x32xf32>
    %767 = arith.mulf %571, %766 : vector<16x32xf32>
    %768 = arith.addf %752, %767 : vector<16x32xf32>
    %c34_196 = arith.constant 34 : index
    %769 = memref.load %arg8[%c34_196] : memref<48xf32, #tpu.memory_space<smem>>
    %770 = vector.broadcast %769 : f32 to vector<16x32xf32>
    %771 = arith.mulf %571, %770 : vector<16x32xf32>
    %772 = arith.addf %756, %771 : vector<16x32xf32>
    %c46_197 = arith.constant 46 : index
    %773 = memref.load %arg8[%c46_197] : memref<48xf32, #tpu.memory_space<smem>>
    %774 = vector.broadcast %773 : f32 to vector<16x32xf32>
    %775 = arith.mulf %571, %774 : vector<16x32xf32>
    %776 = arith.addf %760, %775 : vector<16x32xf32>
    %c31_i32_198 = arith.constant 31 : i32
    %777 = tpu.dynamic_rotate %571 by %c31_i32_198 dim 1 : vector<16x32xf32>, i32 -> vector<16x32xf32>
    %cst_199 = arith.constant 0.000000e+00 : f32
    %778 = vector.broadcast %cst_199 : f32 to vector<16x32xf32>
    %779 = arith.select %5, %777, %778 : vector<16x32xi1>, vector<16x32xf32>
    %c11_200 = arith.constant 11 : index
    %780 = memref.load %arg8[%c11_200] : memref<48xf32, #tpu.memory_space<smem>>
    %781 = vector.broadcast %780 : f32 to vector<16x32xf32>
    %782 = arith.mulf %779, %781 : vector<16x32xf32>
    %783 = arith.addf %764, %782 : vector<16x32xf32>
    %c23_201 = arith.constant 23 : index
    %784 = memref.load %arg8[%c23_201] : memref<48xf32, #tpu.memory_space<smem>>
    %785 = vector.broadcast %784 : f32 to vector<16x32xf32>
    %786 = arith.mulf %779, %785 : vector<16x32xf32>
    %787 = arith.addf %768, %786 : vector<16x32xf32>
    %c35_202 = arith.constant 35 : index
    %788 = memref.load %arg8[%c35_202] : memref<48xf32, #tpu.memory_space<smem>>
    %789 = vector.broadcast %788 : f32 to vector<16x32xf32>
    %790 = arith.mulf %779, %789 : vector<16x32xf32>
    %791 = arith.addf %772, %790 : vector<16x32xf32>
    %c47_203 = arith.constant 47 : index
    %792 = memref.load %arg8[%c47_203] : memref<48xf32, #tpu.memory_space<smem>>
    %793 = vector.broadcast %792 : f32 to vector<16x32xf32>
    %794 = arith.mulf %779, %793 : vector<16x32xf32>
    %795 = arith.addf %776, %794 : vector<16x32xf32>
    %cst_204 = arith.constant 0.000000e+00 : f32
    %cst_205 = arith.constant 6.000000e+00 : f32
    %796 = vector.broadcast %cst_204 : f32 to vector<16x32xf32>
    %797 = arith.maximumf %796, %783 : vector<16x32xf32>
    %798 = vector.broadcast %cst_205 : f32 to vector<16x32xf32>
    %799 = arith.minimumf %798, %797 : vector<16x32xf32>
    %cst_206 = arith.constant 0.000000e+00 : f32
    %cst_207 = arith.constant 6.000000e+00 : f32
    %800 = vector.broadcast %cst_206 : f32 to vector<16x32xf32>
    %801 = arith.maximumf %800, %787 : vector<16x32xf32>
    %802 = vector.broadcast %cst_207 : f32 to vector<16x32xf32>
    %803 = arith.minimumf %802, %801 : vector<16x32xf32>
    %cst_208 = arith.constant 0.000000e+00 : f32
    %cst_209 = arith.constant 6.000000e+00 : f32
    %804 = vector.broadcast %cst_208 : f32 to vector<16x32xf32>
    %805 = arith.maximumf %804, %791 : vector<16x32xf32>
    %806 = vector.broadcast %cst_209 : f32 to vector<16x32xf32>
    %807 = arith.minimumf %806, %805 : vector<16x32xf32>
    %cst_210 = arith.constant 0.000000e+00 : f32
    %cst_211 = arith.constant 6.000000e+00 : f32
    %808 = vector.broadcast %cst_210 : f32 to vector<16x32xf32>
    %809 = arith.maximumf %808, %795 : vector<16x32xf32>
    %810 = vector.broadcast %cst_211 : f32 to vector<16x32xf32>
    %811 = arith.minimumf %810, %809 : vector<16x32xf32>
    %c0_212 = arith.constant 0 : index
    %812 = memref.load %arg11[%c0_212] : memref<4xf32, #tpu.memory_space<smem>>
    %813 = vector.broadcast %812 : f32 to vector<16x32xf32>
    %c1_213 = arith.constant 1 : index
    %814 = memref.load %arg11[%c1_213] : memref<4xf32, #tpu.memory_space<smem>>
    %815 = vector.broadcast %814 : f32 to vector<16x32xf32>
    %c2_214 = arith.constant 2 : index
    %816 = memref.load %arg11[%c2_214] : memref<4xf32, #tpu.memory_space<smem>>
    %817 = vector.broadcast %816 : f32 to vector<16x32xf32>
    %c3_215 = arith.constant 3 : index
    %818 = memref.load %arg11[%c3_215] : memref<4xf32, #tpu.memory_space<smem>>
    %819 = vector.broadcast %818 : f32 to vector<16x32xf32>
    %c1_i32_216 = arith.constant 1 : i32
    %820 = tpu.dynamic_rotate %799 by %c1_i32_216 dim 0 : vector<16x32xf32>, i32 -> vector<16x32xf32>
    %cst_217 = arith.constant 0.000000e+00 : f32
    %821 = vector.broadcast %cst_217 : f32 to vector<16x32xf32>
    %822 = arith.select %11, %820, %821 : vector<16x32xi1>, vector<16x32xf32>
    %c0_218 = arith.constant 0 : index
    %823 = memref.load %arg10[%c0_218] : memref<48xf32, #tpu.memory_space<smem>>
    %824 = vector.broadcast %823 : f32 to vector<16x32xf32>
    %825 = arith.mulf %822, %824 : vector<16x32xf32>
    %826 = arith.addf %813, %825 : vector<16x32xf32>
    %c12_219 = arith.constant 12 : index
    %827 = memref.load %arg10[%c12_219] : memref<48xf32, #tpu.memory_space<smem>>
    %828 = vector.broadcast %827 : f32 to vector<16x32xf32>
    %829 = arith.mulf %822, %828 : vector<16x32xf32>
    %830 = arith.addf %815, %829 : vector<16x32xf32>
    %c24_220 = arith.constant 24 : index
    %831 = memref.load %arg10[%c24_220] : memref<48xf32, #tpu.memory_space<smem>>
    %832 = vector.broadcast %831 : f32 to vector<16x32xf32>
    %833 = arith.mulf %822, %832 : vector<16x32xf32>
    %834 = arith.addf %817, %833 : vector<16x32xf32>
    %c36_221 = arith.constant 36 : index
    %835 = memref.load %arg10[%c36_221] : memref<48xf32, #tpu.memory_space<smem>>
    %836 = vector.broadcast %835 : f32 to vector<16x32xf32>
    %837 = arith.mulf %822, %836 : vector<16x32xf32>
    %838 = arith.addf %819, %837 : vector<16x32xf32>
    %c1_222 = arith.constant 1 : index
    %839 = memref.load %arg10[%c1_222] : memref<48xf32, #tpu.memory_space<smem>>
    %840 = vector.broadcast %839 : f32 to vector<16x32xf32>
    %841 = arith.mulf %799, %840 : vector<16x32xf32>
    %842 = arith.addf %826, %841 : vector<16x32xf32>
    %c13_223 = arith.constant 13 : index
    %843 = memref.load %arg10[%c13_223] : memref<48xf32, #tpu.memory_space<smem>>
    %844 = vector.broadcast %843 : f32 to vector<16x32xf32>
    %845 = arith.mulf %799, %844 : vector<16x32xf32>
    %846 = arith.addf %830, %845 : vector<16x32xf32>
    %c25_224 = arith.constant 25 : index
    %847 = memref.load %arg10[%c25_224] : memref<48xf32, #tpu.memory_space<smem>>
    %848 = vector.broadcast %847 : f32 to vector<16x32xf32>
    %849 = arith.mulf %799, %848 : vector<16x32xf32>
    %850 = arith.addf %834, %849 : vector<16x32xf32>
    %c37_225 = arith.constant 37 : index
    %851 = memref.load %arg10[%c37_225] : memref<48xf32, #tpu.memory_space<smem>>
    %852 = vector.broadcast %851 : f32 to vector<16x32xf32>
    %853 = arith.mulf %799, %852 : vector<16x32xf32>
    %854 = arith.addf %838, %853 : vector<16x32xf32>
    %c15_i32_226 = arith.constant 15 : i32
    %855 = tpu.dynamic_rotate %799 by %c15_i32_226 dim 0 : vector<16x32xf32>, i32 -> vector<16x32xf32>
    %cst_227 = arith.constant 0.000000e+00 : f32
    %856 = vector.broadcast %cst_227 : f32 to vector<16x32xf32>
    %857 = arith.select %9, %855, %856 : vector<16x32xi1>, vector<16x32xf32>
    %c2_228 = arith.constant 2 : index
    %858 = memref.load %arg10[%c2_228] : memref<48xf32, #tpu.memory_space<smem>>
    %859 = vector.broadcast %858 : f32 to vector<16x32xf32>
    %860 = arith.mulf %857, %859 : vector<16x32xf32>
    %861 = arith.addf %842, %860 : vector<16x32xf32>
    %c14_229 = arith.constant 14 : index
    %862 = memref.load %arg10[%c14_229] : memref<48xf32, #tpu.memory_space<smem>>
    %863 = vector.broadcast %862 : f32 to vector<16x32xf32>
    %864 = arith.mulf %857, %863 : vector<16x32xf32>
    %865 = arith.addf %846, %864 : vector<16x32xf32>
    %c26_230 = arith.constant 26 : index
    %866 = memref.load %arg10[%c26_230] : memref<48xf32, #tpu.memory_space<smem>>
    %867 = vector.broadcast %866 : f32 to vector<16x32xf32>
    %868 = arith.mulf %857, %867 : vector<16x32xf32>
    %869 = arith.addf %850, %868 : vector<16x32xf32>
    %c38_231 = arith.constant 38 : index
    %870 = memref.load %arg10[%c38_231] : memref<48xf32, #tpu.memory_space<smem>>
    %871 = vector.broadcast %870 : f32 to vector<16x32xf32>
    %872 = arith.mulf %857, %871 : vector<16x32xf32>
    %873 = arith.addf %854, %872 : vector<16x32xf32>
    %c1_i32_232 = arith.constant 1 : i32
    %874 = tpu.dynamic_rotate %803 by %c1_i32_232 dim 0 : vector<16x32xf32>, i32 -> vector<16x32xf32>
    %cst_233 = arith.constant 0.000000e+00 : f32
    %875 = vector.broadcast %cst_233 : f32 to vector<16x32xf32>
    %876 = arith.select %11, %874, %875 : vector<16x32xi1>, vector<16x32xf32>
    %c3_234 = arith.constant 3 : index
    %877 = memref.load %arg10[%c3_234] : memref<48xf32, #tpu.memory_space<smem>>
    %878 = vector.broadcast %877 : f32 to vector<16x32xf32>
    %879 = arith.mulf %876, %878 : vector<16x32xf32>
    %880 = arith.addf %861, %879 : vector<16x32xf32>
    %c15_235 = arith.constant 15 : index
    %881 = memref.load %arg10[%c15_235] : memref<48xf32, #tpu.memory_space<smem>>
    %882 = vector.broadcast %881 : f32 to vector<16x32xf32>
    %883 = arith.mulf %876, %882 : vector<16x32xf32>
    %884 = arith.addf %865, %883 : vector<16x32xf32>
    %c27_236 = arith.constant 27 : index
    %885 = memref.load %arg10[%c27_236] : memref<48xf32, #tpu.memory_space<smem>>
    %886 = vector.broadcast %885 : f32 to vector<16x32xf32>
    %887 = arith.mulf %876, %886 : vector<16x32xf32>
    %888 = arith.addf %869, %887 : vector<16x32xf32>
    %c39_237 = arith.constant 39 : index
    %889 = memref.load %arg10[%c39_237] : memref<48xf32, #tpu.memory_space<smem>>
    %890 = vector.broadcast %889 : f32 to vector<16x32xf32>
    %891 = arith.mulf %876, %890 : vector<16x32xf32>
    %892 = arith.addf %873, %891 : vector<16x32xf32>
    %c4_238 = arith.constant 4 : index
    %893 = memref.load %arg10[%c4_238] : memref<48xf32, #tpu.memory_space<smem>>
    %894 = vector.broadcast %893 : f32 to vector<16x32xf32>
    %895 = arith.mulf %803, %894 : vector<16x32xf32>
    %896 = arith.addf %880, %895 : vector<16x32xf32>
    %c16_239 = arith.constant 16 : index
    %897 = memref.load %arg10[%c16_239] : memref<48xf32, #tpu.memory_space<smem>>
    %898 = vector.broadcast %897 : f32 to vector<16x32xf32>
    %899 = arith.mulf %803, %898 : vector<16x32xf32>
    %900 = arith.addf %884, %899 : vector<16x32xf32>
    %c28_240 = arith.constant 28 : index
    %901 = memref.load %arg10[%c28_240] : memref<48xf32, #tpu.memory_space<smem>>
    %902 = vector.broadcast %901 : f32 to vector<16x32xf32>
    %903 = arith.mulf %803, %902 : vector<16x32xf32>
    %904 = arith.addf %888, %903 : vector<16x32xf32>
    %c40_241 = arith.constant 40 : index
    %905 = memref.load %arg10[%c40_241] : memref<48xf32, #tpu.memory_space<smem>>
    %906 = vector.broadcast %905 : f32 to vector<16x32xf32>
    %907 = arith.mulf %803, %906 : vector<16x32xf32>
    %908 = arith.addf %892, %907 : vector<16x32xf32>
    %c15_i32_242 = arith.constant 15 : i32
    %909 = tpu.dynamic_rotate %803 by %c15_i32_242 dim 0 : vector<16x32xf32>, i32 -> vector<16x32xf32>
    %cst_243 = arith.constant 0.000000e+00 : f32
    %910 = vector.broadcast %cst_243 : f32 to vector<16x32xf32>
    %911 = arith.select %9, %909, %910 : vector<16x32xi1>, vector<16x32xf32>
    %c5_244 = arith.constant 5 : index
    %912 = memref.load %arg10[%c5_244] : memref<48xf32, #tpu.memory_space<smem>>
    %913 = vector.broadcast %912 : f32 to vector<16x32xf32>
    %914 = arith.mulf %911, %913 : vector<16x32xf32>
    %915 = arith.addf %896, %914 : vector<16x32xf32>
    %c17_245 = arith.constant 17 : index
    %916 = memref.load %arg10[%c17_245] : memref<48xf32, #tpu.memory_space<smem>>
    %917 = vector.broadcast %916 : f32 to vector<16x32xf32>
    %918 = arith.mulf %911, %917 : vector<16x32xf32>
    %919 = arith.addf %900, %918 : vector<16x32xf32>
    %c29_246 = arith.constant 29 : index
    %920 = memref.load %arg10[%c29_246] : memref<48xf32, #tpu.memory_space<smem>>
    %921 = vector.broadcast %920 : f32 to vector<16x32xf32>
    %922 = arith.mulf %911, %921 : vector<16x32xf32>
    %923 = arith.addf %904, %922 : vector<16x32xf32>
    %c41_247 = arith.constant 41 : index
    %924 = memref.load %arg10[%c41_247] : memref<48xf32, #tpu.memory_space<smem>>
    %925 = vector.broadcast %924 : f32 to vector<16x32xf32>
    %926 = arith.mulf %911, %925 : vector<16x32xf32>
    %927 = arith.addf %908, %926 : vector<16x32xf32>
    %c1_i32_248 = arith.constant 1 : i32
    %928 = tpu.dynamic_rotate %807 by %c1_i32_248 dim 0 : vector<16x32xf32>, i32 -> vector<16x32xf32>
    %cst_249 = arith.constant 0.000000e+00 : f32
    %929 = vector.broadcast %cst_249 : f32 to vector<16x32xf32>
    %930 = arith.select %11, %928, %929 : vector<16x32xi1>, vector<16x32xf32>
    %c6_250 = arith.constant 6 : index
    %931 = memref.load %arg10[%c6_250] : memref<48xf32, #tpu.memory_space<smem>>
    %932 = vector.broadcast %931 : f32 to vector<16x32xf32>
    %933 = arith.mulf %930, %932 : vector<16x32xf32>
    %934 = arith.addf %915, %933 : vector<16x32xf32>
    %c18_251 = arith.constant 18 : index
    %935 = memref.load %arg10[%c18_251] : memref<48xf32, #tpu.memory_space<smem>>
    %936 = vector.broadcast %935 : f32 to vector<16x32xf32>
    %937 = arith.mulf %930, %936 : vector<16x32xf32>
    %938 = arith.addf %919, %937 : vector<16x32xf32>
    %c30_252 = arith.constant 30 : index
    %939 = memref.load %arg10[%c30_252] : memref<48xf32, #tpu.memory_space<smem>>
    %940 = vector.broadcast %939 : f32 to vector<16x32xf32>
    %941 = arith.mulf %930, %940 : vector<16x32xf32>
    %942 = arith.addf %923, %941 : vector<16x32xf32>
    %c42_253 = arith.constant 42 : index
    %943 = memref.load %arg10[%c42_253] : memref<48xf32, #tpu.memory_space<smem>>
    %944 = vector.broadcast %943 : f32 to vector<16x32xf32>
    %945 = arith.mulf %930, %944 : vector<16x32xf32>
    %946 = arith.addf %927, %945 : vector<16x32xf32>
    %c7_254 = arith.constant 7 : index
    %947 = memref.load %arg10[%c7_254] : memref<48xf32, #tpu.memory_space<smem>>
    %948 = vector.broadcast %947 : f32 to vector<16x32xf32>
    %949 = arith.mulf %807, %948 : vector<16x32xf32>
    %950 = arith.addf %934, %949 : vector<16x32xf32>
    %c19_255 = arith.constant 19 : index
    %951 = memref.load %arg10[%c19_255] : memref<48xf32, #tpu.memory_space<smem>>
    %952 = vector.broadcast %951 : f32 to vector<16x32xf32>
    %953 = arith.mulf %807, %952 : vector<16x32xf32>
    %954 = arith.addf %938, %953 : vector<16x32xf32>
    %c31_256 = arith.constant 31 : index
    %955 = memref.load %arg10[%c31_256] : memref<48xf32, #tpu.memory_space<smem>>
    %956 = vector.broadcast %955 : f32 to vector<16x32xf32>
    %957 = arith.mulf %807, %956 : vector<16x32xf32>
    %958 = arith.addf %942, %957 : vector<16x32xf32>
    %c43_257 = arith.constant 43 : index
    %959 = memref.load %arg10[%c43_257] : memref<48xf32, #tpu.memory_space<smem>>
    %960 = vector.broadcast %959 : f32 to vector<16x32xf32>
    %961 = arith.mulf %807, %960 : vector<16x32xf32>
    %962 = arith.addf %946, %961 : vector<16x32xf32>
    %c15_i32_258 = arith.constant 15 : i32
    %963 = tpu.dynamic_rotate %807 by %c15_i32_258 dim 0 : vector<16x32xf32>, i32 -> vector<16x32xf32>
    %cst_259 = arith.constant 0.000000e+00 : f32
    %964 = vector.broadcast %cst_259 : f32 to vector<16x32xf32>
    %965 = arith.select %9, %963, %964 : vector<16x32xi1>, vector<16x32xf32>
    %c8_260 = arith.constant 8 : index
    %966 = memref.load %arg10[%c8_260] : memref<48xf32, #tpu.memory_space<smem>>
    %967 = vector.broadcast %966 : f32 to vector<16x32xf32>
    %968 = arith.mulf %965, %967 : vector<16x32xf32>
    %969 = arith.addf %950, %968 : vector<16x32xf32>
    %c20_261 = arith.constant 20 : index
    %970 = memref.load %arg10[%c20_261] : memref<48xf32, #tpu.memory_space<smem>>
    %971 = vector.broadcast %970 : f32 to vector<16x32xf32>
    %972 = arith.mulf %965, %971 : vector<16x32xf32>
    %973 = arith.addf %954, %972 : vector<16x32xf32>
    %c32_262 = arith.constant 32 : index
    %974 = memref.load %arg10[%c32_262] : memref<48xf32, #tpu.memory_space<smem>>
    %975 = vector.broadcast %974 : f32 to vector<16x32xf32>
    %976 = arith.mulf %965, %975 : vector<16x32xf32>
    %977 = arith.addf %958, %976 : vector<16x32xf32>
    %c44_263 = arith.constant 44 : index
    %978 = memref.load %arg10[%c44_263] : memref<48xf32, #tpu.memory_space<smem>>
    %979 = vector.broadcast %978 : f32 to vector<16x32xf32>
    %980 = arith.mulf %965, %979 : vector<16x32xf32>
    %981 = arith.addf %962, %980 : vector<16x32xf32>
    %c1_i32_264 = arith.constant 1 : i32
    %982 = tpu.dynamic_rotate %811 by %c1_i32_264 dim 0 : vector<16x32xf32>, i32 -> vector<16x32xf32>
    %cst_265 = arith.constant 0.000000e+00 : f32
    %983 = vector.broadcast %cst_265 : f32 to vector<16x32xf32>
    %984 = arith.select %11, %982, %983 : vector<16x32xi1>, vector<16x32xf32>
    %c9_266 = arith.constant 9 : index
    %985 = memref.load %arg10[%c9_266] : memref<48xf32, #tpu.memory_space<smem>>
    %986 = vector.broadcast %985 : f32 to vector<16x32xf32>
    %987 = arith.mulf %984, %986 : vector<16x32xf32>
    %988 = arith.addf %969, %987 : vector<16x32xf32>
    %c21_267 = arith.constant 21 : index
    %989 = memref.load %arg10[%c21_267] : memref<48xf32, #tpu.memory_space<smem>>
    %990 = vector.broadcast %989 : f32 to vector<16x32xf32>
    %991 = arith.mulf %984, %990 : vector<16x32xf32>
    %992 = arith.addf %973, %991 : vector<16x32xf32>
    %c33_268 = arith.constant 33 : index
    %993 = memref.load %arg10[%c33_268] : memref<48xf32, #tpu.memory_space<smem>>
    %994 = vector.broadcast %993 : f32 to vector<16x32xf32>
    %995 = arith.mulf %984, %994 : vector<16x32xf32>
    %996 = arith.addf %977, %995 : vector<16x32xf32>
    %c45_269 = arith.constant 45 : index
    %997 = memref.load %arg10[%c45_269] : memref<48xf32, #tpu.memory_space<smem>>
    %998 = vector.broadcast %997 : f32 to vector<16x32xf32>
    %999 = arith.mulf %984, %998 : vector<16x32xf32>
    %1000 = arith.addf %981, %999 : vector<16x32xf32>
    %c10_270 = arith.constant 10 : index
    %1001 = memref.load %arg10[%c10_270] : memref<48xf32, #tpu.memory_space<smem>>
    %1002 = vector.broadcast %1001 : f32 to vector<16x32xf32>
    %1003 = arith.mulf %811, %1002 : vector<16x32xf32>
    %1004 = arith.addf %988, %1003 : vector<16x32xf32>
    %c22_271 = arith.constant 22 : index
    %1005 = memref.load %arg10[%c22_271] : memref<48xf32, #tpu.memory_space<smem>>
    %1006 = vector.broadcast %1005 : f32 to vector<16x32xf32>
    %1007 = arith.mulf %811, %1006 : vector<16x32xf32>
    %1008 = arith.addf %992, %1007 : vector<16x32xf32>
    %c34_272 = arith.constant 34 : index
    %1009 = memref.load %arg10[%c34_272] : memref<48xf32, #tpu.memory_space<smem>>
    %1010 = vector.broadcast %1009 : f32 to vector<16x32xf32>
    %1011 = arith.mulf %811, %1010 : vector<16x32xf32>
    %1012 = arith.addf %996, %1011 : vector<16x32xf32>
    %c46_273 = arith.constant 46 : index
    %1013 = memref.load %arg10[%c46_273] : memref<48xf32, #tpu.memory_space<smem>>
    %1014 = vector.broadcast %1013 : f32 to vector<16x32xf32>
    %1015 = arith.mulf %811, %1014 : vector<16x32xf32>
    %1016 = arith.addf %1000, %1015 : vector<16x32xf32>
    %c15_i32_274 = arith.constant 15 : i32
    %1017 = tpu.dynamic_rotate %811 by %c15_i32_274 dim 0 : vector<16x32xf32>, i32 -> vector<16x32xf32>
    %cst_275 = arith.constant 0.000000e+00 : f32
    %1018 = vector.broadcast %cst_275 : f32 to vector<16x32xf32>
    %1019 = arith.select %9, %1017, %1018 : vector<16x32xi1>, vector<16x32xf32>
    %c11_276 = arith.constant 11 : index
    %1020 = memref.load %arg10[%c11_276] : memref<48xf32, #tpu.memory_space<smem>>
    %1021 = vector.broadcast %1020 : f32 to vector<16x32xf32>
    %1022 = arith.mulf %1019, %1021 : vector<16x32xf32>
    %1023 = arith.addf %1004, %1022 : vector<16x32xf32>
    %c23_277 = arith.constant 23 : index
    %1024 = memref.load %arg10[%c23_277] : memref<48xf32, #tpu.memory_space<smem>>
    %1025 = vector.broadcast %1024 : f32 to vector<16x32xf32>
    %1026 = arith.mulf %1019, %1025 : vector<16x32xf32>
    %1027 = arith.addf %1008, %1026 : vector<16x32xf32>
    %c35_278 = arith.constant 35 : index
    %1028 = memref.load %arg10[%c35_278] : memref<48xf32, #tpu.memory_space<smem>>
    %1029 = vector.broadcast %1028 : f32 to vector<16x32xf32>
    %1030 = arith.mulf %1019, %1029 : vector<16x32xf32>
    %1031 = arith.addf %1012, %1030 : vector<16x32xf32>
    %c47_279 = arith.constant 47 : index
    %1032 = memref.load %arg10[%c47_279] : memref<48xf32, #tpu.memory_space<smem>>
    %1033 = vector.broadcast %1032 : f32 to vector<16x32xf32>
    %1034 = arith.mulf %1019, %1033 : vector<16x32xf32>
    %1035 = arith.addf %1016, %1034 : vector<16x32xf32>
    %cst_280 = arith.constant 0.000000e+00 : f32
    %cst_281 = arith.constant 6.000000e+00 : f32
    %1036 = vector.broadcast %cst_280 : f32 to vector<16x32xf32>
    %1037 = arith.maximumf %1036, %1023 : vector<16x32xf32>
    %1038 = vector.broadcast %cst_281 : f32 to vector<16x32xf32>
    %1039 = arith.minimumf %1038, %1037 : vector<16x32xf32>
    %cst_282 = arith.constant 0.000000e+00 : f32
    %cst_283 = arith.constant 6.000000e+00 : f32
    %1040 = vector.broadcast %cst_282 : f32 to vector<16x32xf32>
    %1041 = arith.maximumf %1040, %1027 : vector<16x32xf32>
    %1042 = vector.broadcast %cst_283 : f32 to vector<16x32xf32>
    %1043 = arith.minimumf %1042, %1041 : vector<16x32xf32>
    %cst_284 = arith.constant 0.000000e+00 : f32
    %cst_285 = arith.constant 6.000000e+00 : f32
    %1044 = vector.broadcast %cst_284 : f32 to vector<16x32xf32>
    %1045 = arith.maximumf %1044, %1031 : vector<16x32xf32>
    %1046 = vector.broadcast %cst_285 : f32 to vector<16x32xf32>
    %1047 = arith.minimumf %1046, %1045 : vector<16x32xf32>
    %cst_286 = arith.constant 0.000000e+00 : f32
    %cst_287 = arith.constant 6.000000e+00 : f32
    %1048 = vector.broadcast %cst_286 : f32 to vector<16x32xf32>
    %1049 = arith.maximumf %1048, %1035 : vector<16x32xf32>
    %1050 = vector.broadcast %cst_287 : f32 to vector<16x32xf32>
    %1051 = arith.minimumf %1050, %1049 : vector<16x32xf32>
    %1052 = arith.addf %79, %1039 : vector<16x32xf32>
    %cst_288 = arith.constant 0.000000e+00 : f32
    %1053 = vector.broadcast %cst_288 : f32 to vector<16x32xf32>
    %1054 = arith.maximumf %1052, %1053 : vector<16x32xf32>
    %1055 = arith.addf %83, %1043 : vector<16x32xf32>
    %cst_289 = arith.constant 0.000000e+00 : f32
    %1056 = vector.broadcast %cst_289 : f32 to vector<16x32xf32>
    %1057 = arith.maximumf %1055, %1056 : vector<16x32xf32>
    %1058 = arith.addf %87, %1047 : vector<16x32xf32>
    %cst_290 = arith.constant 0.000000e+00 : f32
    %1059 = vector.broadcast %cst_290 : f32 to vector<16x32xf32>
    %1060 = arith.maximumf %1058, %1059 : vector<16x32xf32>
    %1061 = arith.addf %91, %1051 : vector<16x32xf32>
    %cst_291 = arith.constant 0.000000e+00 : f32
    %1062 = vector.broadcast %cst_291 : f32 to vector<16x32xf32>
    %1063 = arith.maximumf %1061, %1062 : vector<16x32xf32>
    %1064 = vector.shape_cast %1054 : vector<16x32xf32> to vector<1x16x32xf32>
    %1065 = vector.shape_cast %1057 : vector<16x32xf32> to vector<1x16x32xf32>
    %1066 = vector.shape_cast %1060 : vector<16x32xf32> to vector<1x16x32xf32>
    %1067 = vector.shape_cast %1063 : vector<16x32xf32> to vector<1x16x32xf32>
    %1068 = tpu.concatenate %1064, %1065, %1066, %1067 in 0 : vector<1x16x32xf32>, vector<1x16x32xf32>, vector<1x16x32xf32>, vector<1x16x32xf32> -> vector<4x16x32xf32>
    %c0_292 = arith.constant 0 : index
    %c0_293 = arith.constant 0 : index
    %c0_294 = arith.constant 0 : index
    %1069 = vector.load %arg12[%c0_292, %c0_293, %c0_294] : memref<4x16x32xf32, #tpu.memory_space<vmem>>, vector<4x16x32xf32>
    tpu.vector_store %arg12[%c0_292, %c0_293, %c0_294], %1068 {strides = array<i32>} : memref<4x16x32xf32, #tpu.memory_space<vmem>>, vector<4x16x32xf32>,
    return
  }
  func.func @transform_0(%arg0: i32) -> (i32, i32, i32) {
    %c0_i32 = arith.constant 0 : i32
    %c0_i32_0 = arith.constant 0 : i32
    %c0_i32_1 = arith.constant 0 : i32
    return %c0_i32, %c0_i32_0, %arg0 : i32, i32, i32
  }
  func.func @transform_1(%arg0: i32) -> i32 {
    %c0_i32 = arith.constant 0 : i32
    %c0_i32_0 = arith.constant 0 : i32
    return %c0_i32 : i32
  }
  func.func @transform_2(%arg0: i32) -> i32 {
    %c0_i32 = arith.constant 0 : i32
    %c0_i32_0 = arith.constant 0 : i32
    return %c0_i32 : i32
  }
  func.func @transform_3(%arg0: i32) -> i32 {
    %c0_i32 = arith.constant 0 : i32
    %c0_i32_0 = arith.constant 0 : i32
    return %c0_i32 : i32
  }
  func.func @transform_4(%arg0: i32) -> i32 {
    %c0_i32 = arith.constant 0 : i32
    %c0_i32_0 = arith.constant 0 : i32
    return %c0_i32 : i32
  }
  func.func @transform_5(%arg0: i32) -> i32 {
    %c0_i32 = arith.constant 0 : i32
    %c0_i32_0 = arith.constant 0 : i32
    return %c0_i32 : i32
  }
  func.func @transform_6(%arg0: i32) -> i32 {
    %c0_i32 = arith.constant 0 : i32
    %c0_i32_0 = arith.constant 0 : i32
    return %c0_i32 : i32
  }
  func.func @transform_7(%arg0: i32) -> i32 {
    %c0_i32 = arith.constant 0 : i32
    %c0_i32_0 = arith.constant 0 : i32
    return %c0_i32 : i32
  }
  func.func @transform_8(%arg0: i32) -> i32 {
    %c0_i32 = arith.constant 0 : i32
    %c0_i32_0 = arith.constant 0 : i32
    return %c0_i32 : i32
  }
  func.func @transform_9(%arg0: i32) -> i32 {
    %c0_i32 = arith.constant 0 : i32
    %c0_i32_0 = arith.constant 0 : i32
    return %c0_i32 : i32
  }
  func.func @transform_10(%arg0: i32) -> i32 {
    %c0_i32 = arith.constant 0 : i32
    %c0_i32_0 = arith.constant 0 : i32
    return %c0_i32 : i32
  }
  func.func @transform_11(%arg0: i32) -> (i32, i32, i32) {
    %c0_i32 = arith.constant 0 : i32
    %c0_i32_0 = arith.constant 0 : i32
    %c0_i32_1 = arith.constant 0 : i32
    return %c0_i32, %c0_i32_0, %arg0 : i32, i32, i32
  }
}

</mosaic_0001>

<bundles_post_ra>
// kernel: block_src7.1
= control target key start
LH: loop header
LB: loop body
LE: loop exit
PB: predicated region body
PF: predicated region fallthrough
CT: control target
= control target key end

     0   :  { %s4878_s0 = inlined_call_operand.vmem [shape: f32[4,16,32], index: 0, kind: input, shape index: {}]   ;;  %s4879_s1 = inlined_call_operand.vmem [shape: f32[16], index: 1, kind: input, shape index: {}]   ;;  %s4880_s2 = inlined_call_operand.vmem [shape: f32[4], index: 2, kind: input, shape index: {}]   ;;  %s4881_s3 = inlined_call_operand.vmem [shape: f32[48], index: 3, kind: input, shape index: {}]   ;;  %s4882_s4 = inlined_call_operand.vmem [shape: f32[4], index: 4, kind: input, shape index: {}]   ;;  %s4883_s5 = inlined_call_operand.vmem [shape: f32[48], index: 5, kind: input, shape index: {}]   ;;  %s4884_s6 = inlined_call_operand.vmem [shape: f32[4], index: 6, kind: input, shape index: {}]   ;;  %s4885_s7 = inlined_call_operand.vmem [shape: f32[48], index: 7, kind: input, shape index: {}]   ;;  %s4886_s8 = inlined_call_operand.vmem [shape: f32[4], index: 8, kind: input, shape index: {}]   ;;  %s4887_s9 = inlined_call_operand.vmem [shape: f32[48], index: 9, kind: input, shape index: {}]   ;;  %s4888_s10 = inlined_call_operand.vmem [shape: f32[4], index: 10, kind: input, shape index: {}]   ;;  %s4889_s11 = inlined_call_operand.vmem [shape: f32[4,16,32], index: 11, kind: output, shape index: {}]  }
   0x1   :  { %5065 = sst [smem:[#allocation74_spill]] %s4889_s11 }
   0x2   :  { %16 = vsyncpa [#allocation3], 0 }
   0x3   :  { %17 = vsyncpa [#allocation5], 0 }
   0x4   :  { %18 = vsyncpa [#allocation8], 0 }
   0x5   :  { %19 = vsyncpa [#allocation11], 0 }
   0x6   :  { %20 = vsyncpa [#allocation14], 0  ;;  %s38_s19 = sshll.u32 %s4880_s2, 4  ;;  %s39_s19 = int_to_ptr.vmem [resolvable:$true] %s38_s19 }
   0x7   :  { %21 = vsyncpa [#allocation17], 0  ;;  %s56_s22 = sshll.u32 %s4882_s4, 4  ;;  %s2273_s23 = smov [#allocation4]   ;;  %s57_s22 = int_to_ptr.vmem [resolvable:$true] %s56_s22 }
   0x8   :  { %41 = dma.vmem_to_smem %s39_s19, 16, %s2273_s23, [#allocation5]  }
   0x9   :  { %s2274_s24 = smov [#allocation7]   ;;  %s74_s27 = sshll.u32 %s4884_s6, 4  ;;  %s75_s27 = int_to_ptr.vmem [resolvable:$true] %s74_s27 }
   0xa   :  { %59 = dma.vmem_to_smem %s57_s22, 16, %s2274_s24, [#allocation8]  }
   0xb   :  { %s92_s2 = sshll.u32 %s4886_s8, 4  ;;  %s2275_s30 = smov [#allocation10]   ;;  %s93_s2 = int_to_ptr.vmem [resolvable:$true] %s92_s2 }
   0xc   :  { %77 = dma.vmem_to_smem %s75_s27, 16, %s2275_s30, [#allocation11]  }
   0xd   :  { %s2276_s12 = smov [#allocation13]   ;;  %s29_s14 = sshll.u32 %s4879_s1, 4  ;;  %s30_s14 = int_to_ptr.vmem [resolvable:$true] %s29_s14 }
   0xe   :  { %95 = dma.vmem_to_smem %s93_s2, 16, %s2276_s12, [#allocation14]  }
   0xf   :  { %s47_s17 = sshll.u32 %s4881_s3, 4  ;;  %s2277_s6 = smov [#allocation2]   ;;  %s48_s17 = int_to_ptr.vmem [resolvable:$true] %s47_s17 }
  0x10   :  { %32 = dma.vmem_to_smem %s30_s14, 16, %s2277_s6, [#allocation3]  }
  0x11   :  { %s2278_s18 = smov [#allocation6]   ;;  %s65_s20 = sshll.u32 %s4883_s5, 4  ;;  %s66_s20 = int_to_ptr.vmem [resolvable:$true] %s65_s20 }
  0x12   :  { %50 = dma.vmem_to_smem %s48_s17, 16, %s2278_s18, [#allocation5]  }
  0x13   :  { %s83_s23 = sshll.u32 %s4885_s7, 4  ;;  %s2279_s1 = smov [#allocation9]   ;;  %s84_s23 = int_to_ptr.vmem [resolvable:$true] %s83_s23 }
  0x14   :  { %68 = dma.vmem_to_smem %s66_s20, 16, %s2279_s1, [#allocation8]  }
  0x15   :  { %s2280_s24 = smov [#allocation12]   ;;  %s101_s26 = sshll.u32 %s4887_s9, 4  ;;  %s102_s26 = int_to_ptr.vmem [resolvable:$true] %s101_s26 }
  0x16   :  { %86 = dma.vmem_to_smem %s84_s23, 16, %s2280_s24, [#allocation11]  }
  0x17   :  { %s110_s29 = sshll.u32 %s4888_s10, 4  ;;  %s2281_s5 = smov [#allocation15]   ;;  %s111_s29 = int_to_ptr.vmem [resolvable:$true] %s110_s29 }
  0x18   :  { %104 = dma.vmem_to_smem %s102_s26, 16, %s2281_s5, [#allocation14]  }
  0x19   :  { %s2282_s2 = smov [#allocation16]  }
  0x1a   :  { %113 = dma.vmem_to_smem %s111_s29, 16, %s2282_s2, [#allocation17]  }
  0x1b   :  { %2261 = dma.done.wait [#allocation3], 16  }
  0x1c   :  { %2262 = vsyncadd [#allocation3], 4294967280 }
  0x1d   :  { %2263 = dma.done.wait [#allocation5], 32  }
  0x1e   :  { %2264 = vsyncadd [#allocation5], 4294967264 }
  0x1f   :  { %2265 = dma.done.wait [#allocation8], 32  }
  0x20   :  { %2266 = vsyncadd [#allocation8], 4294967264 }
  0x21   :  { %2267 = dma.done.wait [#allocation11], 32  }
  0x22   :  { %2268 = vsyncadd [#allocation11], 4294967264 }
  0x23   :  { %2269 = dma.done.wait [#allocation14], 32  }
  0x24   :  { %2270 = vsyncadd [#allocation14], 4294967264 }
  0x25   :  { %2271 = dma.done.wait [#allocation17], 16  }
  0x26   :  { %2272 = vsyncadd [#allocation17], 4294967280 }
  0x27   :  { %154 = sfence }
  0x28   :  { %s178_s7 = sld [smem:[#allocation4]]  ;;  %v2381_v0 = vld [vmem:[%s4878_s0] sm:$0xff]  ;;  %v2386_v1 = vld [vmem:[%s4878_s0 + $0x8] sm:$0xff]  ;;  %v2393_v2 = vld [vmem:[%s4878_s0 + $0x10] sm:$0xff]  ;;  %vm290_vm0 = vcmask 1047808   ;;  %s4890_s14 = smov 97  }
  0x29   :  { %s186_s9 = sld [smem:[#allocation2]]  ;;  %v2398_v3 = vld [vmem:[%s4878_s0 + $0x18] sm:$0xff]  ;;  %v2405_v4 = vld [vmem:[%s4878_s0 + $0x20] sm:$0xff]  ;;  %v2412_v7 = vld [vmem:[%s4878_s0 + $0x30] sm:$0xff]  ;;  %s4892_s15 = smov 127   ;;  %vm1885_vm7 = vcmask 261120  }
  0x2a   :  { %s1916_s10 = sld [smem:[#allocation2 + $0x1]]  ;;  %v2418_v10 = vld [vmem:[%s4878_s0 + $0x28] sm:$0xff]  ;;  %v2442_v25 = vld [vmem:[%s4878_s0 + $0x38] sm:$0xff] }
  0x2b   :  { %s1920_s30 = sld [smem:[#allocation2 + $0x2]] }
  0x2c   :  { %s2376_s12 = sld [smem:[#allocation2 + $0x3]] }
  0x2d   :  { %s2388_s16 = sld [smem:[#allocation4 + $0x1]] }
  0x2e   :  { %s2400_s19 = sld [smem:[#allocation2 + $0x4]]  ;;  %v179_v5 = vstv %s178_s7 }
  0x2f   :  { %v187_v6 = vstv %s186_s9  ;;  %s2407_s22 = sld [smem:[#allocation2 + $0x5]] }
  0x30   :  { %v188_v8 = vmul.f32 %v187_v6, %v2381_v0  ;;  %v211_v9 = vstv %s1916_s10  ;;  %v189_v11 = vmul.f32 %v187_v6, %v2386_v1  ;;  %s2421_s25 = sld [smem:[#allocation2 + $0x6]] }
  0x31   :  { %v212_v12 = vmul.f32 %v2393_v2, %v211_v9  ;;  %v235_v13 = vstv %s1920_s30  ;;  %v213_v14 = vmul.f32 %v2398_v3, %v211_v9  ;;  %s2425_s26 = sld [smem:[#allocation2 + $0x7]] }
  0x32   :  { %v190_v15 = vadd.f32 %v188_v8, %v179_v5  ;;  %v236_v16 = vmul.f32 %v2405_v4, %v235_v13  ;;  %v259_v17 = vstv %s2376_s12  ;;  %v191_v18 = vadd.f32 %v189_v11, %v179_v5  ;;  %s2429_s27 = sld [smem:[#allocation4 + $0x2]]  ;;  %s4894_s12 = smov 32  }
  0x33   :  { %v260_v19 = vmul.f32 %v2412_v7, %v259_v17  ;;  %v237_v20 = vmul.f32 %v2418_v10, %v235_v13  ;;  %s2433_s28 = sld [smem:[#allocation2 + $0x8]]  ;;  %v181_v23 = vstv %s2388_s16  ;;  %v261_v38 = vmul.f32 %v2442_v25, %v259_v17 }
  0x34   :  { %v214_v21 = vadd.f32 %v212_v12, %v190_v15  ;;  %v215_v22 = vadd.f32 %v213_v14, %v191_v18  ;;  %v193_v24 = vstv %s2400_s19  ;;  %s2437_s29 = sld [smem:[#allocation2 + $0x9]] }
  0x35   :  { %v194_v26 = vmul.f32 %v193_v24, %v2381_v0  ;;  %v217_v27 = vstv %s2407_s22  ;;  %v195_v28 = vmul.f32 %v193_v24, %v2386_v1  ;;  %s2447_s7 = sld [smem:[#allocation2 + $0xa]] }
  0x36   :  { %v238_v29 = vadd.f32 %v236_v16, %v214_v21  ;;  %v218_v30 = vmul.f32 %v2393_v2, %v217_v27  ;;  %v241_v31 = vstv %s2421_s25  ;;  %s2451_s9 = sld [smem:[#allocation2 + $0xb]]  ;;  %v239_v37 = vadd.f32 %v237_v20, %v215_v22 }
  0x37   :  { %v196_v32 = vadd.f32 %v194_v26, %v181_v23  ;;  %v242_v33 = vmul.f32 %v2405_v4, %v241_v31  ;;  %v265_v34 = vstv %s2425_s26  ;;  %v197_v35 = vadd.f32 %v195_v28, %v181_v23  ;;  %s2455_s0 = sld [smem:[#allocation4 + $0x3]] }
  0x38   :  { %v2457_v36 = vadd.f32 %v260_v19, %v238_v29  ;;  %v219_v39 = vmul.f32 %v2398_v3, %v217_v27  ;;  %s2461_s10 = sld [smem:[#allocation2 + $0xc]]  ;;  %v266_v41 = vmul.f32 %v2412_v7, %v265_v34  ;;  %v243_v42 = vmul.f32 %v2418_v10, %v241_v31 }
  0x39   :  { %v220_v40 = vadd.f32 %v218_v30, %v196_v32  ;;  %s2465_s30 = sld [smem:[#allocation2 + $0xd]]  ;;  %v183_v44 = vstv %s2429_s27  ;;  %v199_v45 = vstv %s2433_s28  ;;  %v2477_v51 = vadd.f32 %v261_v38, %v239_v37 }
  0x3a   :  { %5066 = vst [vmem:[#allocation24_spill] sm:$0xff] %v2457_v36  ;;  %291 = vrot.lane.b32.xlu0 %v2457_v36, %s4894_s12  ;;  %v221_v43 = vadd.f32 %v219_v39, %v197_v35  ;;  %v223_v46 = vstv %s2437_s29  ;;  %s2472_s4 = sld [smem:[#allocation2 + $0xe]]  ;;  %v200_v48 = vmul.f32 %v199_v45, %v2381_v0  ;;  %v267_v52 = vmul.f32 %v2442_v25, %v265_v34 }
  0x3b   :  { %v244_v47 = vadd.f32 %v242_v33, %v220_v40  ;;  %v224_v49 = vmul.f32 %v2393_v2, %v223_v46  ;;  %v247_v50 = vstv %s2447_s7  ;;  %5067 = vst [vmem:[#allocation25_spill] sm:$0xff] %v2477_v51  ;;  %s2481_s13 = sld [smem:[#allocation2 + $0xf]]  ;;  %v201_v54 = vmul.f32 %v199_v45, %v2386_v1 }
  0x3c   :  { %v271_v53 = vstv %s2451_s9  ;;  %v245_v56 = vadd.f32 %v243_v42, %v221_v43  ;;  %v202_v57 = vadd.f32 %v200_v48, %v183_v44  ;;  %v248_v58 = vmul.f32 %v2405_v4, %v247_v50  ;;  %s2584_s16 = sld [smem:[#allocation7]] }
  0x3d   :  { %v2484_v55 = vadd.f32 %v266_v41, %v244_v47  ;;  %v185_v59 = vstv %s2455_s0  ;;  %v203_v61 = vadd.f32 %v201_v54, %v183_v44  ;;  %v225_v62 = vmul.f32 %v2398_v3, %v223_v46  ;;  %s2586_s17 = sld [smem:[#allocation7 + $0x1]] }
  0x3e   :  { %v205_v60 = vstv %s2461_s10  ;;  %v226_v63 = vadd.f32 %v224_v49, %v202_v57  ;;  %v272_v5 = vmul.f32 %v2412_v7, %v271_v53  ;;  %v249_v15 = vmul.f32 %v2418_v10, %v247_v50  ;;  %s2588_s6 = sld [smem:[#allocation7 + $0x2]] }
  0x3f   :  { %5068 = vst [vmem:[#allocation26_spill] sm:$0xff] %v2484_v55  ;;  %393 = vrot.lane.b32.xlu1 %v2484_v55, %s4894_s12  ;;  %v207_v6 = vmul.f32 %v205_v60, %v2386_v1  ;;  %v229_v8 = vstv %s2465_s30  ;;  %v227_v14 = vadd.f32 %v225_v62, %v203_v61  ;;  %v206_v16 = vmul.f32 %v205_v60, %v2381_v0  ;;  %s2590_s18 = sld [smem:[#allocation7 + $0x3]] }
  0x40   :  { %v231_v9 = vmul.f32 %v2398_v3, %v229_v8  ;;  %v253_v11 = vstv %s2472_s4  ;;  %v250_v12 = vadd.f32 %v248_v58, %v226_v63  ;;  %v230_v17 = vmul.f32 %v2393_v2, %v229_v8  ;;  %s2592_s8 = sld [smem:[#allocation6]] }
  0x41   :  { %v209_v13 = vadd.f32 %v207_v6, %v185_v59  ;;  %v2502_v18 = vadd.f32 %v267_v52, %v245_v56  ;;  %v255_v3 = vmul.f32 %v2418_v10, %v253_v11  ;;  %v277_v20 = vstv %s2481_s13  ;;  %s2594_s19 = sld [smem:[#allocation6 + $0xc]] }
  0x42   :  { %294 = vrot.lane.b32.xlu0 %v2477_v51, %s4894_s12  ;;  %v2504_v19 = vadd.f32 %v272_v5, %v250_v12  ;;  %v208_v21 = vadd.f32 %v206_v16, %v185_v59  ;;  %v254_v22 = vmul.f32 %v2405_v4, %v253_v11  ;;  %v251_v23 = vadd.f32 %v249_v15, %v227_v14  ;;  %s2596_s20 = sld [smem:[#allocation6 + $0x18]] }
  0x43   :  { %5069 = vst [vmem:[#allocation27_spill] sm:$0xff] %v2502_v18  ;;  %v233_v1 = vadd.f32 %v231_v9, %v209_v13  ;;  %v273_v24 = vmul.f32 %v2442_v25, %v271_v53  ;;  %v278_v2 = vmul.f32 %v2412_v7, %v277_v20  ;;  %v279_v27 = vmul.f32 %v2442_v25, %v277_v20  ;;  %s2598_s21 = sld [smem:[#allocation6 + $0x24]] }
  0x44   :  { %5070 = vst [vmem:[#allocation28_spill] sm:$0xff] %v2504_v19  ;;  %495 = vrot.lane.b32.xlu2 %v2504_v19, %s4894_s12  ;;  %v232_v0 = vadd.f32 %v230_v17, %v208_v21  ;;  %s2600_s22 = sld [smem:[#allocation6 + $0x2]]  ;;  %v4901_v63 = vlaneseq  ;;  %v283_v8 = vstv %s2584_s16  ;;  %v285_v9 = vstv %s2586_s17 }
  0x45   :  { %v257_v26 = vadd.f32 %v255_v3, %v233_v1  ;;  %v2516_v28 = vadd.f32 %v273_v24, %v251_v23  ;;  %s2602_s23 = sld [smem:[#allocation6 + $0xe]]  ;;  %v287_v11 = vstv %s2588_s6  ;;  %v289_v12 = vstv %s2590_s18 }
  0x46   :  { %v256_v10 = vadd.f32 %v254_v22, %v232_v0  ;;  %s2604_s1 = sld [smem:[#allocation6 + $0x1]]  ;;  %v156_v5 = vand.u32 127, %v4901_v63  ;;  %v314_v15 = vstv %s2592_s8 }
  0x47   :  { %396 = vrot.lane.b32.xlu1 %v2502_v18, %s4894_s12  ;;  %5071 = vst [vmem:[#allocation29_spill] sm:$0xff] %v2516_v28  ;;  %v2520_v4 = vadd.f32 %v279_v27, %v257_v26  ;;  %s2606_s24 = sld [smem:[#allocation6 + $0xd]]  ;;  %v320_v16 = vstv %s2594_s19 }
  0x48   :  { %v2518_v29 = vadd.f32 %v278_v2, %v256_v10  ;;  %s2608_s3 = sld [smem:[#allocation6 + $0x19]]  ;;  %v157_v6 = vand.u32 15, %v156_v5  ;;  %v326_v3 = vstv %s2596_s20 }
  0x49   :  { %5073 = vst [vmem:[#allocation31_spill] sm:$0xff] %v2520_v4  ;;  %s2610_s25 = sld [smem:[#allocation6 + $0x25]]  ;;  %v332_v20 = vstv %s2598_s21 }
  0x4a   :  { %5072 = vst [vmem:[#allocation30_spill] sm:$0xff] %v2518_v29  ;;  %597 = vrot.lane.b32.xlu0 %v2518_v29, %s4894_s12  ;;  %s2612_s26 = sld [smem:[#allocation6 + $0x1a]]  ;;  %vm2641_vm1 = vcmp.ne.s32.totalorder %v157_v6, 0  ;;  %v370_v24 = vstv %s2600_s22  ;;  %vm2663_vm2 = vcmp.ne.s32.totalorder %v157_v6, 15 }
  0x4b   :  { %s2614_s27 = sld [smem:[#allocation6 + $0x26]]  ;;  %v4902_v0 = vstv %s2602_s23 }
  0x4c   :  { %498 = vrot.lane.b32.xlu2 %v2516_v28, %s4894_s12  ;;  %s2616_s28 = sld [smem:[#allocation6 + $0x3]]  ;;  %v338_v17 = vstv %s2604_s1 }
  0x4d   :  { %s2618_s29 = sld [smem:[#allocation6 + $0xf]]  ;;  %v344_v1 = vstv %s2606_s24  ;;  %v339_v10 = vmul.f32 %v338_v17, %v2457_v36 }
  0x4e   :  { %s2621_s5 = sld [smem:[#allocation6 + $0x1b]]  ;;  %v350_v21 = vstv %s2608_s3 }
  0x4f   :  { %600 = vrot.lane.b32.xlu1 %v2520_v4, %s4894_s12  ;;  %s2623_s2 = sld [smem:[#allocation6 + $0x27]]  ;;  %v356_v22 = vstv %s2610_s25 }
  0x50   :  { %5074 = sst [smem:[#allocation32_spill]] %s2612_s26  ;;  %v382_v26 = vstv %s2612_s26 }
  0x51   :  { %s2625_s7 = sld [smem:[#allocation6 + $0x4]]  ;;  %v388_v27 = vstv %s2614_s27 }
  0x52   :  { %s2627_s9 = sld [smem:[#allocation6 + $0x10]] }
  0x53   :  { %s2629_s0 = sld [smem:[#allocation6 + $0x1c]] }
  0x54   :  { %s2631_s10 = sld [smem:[#allocation6 + $0x28]] }
  0x55   :  { %5075 = sst [smem:[#allocation33_spill]] %s2623_s2 }
  0x56   :  { %s2633_s30 = sld [smem:[#allocation6 + $0x5]] }
  0x57   :  { %s2636_s4 = sld [smem:[#allocation6 + $0x11]] }
  0x58   :  { %s2645_s13 = sld [smem:[#allocation6 + $0x1d]] }
  0x59   :  { %s2667_s1 = sld [smem:[#allocation6 + $0x14]] }
  0x5a   :  { %s2673_s24 = sld [smem:[#allocation6 + $0x20]] }
  0x5b   :  { %s2679_s3 = sld [smem:[#allocation6 + $0x2c]] }
  0x5c   :  { %s2688_s25 = sld [smem:[#allocation6 + $0x9]] }
  0x5d   :  { %s2709_s11 = sld [smem:[#allocation6 + $0x21]] }
  0x5e   :  { %s2767_s26 = sld [smem:[#allocation6 + $0x13]] }
  0x5f   :  { %s2789_s8 = sld [smem:[#allocation6 + $0x2b]] }
  0x60   :  { %s2798_s20 = sld [smem:[#allocation6 + $0xa]] }
  0x61   :  { %s2806_s21 = sld [smem:[#allocation6 + $0x16]] }
  0x62   :  { %s2814_s16 = sld [smem:[#allocation6 + $0x22]] }
  0x63   :  { %5083 = sst [smem:[#allocation37_spill]] %s2709_s11 }
  0x64   :  { %s2822_s17 = sld [smem:[#allocation6 + $0x2e]] }
  0x65   :  { %s2829_s6 = sld [smem:[#allocation6 + $0xb]] }
  0x66   :  { %s2835_s18 = sld [smem:[#allocation6 + $0x17]] }
  0x67   :  { %5086 = sst [smem:[#allocation33_spill]] %s2806_s21 }
  0x68   :  { %5087 = sst [smem:[#allocation39_spill]] %s2814_s16 }
  0x69   :  { %s2849_s11 = sld [smem:[#allocation6 + $0x2f]] }
  0x6a   :  { %5088 = sst [smem:[#allocation40_spill]] %s2822_s17 }
  0x6b   :  { %s2933_s19 = sld [smem:[#allocation9 + $0x10]] }
  0x6c   :  { %s2960_s27 = sld [smem:[#allocation9 + $0x7]] }
  0x6d   :  { %s3135_s22 = sld [smem:[#allocation9 + $0x1b]] }
  0x71   :  { %5095 = sst [smem:[#allocation42_spill]] %s2933_s19 }
  0x72   :  { %5099 = sst [smem:[#allocation44_spill]] %s2960_s27 }
  0x73   :  { %5123 = sst [smem:[#allocation53_spill]] %s3135_s22 }
  0x9e   :  { %v496_v7 = vpop.permute.xlu2 %495 }
  0x9f   :  { %v497_v40 = vsel %vm290_vm0, %v496_v7, %v2504_v19  ;;  %v345_v7 = vmul.f32 %v344_v1, %v2457_v36 }
  0xa6   :  { %v499_v35 = vpop.permute.xlu2 %498 }
  0xa7   :  { %v500_v37 = vsel %vm290_vm0, %v499_v35, %v2516_v28 }
  0xac   :  { %v292_v30 = vpop.permute.xlu0 %291 }
  0xad   :  { %v293_v25 = vsel %vm290_vm0, %v292_v30, %v2457_v36  ;;  %v351_v30 = vmul.f32 %v350_v21, %v2457_v36 }
  0xae   :  { %297 = vrot.lane.b32.xlu2 %v293_v25, %s4894_s12  ;;  %v357_v25 = vmul.f32 %v356_v22, %v2457_v36 }
  0xb1   :  { %v394_v31 = vpop.permute.xlu1 %393 }
  0xb2   :  { %v395_v32 = vsel %vm290_vm0, %v394_v31, %v2484_v55  ;;  %v416_v31 = vstv %s2616_s28  ;;  %s2970_s28 = sld [smem:[#allocation9 + $0x13]] }
  0xb3   :  { %399 = vrot.lane.b32.xlu1 %v395_v32, %s4894_s12  ;;  %v422_v32 = vstv %s2618_s29  ;;  %s2892_s29 = sld [smem:[#allocation9 + $0x19]] }
  0xb4   :  { %v295_v33 = vpop.permute.xlu0 %294 }
  0xb5   :  { %v296_v34 = vsel %vm290_vm0, %v295_v33, %v2477_v51 }
  0xb6   :  { %299 = vrot.lane.b32.xlu0 %v296_v34, %s4894_s12 }
  0xb8   :  { %5100 = sst [smem:[#allocation45_spill]] %s2970_s28 }
  0xb9   :  { %v397_v38 = vpop.permute.xlu1 %396 }
  0xba   :  { %v398_v39 = vsel %vm290_vm0, %v397_v38, %v2502_v18  ;;  %v428_v38 = vstv %s2621_s5  ;;  %s2907_s5 = sld [smem:[#allocation9 + $0x25]] }
  0xbb   :  { %503 = vrot.lane.b32.xlu1 %v500_v37, %s4894_s12  ;;  %401 = vrot.lane.b32.xlu2 %v398_v39, %s4894_s12 }
  0xbc   :  { %v598_v41 = vpop.permute.xlu0 %597 }
  0xbd   :  { %v599_v42 = vsel %vm290_vm0, %v598_v41, %v2518_v29  ;;  %v434_v41 = vstv %s2623_s2  ;;  %s2715_s2 = sld [smem:[#allocation6 + $0x2d]] }
  0xbe   :  { %501 = vrot.lane.b32.xlu0 %v497_v40, %s4894_s12 }
  0xc1   :  { %v601_v43 = vpop.permute.xlu1 %600 }
  0xc2   :  { %v602_v44 = vsel %vm290_vm0, %v601_v43, %v2520_v4  ;;  %v2697_v43 = vmul.f32 %v344_v1, %v2477_v51 }
  0xc3   :  { %603 = vrot.lane.b32.xlu2 %v599_v42, %s4894_s12  ;;  %v2694_v42 = vmul.f32 %v338_v17, %v2477_v51  ;;  %5084 = sst [smem:[#allocation38_spill]] %s2715_s2 }
  0xc4   :  { %s2839_s2 = sld [smem:[#allocation6 + $0x23]] }
  0xc6   :  { %605 = vrot.lane.b32.xlu0 %v602_v44, %s4894_s12  ;;  %s2699_s12 = sld [smem:[#allocation6 + $0x15]]  ;;  %v472_v44 = vstv %s2633_s30 }
  0xc7   :  { %s3023_s30 = sld [smem:[#allocation9 + $0x2e]] }
  0xcc   :  { %5082 = sst [smem:[#allocation36_spill]] %s2699_s12 }
  0xcd   :  { %s2939_s12 = sld [smem:[#allocation9 + $0x1c]] }
  0xce   :  { %5106 = sst [smem:[#allocation51_spill]] %s3023_s30 }
  0xcf   :  { %s3126_s30 = sld [smem:[#allocation9 + $0xf]] }
  0xd3   :  { %5096 = sst [smem:[#allocation43_spill]] %s2939_s12 }
  0xd5   :  { %5121 = sst [smem:[#allocation52_spill]] %s3126_s30 }
 0x108   :  { %v298_v45 = vpop.permute.xlu2 %297 }
 0x109   :  { %v301_v46 = vsel %vm290_vm0, %v298_v45, %v2457_v36  ;;  %v2703_v45 = vmul.f32 %v350_v21, %v2477_v51 }
 0x10a   :  { %305 = vrot.lane.b32.xlu1 %v301_v46, %s4890_s14  ;;  %361 = vrot.lane.b32.xlu0 %v301_v46, %s4892_s15  ;;  %v2706_v46 = vmul.f32 %v356_v22, %v2477_v51 }
 0x115   :  { %v402_v47 = vpop.permute.xlu2 %401 }
 0x116   :  { %v404_v48 = vsel %vm290_vm0, %v402_v47, %v2502_v18  ;;  %v440_v47 = vstv %s2625_s7  ;;  %s2725_s7 = sld [smem:[#allocation6 + $0x6]] }
 0x117   :  { %409 = vrot.lane.b32.xlu0 %v404_v48, %s4890_s14 }
 0x11d   :  { %v604_v59 = vpop.permute.xlu2 %603 }
 0x11e   :  { %v607_v60 = vsel %vm290_vm0, %v604_v59, %v2518_v29  ;;  %v484_v59 = vstv %s2645_s13  ;;  %s3038_s13 = sld [smem:[#allocation10 + $0x1]] }
 0x125   :  { %v400_v52 = vpop.permute.xlu1 %399 }
 0x126   :  { %v403_v53 = vsel %vm290_vm0, %v400_v52, %v2484_v55  ;;  %v458_v52 = vstv %s2631_s10  ;;  %s2757_s10 = sld [smem:[#allocation6 + $0x2a]] }
 0x128   :  { %v300_v49 = vpop.permute.xlu0 %299 }
 0x129   :  { %v302_v50 = vsel %vm290_vm0, %v300_v49, %v2477_v51  ;;  %v446_v49 = vstv %s2627_s9  ;;  %s2734_s9 = sld [smem:[#allocation6 + $0x12]] }
 0x12a   :  { %363 = vrot.lane.b32.xlu1 %v302_v50, %s4892_s15  ;;  %307 = vrot.lane.b32.xlu2 %v302_v50, %s4890_s14  ;;  %v452_v50 = vstv %s2629_s0  ;;  %v2739_v5 = vmul.f32 %v446_v49, %v2484_v55  ;;  %s2747_s0 = sld [smem:[#allocation6 + $0x1e]] }
 0x12b   :  { %v2742_v6 = vmul.f32 %v452_v50, %v2484_v55 }
 0x12d   :  { %v504_v57 = vpop.permute.xlu1 %503 }
 0x12e   :  { %v506_v58 = vsel %vm290_vm0, %v504_v57, %v2516_v28 }
 0x130   :  { %v502_v54 = vpop.permute.xlu0 %501 }
 0x131   :  { %v505_v56 = vsel %vm290_vm0, %v502_v54, %v2504_v19 }
 0x132   :  { %463 = vrot.lane.b32.xlu1 %v403_v53, %s4892_s15  ;;  %407 = vrot.lane.b32.xlu2 %v403_v53, %s4890_s14 }
 0x133   :  { %509 = vrot.lane.b32.xlu0 %v505_v56, %s4890_s14 }
 0x138   :  { %v606_v61 = vpop.permute.xlu0 %605 }
 0x139   :  { %v608_v62 = vsel %vm290_vm0, %v606_v61, %v2520_v4  ;;  %v2732_v61 = vmul.f32 %v440_v47, %v2484_v55 }
 0x13a   :  { %511 = vrot.lane.b32.xlu1 %v506_v58, %s4890_s14  ;;  %465 = vrot.lane.b32.xlu2 %v404_v48, %s4892_s15  ;;  %v478_v48 = vstv %s2636_s4  ;;  %s3030_s4 = sld [smem:[#allocation10]] }
 0x13b   :  { %567 = vrot.lane.b32.xlu0 %v506_v58, %s4892_s15 }
 0x142   :  { %611 = vrot.lane.b32.xlu1 %v607_v60, %s4890_s14  ;;  %565 = vrot.lane.b32.xlu2 %v505_v56, %s4892_s15 }
 0x143   :  { %667 = vrot.lane.b32.xlu0 %v607_v60, %s4892_s15 }
 0x14a   :  { %669 = vrot.lane.b32.xlu1 %v608_v62, %s4892_s15  ;;  %613 = vrot.lane.b32.xlu2 %v608_v62, %s4890_s14  ;;  %s2651_s14 = sld [smem:[#allocation6 + $0x29]] }
 0x14b   :  { %s2657_s15 = sld [smem:[#allocation6 + $0x8]] }
 0x150   :  { %5078 = sst [smem:[#allocation34_spill]] %s2651_s14  ;;  %v490_v60 = vstv %s2651_s14 }
 0x151   :  { %5079 = sst [smem:[#allocation35_spill]] %s2657_s15 }
 0x152   :  { %s2760_s14 = sld [smem:[#allocation6 + $0x7]] }
 0x17c   :  { %v306_v13 = vpop.permute.xlu1 %305  ;;  %v362_v40 = vpop.permute.xlu0 %361 }
 0x17d   :  { %v311_v23 = vsel %vm2641_vm1, %v306_v13, 0.0  ;;  %v367_v57 = vsel %vm2663_vm2, %v362_v40, 0.0  ;;  %v2745_v13 = vmul.f32 %v458_v52, %v2484_v55 }
 0x17e   :  { %v315_v33 = vmul.f32 %v314_v15, %v311_v23  ;;  %v321_v34 = vmul.f32 %v320_v16, %v311_v23  ;;  %v327_v35 = vmul.f32 %v326_v3, %v311_v23  ;;  %v333_v39 = vmul.f32 %v332_v20, %v311_v23 }
 0x17f   :  { %v371_v17 = vmul.f32 %v370_v24, %v367_v57  ;;  %v377_v1 = vmul.f32 %v4902_v0, %v367_v57  ;;  %v383_v21 = vmul.f32 %v382_v26, %v367_v57  ;;  %v389_v22 = vmul.f32 %v388_v27, %v367_v57 }
 0x180   :  { %v317_v53 = vadd.f32 %v315_v33, %v283_v8  ;;  %v323_v54 = vadd.f32 %v321_v34, %v285_v9  ;;  %v329_v56 = vadd.f32 %v327_v35, %v287_v11  ;;  %v335_v58 = vadd.f32 %v333_v39, %v289_v12 }
 0x181   :  { %v580_v0 = vstv %s2667_s1  ;;  %s3145_s1 = sld [smem:[#allocation9 + $0x27]] }
 0x182   :  { %v341_v23 = vadd.f32 %v339_v10, %v317_v53  ;;  %v347_v33 = vadd.f32 %v345_v7, %v323_v54  ;;  %v353_v34 = vadd.f32 %v351_v30, %v329_v56  ;;  %v359_v39 = vadd.f32 %v357_v25, %v335_v58 }
 0x183   :  { %v586_v7 = vstv %s2673_s24  ;;  %v4921_v30 = vstv %s2679_s3  ;;  %v2784_v25 = vmul.f32 %v452_v50, %v2502_v18  ;;  %s3147_s24 = sld [smem:[#allocation9 + $0x5]] }
 0x184   :  { %v308_v37 = vpop.permute.xlu2 %307  ;;  %v379_v53 = vadd.f32 %v377_v1, %v347_v33  ;;  %v391_v54 = vadd.f32 %v389_v22, %v359_v39  ;;  %v524_v33 = vstv %s2734_s9  ;;  %s3083_s9 = sld [smem:[#allocation9 + $0x2]] }
 0x185   :  { %v312_v62 = vsel %vm2641_vm1, %v308_v37, 0.0  ;;  %v574_v37 = vstv %s2657_s15  ;;  %s2775_s15 = sld [smem:[#allocation6 + $0x1f]] }
 0x186   :  { %v316_v40 = vmul.f32 %v314_v15, %v312_v62  ;;  %v322_v63 = vmul.f32 %v320_v16, %v312_v62  ;;  %v328_v57 = vmul.f32 %v326_v3, %v312_v62  ;;  %v334_v10 = vmul.f32 %v332_v20, %v312_v62 }
 0x187   :  { %v2778_v15 = vmul.f32 %v440_v47, %v2502_v18  ;;  %v2781_v16 = vmul.f32 %v446_v49, %v2502_v18  ;;  %v2787_v3 = vmul.f32 %v458_v52, %v2502_v18  ;;  %v373_v20 = vadd.f32 %v371_v17, %v341_v23  ;;  %5128 = sst [smem:[#allocation54_spill]] %s3145_s1 }
 0x188   :  { %v385_v47 = vadd.f32 %v383_v21, %v353_v34  ;;  %v318_v50 = vadd.f32 %v316_v40, %v283_v8  ;;  %v324_v52 = vadd.f32 %v322_v63, %v285_v9  ;;  %v330_v58 = vadd.f32 %v328_v57, %v287_v11  ;;  %s3303_s1 = sld [smem:[#allocation9 + $0x2c]] }
 0x189   :  { %v336_v62 = vadd.f32 %v334_v10, %v289_v12  ;;  %v410_v17 = vpop.permute.xlu0 %409  ;;  %v518_v9 = vstv %s2725_s7  ;;  %v542_v63 = vstv %s2760_s14  ;;  %v548_v21 = vstv %s2767_s26  ;;  %s2864_s14 = sld [smem:[#allocation9 + $0x1]] }
 0x18a   :  { %v348_v39 = vadd.f32 %v2697_v43, %v324_v52  ;;  %v414_v40 = vsel %vm2641_vm1, %v410_v17, 0.0  ;;  %v354_v10 = vadd.f32 %v2703_v45, %v330_v58  ;;  %v560_v52 = vstv %s2789_s8  ;;  %s2878_s26 = sld [smem:[#allocation9 + $0xd]] }
 0x18b   :  { %v2843_v56 = vmul.f32 %v416_v31, %v414_v40  ;;  %v2847_v45 = vmul.f32 %v422_v32, %v414_v40  ;;  %s2923_s8 = sld [smem:[#allocation9 + $0x4]] }
 0x18c   :  { %v408_v35 = vpop.permute.xlu2 %407  ;;  %s3081_s7 = sld [smem:[#allocation9 + $0x24]] }
 0x18d   :  { %v413_v49 = vsel %vm2641_vm1, %v408_v35, 0.0  ;;  %v342_v35 = vadd.f32 %v2694_v42, %v318_v50  ;;  %v554_v50 = vstv %s2775_s15  ;;  %s3045_s15 = sld [smem:[#allocation10 + $0x2]] }
 0x18e   :  { %v417_v8 = vmul.f32 %v416_v31, %v413_v49  ;;  %v423_v22 = vmul.f32 %v422_v32, %v413_v49  ;;  %v429_v11 = vmul.f32 %v428_v38, %v413_v49  ;;  %v435_v12 = vmul.f32 %v434_v41, %v413_v49  ;;  %5129 = sst [smem:[#allocation55_spill]] %s3147_s24 }
 0x18f   :  { %v360_v49 = vadd.f32 %v2706_v46, %v336_v62  ;;  %5089 = sst [smem:[#allocation41_spill]] %s2864_s14  ;;  %v2867_v31 = vmul.f32 %v548_v21, %v2504_v19  ;;  %v2870_v32 = vmul.f32 %v554_v50, %v2504_v19  ;;  %v2887_v62 = vmul.f32 %v548_v21, %v2516_v28 }
 0x190   :  { %v419_v42 = vadd.f32 %v417_v8, %v373_v20  ;;  %v425_v43 = vadd.f32 %v423_v22, %v379_v53  ;;  %v431_v17 = vadd.f32 %v429_v11, %v385_v47  ;;  %v437_v1 = vadd.f32 %v435_v12, %v391_v54  ;;  %5091 = sst [smem:[#allocation34_spill]] %s2878_s26 }
 0x191   :  { %v2855_v20 = vmul.f32 %v428_v38, %v414_v40  ;;  %v2859_v53 = vmul.f32 %v434_v41, %v414_v40  ;;  %v2862_v47 = vmul.f32 %v542_v63, %v2504_v19  ;;  %v2873_v54 = vmul.f32 %v560_v52, %v2504_v19  ;;  %5093 = sst [smem:[#allocation32_spill]] %s2923_s8 }
 0x192   :  { %v2876_v38 = vmul.f32 %v542_v63, %v2516_v28  ;;  %v2881_v41 = vadd.f32 %v2732_v61, %v419_v42  ;;  %v2884_v58 = vadd.f32 %v2739_v5, %v425_v43  ;;  %v2890_v8 = vmul.f32 %v554_v50, %v2516_v28  ;;  %s2994_s26 = sld [smem:[#allocation9 + $0x2b]] }
 0x193   :  { %v2899_v5 = vadd.f32 %v2742_v6, %v431_v17  ;;  %v2902_v21 = vadd.f32 %v2745_v13, %v437_v1  ;;  %v2905_v63 = vmul.f32 %v560_v52, %v2516_v28  ;;  %v5094_v40 = vstv %s2602_s23  ;;  %s2953_s23 = sld [smem:[#allocation9 + $0x28]] }
 0x194   :  { %v466_v23 = vpop.permute.xlu2 %465  ;;  %v4912_v52 = vstv %s2798_s20  ;;  %v4913_v17 = vstv %s2806_s21  ;;  %s3001_s14 = sld [smem:[#allocation9 + $0xa]] }
 0x195   :  { %v470_v46 = vsel %vm2663_vm2, %v466_v23, 0.0  ;;  %s3017_s21 = sld [smem:[#allocation9 + $0x22]] }
 0x196   :  { %v2896_v22 = vmul.f32 %v472_v44, %v470_v46  ;;  %v2911_v11 = vmul.f32 %v478_v48, %v470_v46  ;;  %v2915_v12 = vmul.f32 %v484_v59, %v470_v46  ;;  %v2919_v6 = vmul.f32 %v490_v60, %v470_v46  ;;  %s3281_s24 = sld [smem:[#allocation9 + $0x20]] }
 0x197   :  { %v4916_v46 = vstv %s2814_s16  ;;  %s2979_s16 = sld [smem:[#allocation9 + $0x1f]] }
 0x198   :  { %5102 = sst [smem:[#allocation47_spill]] %s2994_s26 }
 0x199   :  { %5098 = sst [smem:[#allocation35_spill]] %s2953_s23 }
 0x19a   :  { %5103 = sst [smem:[#allocation48_spill]] %s3001_s14 }
 0x19b   :  { %5105 = sst [smem:[#allocation50_spill]] %s3017_s21 }
 0x19c   :  { %v364_v61 = vpop.permute.xlu1 %363  ;;  %v566_v1 = vpop.permute.xlu2 %565  ;;  %s5160_s22 = sld [smem:[#allocation48_spill]] }
 0x19d   :  { %v368_v13 = vsel %vm2663_vm2, %v364_v61, 0.0  ;;  %v4915_v61 = vstv %s2822_s17  ;;  %5101 = sst [smem:[#allocation46_spill]] %s2979_s16 }
 0x19e   :  { %v372_v23 = vmul.f32 %v370_v24, %v368_v13  ;;  %v378_v42 = vmul.f32 %v5094_v40, %v368_v13  ;;  %v384_v43 = vmul.f32 %v382_v26, %v368_v13  ;;  %v390_v50 = vmul.f32 %v388_v27, %v368_v13  ;;  %s3011_s17 = sld [smem:[#allocation9 + $0x16]] }
 0x19f   :  { %v571_v26 = vsel %vm2663_vm2, %v566_v1, 0.0  ;;  %v2946_v27 = vmul.f32 %v4912_v52, %v2518_v29  ;;  %v2951_v13 = vmul.f32 %v4913_v17, %v2518_v29  ;;  %v2958_v1 = vmul.f32 %v4916_v46, %v2518_v29  ;;  %s3072_s16 = sld [smem:[#allocation9 + $0x18]] }
 0x1a0   :  { %v374_v24 = vadd.f32 %v372_v23, %v342_v35  ;;  %v380_v40 = vadd.f32 %v378_v42, %v348_v39  ;;  %v386_v35 = vadd.f32 %v384_v43, %v354_v10  ;;  %v392_v23 = vadd.f32 %v390_v50, %v360_v49 }
 0x1a1   :  { %v2965_v52 = vmul.f32 %v4915_v61, %v2518_v29  ;;  %v2974_v39 = vmul.f32 %v574_v37, %v571_v26  ;;  %v2983_v43 = vmul.f32 %v580_v0, %v571_v26  ;;  %v2987_v50 = vmul.f32 %v586_v7, %v571_v26 }
 0x1a2   :  { %v2991_v61 = vmul.f32 %v4921_v30, %v571_v26  ;;  %v420_v46 = vadd.f32 %v2843_v56, %v374_v24  ;;  %v426_v42 = vadd.f32 %v2847_v45, %v380_v40  ;;  %v432_v10 = vadd.f32 %v2855_v20, %v386_v35 }
 0x1a3   :  { %v438_v34 = vadd.f32 %v2859_v53, %v392_v23  ;;  %v767_v45 = vstv %s2892_s29  ;;  %v773_v20 = vstv %s2907_s5  ;;  %v840_v53 = vstv %s2923_s8  ;;  %s5112_s8 = sld [smem:[#allocation38_spill]] }
 0x1a4   :  { %v464_v49 = vpop.permute.xlu1 %463  ;;  %5104 = sst [smem:[#allocation49_spill]] %s3011_s17  ;;  %v4982_v40 = vstv %s2933_s19  ;;  %v444_v35 = vadd.f32 %v2778_v15, %v420_v46  ;;  %v456_v23 = vadd.f32 %v2784_v25, %v432_v10  ;;  %v4973_v25 = vstv %s2953_s23 }
 0x1a5   :  { %v469_v57 = vsel %vm2663_vm2, %v464_v49, 0.0  ;;  %v510_v17 = vpop.permute.xlu0 %509  ;;  %v462_v49 = vadd.f32 %v2787_v3, %v438_v34  ;;  %v4976_v3 = vstv %s2960_s27  ;;  %v4977_v34 = vstv %s2970_s28  ;;  %s3058_s28 = sld [smem:[#allocation9]] }
 0x1a6   :  { %v473_v56 = vmul.f32 %v472_v44, %v469_v57  ;;  %v479_v24 = vmul.f32 %v478_v48, %v469_v57  ;;  %v485_v26 = vmul.f32 %v484_v59, %v469_v57  ;;  %v491_v30 = vmul.f32 %v490_v60, %v469_v57  ;;  %v614_v59 = vpop.permute.xlu2 %613  ;;  %s3062_s27 = sld [smem:[#allocation9 + $0xc]] }
 0x1a7   :  { %v4972_v60 = vstv %s2939_s12  ;;  %v450_v57 = vadd.f32 %v2781_v16, %v426_v42  ;;  %v515_v15 = vsel %vm2641_vm1, %v510_v17, 0.0  ;;  %v618_v16 = vsel %vm2641_vm1, %v614_v59, 0.0  ;;  %s3051_s12 = sld [smem:[#allocation10 + $0x3]] }
 0x1a8   :  { %v475_v44 = vadd.f32 %v473_v56, %v2881_v41  ;;  %v481_v48 = vadd.f32 %v479_v24, %v2884_v58  ;;  %v487_v41 = vadd.f32 %v485_v26, %v2899_v5  ;;  %v493_v58 = vadd.f32 %v491_v30, %v2902_v21  ;;  %s5109_s23 = sld [smem:[#allocation36_spill]] }
 0x1a9   :  { %v519_v46 = vmul.f32 %v518_v9, %v515_v15  ;;  %v525_v56 = vmul.f32 %v524_v33, %v515_v15  ;;  %v5107_v5 = vstv %s2747_s0  ;;  %v5108_v21 = vstv %s2757_s10  ;;  %s5110_s19 = sld [smem:[#allocation37_spill]] }
 0x1aa   :  { %v531_v30 = vmul.f32 %v5107_v5, %v515_v15  ;;  %v537_v42 = vmul.f32 %v5108_v21, %v515_v15  ;;  %v476_v26 = vadd.f32 %v2896_v22, %v444_v35  ;;  %v482_v59 = vadd.f32 %v2911_v11, %v450_v57  ;;  %5115 = sst [smem:[#allocation36_spill]] %s3083_s9 }
 0x1ab   :  { %v521_v17 = vadd.f32 %v519_v46, %v475_v44  ;;  %v527_v10 = vadd.f32 %v525_v56, %v481_v48  ;;  %v488_v5 = vadd.f32 %v2915_v12, %v456_v23  ;;  %v494_v21 = vadd.f32 %v2919_v6, %v462_v49  ;;  %s5161_s30 = sld [smem:[#allocation49_spill]] }
 0x1ac   :  { %v512_v24 = vpop.permute.xlu1 %511  ;;  %v533_v56 = vadd.f32 %v531_v30, %v487_v41  ;;  %v539_v15 = vadd.f32 %v537_v42, %v493_v58  ;;  %v5111_v35 = vstv %s2747_s0  ;;  %v5114_v41 = vstv %s2688_s25  ;;  %s3098_s0 = sld [smem:[#allocation9 + $0xe]] }
 0x1ad   :  { %v516_v44 = vsel %vm2641_vm1, %v512_v24, 0.0  ;;  %v568_v48 = vpop.permute.xlu0 %567  ;;  %v5113_v24 = vstv %s2757_s10  ;;  %v3076_v58 = vmul.f32 %v5114_v41, %v618_v16  ;;  %v545_v12 = vadd.f32 %v2862_v47, %v521_v17  ;;  %s3105_s10 = sld [smem:[#allocation9 + $0x1a]] }
 0x1ae   :  { %v520_v22 = vmul.f32 %v518_v9, %v516_v44  ;;  %v526_v11 = vmul.f32 %v524_v33, %v516_v44  ;;  %v532_v57 = vmul.f32 %v5111_v35, %v516_v44  ;;  %v538_v46 = vmul.f32 %v5113_v24, %v516_v44  ;;  %s5193_s29 = sld [smem:[#allocation43_spill]] }
 0x1af   :  { %v551_v6 = vadd.f32 %v2867_v31, %v527_v10  ;;  %v4978_v9 = vstv %s2994_s26  ;;  %v5116_v42 = vstv %s5109_s23  ;;  %v5117_v35 = vstv %s5110_s19  ;;  %s3111_s26 = sld [smem:[#allocation9 + $0x26]] }
 0x1b0   :  { %v522_v33 = vadd.f32 %v520_v22, %v476_v26  ;;  %v528_v23 = vadd.f32 %v526_v11, %v482_v59  ;;  %v534_v49 = vadd.f32 %v532_v57, %v488_v5  ;;  %v540_v30 = vadd.f32 %v538_v46, %v494_v21  ;;  %s5132_s19 = sld [smem:[#allocation40_spill]] }
 0x1b1   :  { %v3087_v44 = vmul.f32 %v5116_v42, %v618_v16  ;;  %v3091_v47 = vmul.f32 %v5117_v35, %v618_v16  ;;  %v5118_v17 = vstv %s5112_s8  ;;  %v557_v10 = vadd.f32 %v2870_v32, %v533_v56  ;;  %s3149_s23 = sld [smem:[#allocation9 + $0x11]] }
 0x1b2   :  { %v3095_v31 = vmul.f32 %v5118_v17, %v618_v16  ;;  %v563_v26 = vadd.f32 %v2873_v54, %v539_v15  ;;  %v572_v59 = vsel %vm2663_vm2, %v568_v48, 0.0  ;;  %v4981_v46 = vstv %s3001_s14  ;;  %s3159_s8 = sld [smem:[#allocation9 + $0x1d]] }
 0x1b3   :  { %v4979_v5 = vstv %s3011_s17  ;;  %5119 = sst [smem:[#allocation37_spill]] %s3105_s10  ;;  %v577_v22 = vadd.f32 %v2974_v39, %v545_v12  ;;  %v583_v16 = vadd.f32 %v2983_v43, %v551_v6  ;;  %v4980_v32 = vstv %s3017_s21 }
 0x1b4   :  { %v612_v21 = vpop.permute.xlu1 %611  ;;  %v546_v54 = vadd.f32 %v2876_v38, %v522_v33  ;;  %v552_v48 = vadd.f32 %v2887_v62, %v528_v23  ;;  %v558_v15 = vadd.f32 %v2890_v8, %v534_v49  ;;  %v564_v11 = vadd.f32 %v2905_v63, %v540_v30  ;;  %s3117_s17 = sld [smem:[#allocation9 + $0x3]] }
 0x1b5   :  { %v668_v39 = vpop.permute.xlu0 %667  ;;  %v576_v43 = vmul.f32 %v574_v37, %v572_v59  ;;  %v582_v57 = vmul.f32 %v580_v0, %v572_v59  ;;  %v589_v24 = vadd.f32 %v2987_v50, %v557_v10  ;;  %v617_v38 = vsel %vm2641_vm1, %v612_v21, 0.0  ;;  %s3165_s21 = sld [smem:[#allocation9 + $0x29]] }
 0x1b6   :  { %v588_v62 = vmul.f32 %v586_v7, %v572_v59  ;;  %v5122_v8 = vstv %s2679_s3  ;;  %v595_v63 = vadd.f32 %v2991_v61, %v563_v26  ;;  %v673_v12 = vsel %vm2663_vm2, %v668_v39, 0.0  ;;  %s5130_s3 = sld [smem:[#allocation33_spill]] }
 0x1b7   :  { %v594_v41 = vmul.f32 %v5122_v8, %v572_v59  ;;  %v5124_v37 = vstv %s2688_s25  ;;  %v5125_v50 = vmov %v5116_v42  ;;  %v5126_v33 = vmov %v5117_v35  ;;  %s5131_s25 = sld [smem:[#allocation39_spill]] }
 0x1b8   :  { %v621_v0 = vmul.f32 %v5124_v37, %v617_v38  ;;  %v627_v6 = vmul.f32 %v5125_v50, %v617_v38  ;;  %v633_v23 = vmul.f32 %v5126_v33, %v617_v38  ;;  %v5127_v49 = vmov %v5118_v17  ;;  %5133 = sst [smem:[#allocation33_spill]] %s3149_s23 }
 0x1b9   :  { %v639_v7 = vmul.f32 %v5127_v49, %v617_v38  ;;  %v578_v61 = vadd.f32 %v576_v43, %v546_v54  ;;  %v584_v30 = vadd.f32 %v582_v57, %v552_v48  ;;  %v590_v42 = vadd.f32 %v588_v62, %v558_v15  ;;  %5138 = sst [smem:[#allocation39_spill]] %s3159_s8 }
 0x1ba   :  { %5120 = sst [smem:[#allocation38_spill]] %s3117_s17  ;;  %v596_v35 = vadd.f32 %v594_v41, %v564_v11  ;;  %v623_v17 = vadd.f32 %v621_v0, %v577_v22  ;;  %v629_v10 = vadd.f32 %v627_v6, %v583_v16  ;;  %v635_v26 = vadd.f32 %v633_v23, %v589_v24 }
 0x1bb   :  { %v641_v59 = vadd.f32 %v639_v7, %v595_v63  ;;  %v5134_v21 = vstv %s2829_s6  ;;  %v5135_v38 = vstv %s2835_s18  ;;  %v5136_v54 = vstv %s2839_s2  ;;  %5139 = sst [smem:[#allocation40_spill]] %s3165_s21 }
 0x1bc   :  { %v677_v39 = vmul.f32 %v5134_v21, %v673_v12  ;;  %v683_v8 = vmul.f32 %v5135_v38, %v673_v12  ;;  %v689_v48 = vmul.f32 %v5136_v54, %v673_v12  ;;  %v5137_v15 = vstv %s2849_s11  ;;  %s3187_s14 = sld [smem:[#allocation9 + $0x6]] }
 0x1bd   :  { %v695_v11 = vmul.f32 %v5137_v15, %v673_v12  ;;  %v647_v22 = vadd.f32 %v2946_v27, %v623_v17  ;;  %v653_v16 = vadd.f32 %v2951_v13, %v629_v10  ;;  %v659_v43 = vadd.f32 %v2958_v1, %v635_v26  ;;  %s5150_s10 = sld [smem:[#allocation42_spill]] }
 0x1be   :  { %v665_v57 = vadd.f32 %v2965_v52, %v641_v59  ;;  %v5140_v24 = vstv %s2798_s20  ;;  %v5141_v41 = vstv %s5130_s3  ;;  %v5142_v27 = vstv %s5131_s25  ;;  %s3189_s20 = sld [smem:[#allocation9 + $0x12]] }
 0x1bf   :  { %v3170_v62 = vmul.f32 %v5140_v24, %v2520_v4  ;;  %v3175_v63 = vmul.f32 %v5141_v41, %v2520_v4  ;;  %v3180_v12 = vmul.f32 %v5142_v27, %v2520_v4  ;;  %v5143_v13 = vstv %s5132_s19  ;;  %s3197_s3 = sld [smem:[#allocation9 + $0x1e]] }
 0x1c0   :  { %v3185_v1 = vmul.f32 %v5143_v13, %v2520_v4  ;;  %v679_v52 = vadd.f32 %v677_v39, %v647_v22  ;;  %v685_v37 = vadd.f32 %v683_v8, %v653_v16  ;;  %v691_v0 = vadd.f32 %v689_v48, %v659_v43  ;;  %s5147_s25 = sld [smem:[#allocation41_spill]] }
 0x1c1   :  { %v697_v50 = vadd.f32 %v695_v11, %v665_v57  ;;  %v3192_v6 = vadd.f32 %v3076_v58, %v578_v61  ;;  %v716_v33 = vstv %s3030_s4  ;;  %v718_v23 = vstv %s3038_s13  ;;  %s5148_s19 = sld [smem:[#allocation34_spill]] }
 0x1c2   :  { %5144 = sst [smem:[#allocation56_spill]] %s3187_s14  ;;  %v720_v49 = vstv %s3045_s15  ;;  %v630_v7 = vadd.f32 %v3087_v44, %v584_v30  ;;  %v636_v17 = vadd.f32 %v3091_v47, %v590_v42  ;;  %v642_v10 = vadd.f32 %v3095_v31, %v596_v35 }
 0x1c3   :  { %v699_v58 = vmax.f32 %v679_v52, 0.0  ;;  %v703_v61 = vmax.f32 %v685_v37, 0.0  ;;  %v722_v26 = vstv %s3051_s12  ;;  %v731_v59 = vstv %s3058_s28  ;;  %s3231_s17 = sld [smem:[#allocation9 + $0x2a]]  ;;  %v670_v52 = vpop.permute.xlu1 %669 }
 0x1c4   :  { %5145 = sst [smem:[#allocation57_spill]] %s3189_s20  ;;  %v737_v21 = vstv %s3062_s27  ;;  %v707_v39 = vmax.f32 %v691_v0, 0.0  ;;  %v711_v38 = vmax.f32 %v697_v50, 0.0  ;;  %v743_v8 = vstv %s3072_s16 }
 0x1c5   :  { %5146 = sst [smem:[#allocation58_spill]] %s3197_s3  ;;  %v749_v44 = vstv %s3081_s7  ;;  %v3207_v47 = vmin.f32 %v699_v58, 6.0  ;;  %v3216_v11 = vmin.f32 %v703_v61, 6.0  ;;  %v5163_v48 = vlaneseq }
 0x1c6   :  { %v3221_v57 = vmin.f32 %v707_v39, 6.0  ;;  %v3223_v24 = vmin.f32 %v711_v38, 6.0  ;;  %v5153_v50 = vstv %s5147_s25  ;;  %s5156_s21 = sld [smem:[#allocation45_spill]]  ;;  %v674_v54 = vsel %vm2663_vm2, %v670_v52, 0.0 }
 0x1c7   :  { %v723_v13 = vrot.slane %v3207_v47, 7  ;;  %v3236_v58 = vmul.f32 %v5153_v50, %v3207_v47  ;;  %v5154_v61 = vstv %s5148_s19  ;;  %v3246_v38 = vmul.f32 %v767_v45, %v3207_v47  ;;  %s5157_s20 = sld [smem:[#allocation46_spill]] }
 0x1c8   :  { %v3241_v39 = vmul.f32 %v5154_v61, %v3207_v47  ;;  %v3251_v56 = vmul.f32 %v773_v20, %v3207_v47  ;;  %s5158_s3 = sld [smem:[#allocation47_spill]]  ;;  %v3260_v61 = vmul.f32 %v840_v53, %v3216_v11  ;;  %v3265_v37 = vmul.f32 %v4982_v40, %v3216_v11 }
 0x1c9   :  { %s3253_s14 = sld [smem:[#allocation9 + $0x8]]  ;;  %v3272_v27 = vmul.f32 %v4972_v60, %v3216_v11  ;;  %v3277_v41 = vmul.f32 %v4973_v25, %v3216_v11  ;;  %v3286_v22 = vmul.f32 %v4976_v3, %v3221_v57  ;;  %v3291_v60 = vmul.f32 %v4977_v34, %v3221_v57 }
 0x1ca   :  { %s3267_s8 = sld [smem:[#allocation9 + $0x14]]  ;;  %v3301_v16 = vmul.f32 %v4978_v9, %v3221_v57  ;;  %v3308_v34 = vshrl.u32 %v5163_v48, 7  ;;  %v654_v35 = vadd.f32 %v3175_v63, %v630_v7  ;;  %v5165_v9 = vstv %s2829_s6 }
 0x1cb   :  { %s5162_s23 = sld [smem:[#allocation50_spill]]  ;;  %v678_v42 = vmul.f32 %v5165_v9, %v674_v54  ;;  %v5166_v0 = vstv %s2835_s18  ;;  %v660_v3 = vadd.f32 %v3180_v12, %v636_v17  ;;  %v666_v43 = vadd.f32 %v3185_v1, %v642_v10 }
 0x1cc   :  { %5164 = vst [vmem:[#allocation59_spill] sm:$0xff] %v3308_v34  ;;  %v684_v31 = vmul.f32 %v5166_v0, %v674_v54  ;;  %v5167_v48 = vstv %s2839_s2  ;;  %v5168_v50 = vstv %s2849_s11  ;;  %v3333_v9 = vmul.f32 %v4979_v5, %v3223_v24  ;;  %s5172_s11 = sld [smem:[#allocation36_spill]] }
 0x1cd   :  { %v5159_v25 = vstv %s5157_s20  ;;  %v690_v30 = vmul.f32 %v5167_v48, %v674_v54  ;;  %v696_v52 = vmul.f32 %v5168_v50, %v674_v54  ;;  %v3338_v1 = vmul.f32 %v4980_v32, %v3223_v24  ;;  %s5174_s2 = sld [smem:[#allocation37_spill]] }
 0x1ce   :  { %v3296_v15 = vmul.f32 %v5159_v25, %v3221_v57  ;;  %v648_v25 = vadd.f32 %v3170_v62, %v3192_v6  ;;  %v3328_v62 = vmul.f32 %v4981_v46, %v3223_v24  ;;  %v686_v12 = vadd.f32 %v684_v31, %v654_v35  ;;  %s5180_s12 = sld [smem:[#allocation38_spill]] }
 0x1cf   :  { %v3341_v6 = vadd.s32 8, %v3308_v34  ;;  %v692_v7 = vadd.f32 %v690_v30, %v660_v3  ;;  %v698_v17 = vadd.f32 %v696_v52, %v666_v43  ;;  %vm165_vm4 = vcmp.ne.s32.totalorder %v3308_v34, 0  ;;  %s5182_s16 = sld [smem:[#allocation52_spill]] }
 0x1d0   :  { %v680_v63 = vadd.f32 %v678_v42, %v648_v25  ;;  %v704_v50 = vmax.f32 %v686_v12, 0.0  ;;  %vm725_vm5 = vcmp.lt.s32.totalorder %v3308_v34, 1  ;;  %vm780_vm6 = vcmp.lt.s32.totalorder %v3308_v34, 7  ;;  %s5186_s6 = sld [smem:[#allocation53_spill]] }
 0x1d1   :  { %5169 = vst [vmem:[#allocation60_spill] sm:$0xff] %v3341_v6  ;;  %v708_v31 = vmax.f32 %v692_v7, 0.0  ;;  %v712_v42 = vmax.f32 %v698_v17, 0.0  ;;  %vm164_vm3 = vcmp.ne.s32.totalorder %v3341_v6, 15  ;;  %v5170_v52 = vstv %s5147_s25  ;;  %s5187_s18 = sld [smem:[#allocation54_spill]] }
 0x1d2   :  { %v700_v0 = vmax.f32 %v680_v63, 0.0  ;;  %v3349_v46 = vmin.f32 %v704_v50, 6.0  ;;  %v5171_v12 = vstv %s5148_s19  ;;  %s5203_s5 = sld [smem:[#allocation44_spill]] }
 0x1d3   :  { %v3355_v3 = vmin.f32 %v708_v31, 6.0  ;;  %v3357_v30 = vmin.f32 %v712_v42, 6.0  ;;  %s5204_s27 = sld [smem:[#allocation55_spill]] }
 0x1d4   :  { %v702_v32 = vmin.f32 %v700_v0, 6.0  ;;  %s5205_s28 = sld [smem:[#allocation33_spill]] }
 0x1d5   :  { %s5206_s4 = sld [smem:[#allocation39_spill]] }
 0x1d6   :  { %v724_v43 = vrot.slane %v702_v32, 7  ;;  %v757_v63 = vmul.f32 %v5170_v52, %v702_v32  ;;  %v763_v7 = vmul.f32 %v5171_v12, %v702_v32  ;;  %v769_v17 = vmul.f32 %v767_v45, %v702_v32  ;;  %s5207_s13 = sld [smem:[#allocation40_spill]] }
 0x1d7   :  { %v775_v0 = vmul.f32 %v773_v20, %v702_v32  ;;  %v779_v50 = vrot.slane %v702_v32, 1  ;;  %v810_v45 = vrot.slane %v3349_v46, 7  ;;  %v3379_v20 = vmul.f32 %v840_v53, %v3349_v46  ;;  %s5215_s15 = sld [smem:[#allocation56_spill]] }
 0x1d8   :  { %v726_v31 = vsel %vm725_vm5, %v723_v13, %v724_v43  ;;  %v727_v42 = vsel %vm725_vm5, %v724_v43, %v723_v13  ;;  %s5217_s7 = sld [smem:[#allocation57_spill]] }
 0x1d9   :  { %v728_v32 = vsel %vm165_vm4, %v727_v42, 0.0  ;;  %v733_v52 = vmul.f32 %v731_v59, %v726_v31  ;;  %v739_v12 = vmul.f32 %v737_v21, %v726_v31  ;;  %v745_v10 = vmul.f32 %v743_v8, %v726_v31  ;;  %s3535_s9 = sld [smem:[#allocation9 + $0x9]] }
 0x1da   :  { %v732_v13 = vmul.f32 %v731_v59, %v728_v32  ;;  %v738_v43 = vmul.f32 %v737_v21, %v728_v32  ;;  %v744_v25 = vmul.f32 %v743_v8, %v728_v32  ;;  %v750_v53 = vmul.f32 %v749_v44, %v728_v32  ;;  %s3559_s25 = sld [smem:[#allocation9 + $0x17]] }
 0x1db   :  { %v735_v35 = vadd.f32 %v733_v52, %v716_v33  ;;  %v741_v42 = vadd.f32 %v739_v12, %v718_v23  ;;  %v747_v5 = vadd.f32 %v745_v10, %v720_v49  ;;  %v751_v48 = vmul.f32 %v749_v44, %v726_v31  ;;  %s3780_s19 = sld [smem:[#allocation12 + $0x19]] }
 0x1dc   :  { %v734_v54 = vadd.f32 %v732_v13, %v716_v33  ;;  %v740_v40 = vadd.f32 %v738_v43, %v718_v23  ;;  %v746_v59 = vadd.f32 %v744_v25, %v720_v49  ;;  %v752_v21 = vadd.f32 %v750_v53, %v722_v26 }
 0x1dd   :  { %v753_v8 = vadd.f32 %v751_v48, %v722_v26  ;;  %v759_v32 = vadd.f32 %v757_v63, %v735_v35  ;;  %v765_v52 = vadd.f32 %v763_v7, %v741_v42  ;;  %v5173_v10 = vstv %s5150_s10  ;;  %s3551_s10 = sld [smem:[#allocation9 + $0x15]] }
 0x1de   :  { %v848_v44 = vmul.f32 %v5173_v10, %v3349_v46  ;;  %v758_v33 = vadd.f32 %v3236_v58, %v734_v54  ;;  %v764_v23 = vadd.f32 %v3241_v39, %v740_v40  ;;  %v770_v49 = vadd.f32 %v3246_v38, %v746_v59 }
 0x1df   :  { %v771_v25 = vadd.f32 %v769_v17, %v747_v5  ;;  %v776_v26 = vadd.f32 %v3251_v56, %v752_v21  ;;  %v777_v48 = vadd.f32 %v775_v0, %v753_v8  ;;  %v5175_v35 = vrot.slane %v3207_v47, 1 }
 0x1e0   :  { %v5177_v39 = vstv %s5172_s11  ;;  %v5178_v5 = vstv %s3098_s0  ;;  %v5179_v56 = vrot.slane %v3216_v11, 7  ;;  %v5184_v13 = vstv %s5174_s2  ;;  %s3545_s0 = sld [smem:[#allocation9 + $0xb]] }
 0x1e1   :  { %v781_v63 = vsel %vm780_vm6, %v5175_v35, %v779_v50  ;;  %v5176_v7 = vmov %v5175_v35  ;;  %v5181_v0 = vmov %v5177_v39  ;;  %v5183_v47 = vmov %v5178_v5  ;;  %s3782_s11 = sld [smem:[#allocation12 + $0x25]] }
 0x1e2   :  { %v782_v58 = vsel %vm780_vm6, %v779_v50, %v5176_v7  ;;  %v787_v38 = vmul.f32 %v5177_v39, %v781_v63  ;;  %v793_v54 = vmul.f32 %v5178_v5, %v781_v63  ;;  %v811_v17 = vsel %vm725_vm5, %v5179_v56, %v810_v45  ;;  %s3784_s2 = sld [smem:[#allocation12 + $0x4]] }
 0x1e3   :  { %v784_v40 = vsel %vm164_vm3, %v782_v58, 0.0  ;;  %v799_v50 = vmul.f32 %v5184_v13, %v781_v63  ;;  %v5185_v43 = vmov %v5184_v13  ;;  %v5188_v21 = vstv %s3111_s26  ;;  %s5194_s26 = sld [smem:[#allocation35_spill]] }
 0x1e4   :  { %v788_v31 = vmul.f32 %v5181_v0, %v784_v40  ;;  %v794_v12 = vmul.f32 %v5183_v47, %v784_v40  ;;  %v800_v53 = vmul.f32 %v5185_v43, %v784_v40  ;;  %v789_v42 = vadd.f32 %v787_v38, %v758_v33 }
 0x1e5   :  { %v795_v59 = vadd.f32 %v793_v54, %v764_v23  ;;  %v805_v8 = vmul.f32 %v5188_v21, %v781_v63  ;;  %v5189_v10 = vmov %v5188_v21  ;;  %v801_v39 = vadd.f32 %v799_v50, %v770_v49 }
 0x1e6   :  { %v806_v35 = vmul.f32 %v5189_v10, %v784_v40  ;;  %v790_v7 = vadd.f32 %v788_v31, %v759_v32  ;;  %v796_v58 = vadd.f32 %v794_v12, %v765_v52  ;;  %v802_v5 = vadd.f32 %v800_v53, %v771_v25 }
 0x1e7   :  { %v5190_v0 = vrot.slane %v3216_v11, 7  ;;  %v5191_v33 = vstv %s5180_s12  ;;  %v5192_v23 = vstv %s5182_s16  ;;  %v807_v54 = vadd.f32 %v805_v8, %v776_v26  ;;  %s3786_s12 = sld [smem:[#allocation12 + $0x10]] }
 0x1e8   :  { %v808_v56 = vadd.f32 %v806_v35, %v777_v48  ;;  %v818_v38 = vmul.f32 %v5191_v33, %v811_v17  ;;  %v824_v63 = vmul.f32 %v5192_v23, %v811_v17  ;;  %v5195_v52 = vstv %s5186_s6  ;;  %s3788_s16 = sld [smem:[#allocation12 + $0x1c]] }
 0x1e9   :  { %v812_v47 = vsel %vm725_vm5, %v810_v45, %v5190_v0  ;;  %v830_v49 = vmul.f32 %v5195_v52, %v811_v17  ;;  %v5196_v40 = vstv %s5187_s18  ;;  %v5197_v48 = vmov %v5191_v33  ;;  %s3790_s6 = sld [smem:[#allocation12 + $0x28]] }
 0x1ea   :  { %v813_v32 = vsel %vm165_vm4, %v812_v47, 0.0  ;;  %v836_v25 = vmul.f32 %v5196_v40, %v811_v17  ;;  %v820_v12 = vadd.f32 %v818_v38, %v790_v7  ;;  %v5198_v13 = vmov %v5192_v23  ;;  %s3792_s18 = sld [smem:[#allocation12 + $0x7]] }
 0x1eb   :  { %v817_v31 = vmul.f32 %v5197_v48, %v813_v32  ;;  %v823_v50 = vmul.f32 %v5198_v13, %v813_v32  ;;  %v826_v45 = vadd.f32 %v824_v63, %v796_v58  ;;  %v5199_v43 = vmov %v5195_v52 }
 0x1ec   :  { %v829_v53 = vmul.f32 %v5199_v43, %v813_v32  ;;  %v832_v21 = vadd.f32 %v830_v49, %v802_v5  ;;  %v5200_v10 = vmov %v5196_v40  ;;  %v838_v0 = vadd.f32 %v836_v25, %v808_v56 }
 0x1ed   :  { %v835_v35 = vmul.f32 %v5200_v10, %v813_v32  ;;  %v819_v26 = vadd.f32 %v817_v31, %v789_v42  ;;  %v825_v8 = vadd.f32 %v823_v50, %v795_v59  ;;  %v5201_v47 = vstv %s5193_s29  ;;  %s3794_s29 = sld [smem:[#allocation12 + $0x13]] }
 0x1ee   :  { %v854_v33 = vmul.f32 %v5201_v47, %v3349_v46  ;;  %v5202_v23 = vstv %s5194_s26  ;;  %v831_v7 = vadd.f32 %v829_v53, %v801_v39  ;;  %v844_v58 = vadd.f32 %v3379_v20, %v820_v12  ;;  %s3796_s26 = sld [smem:[#allocation12 + $0x1f]] }
 0x1ef   :  { %v860_v17 = vmul.f32 %v5202_v23, %v3349_v46  ;;  %v837_v38 = vadd.f32 %v835_v35, %v807_v54  ;;  %v850_v63 = vadd.f32 %v848_v44, %v826_v45  ;;  %v864_v42 = vrot.slane %v3349_v46, 1 }
 0x1f0   :  { %v856_v5 = vadd.f32 %v854_v33, %v832_v21  ;;  %v894_v59 = vrot.slane %v3355_v3, 7  ;;  %v843_v56 = vadd.f32 %v3260_v61, %v819_v26  ;;  %v849_v52 = vadd.f32 %v3265_v37, %v825_v8 }
 0x1f1   :  { %v862_v32 = vadd.f32 %v860_v17, %v838_v0  ;;  %v855_v39 = vadd.f32 %v3272_v27, %v831_v7  ;;  %v861_v20 = vadd.f32 %v3277_v41, %v837_v38  ;;  %v5208_v44 = vrot.slane %v3216_v11, 1 }
 0x1f2   :  { %v5210_v61 = vstv %s5203_s5  ;;  %v5211_v40 = vstv %s5156_s21  ;;  %v5212_v25 = vstv %s5204_s27  ;;  %v5213_v31 = vrot.slane %v3221_v57, 7  ;;  %s5222_s21 = sld [smem:[#allocation58_spill]] }
 0x1f3   :  { %v865_v46 = vsel %vm780_vm6, %v5208_v44, %v864_v42  ;;  %v5209_v54 = vmov %v5208_v44  ;;  %v926_v37 = vmul.f32 %v5210_v61, %v3355_v3  ;;  %v932_v27 = vmul.f32 %v5211_v40, %v3355_v3  ;;  %s3798_s5 = sld [smem:[#allocation12 + $0x2b]] }
 0x1f4   :  { %v866_v49 = vsel %vm780_vm6, %v864_v42, %v5209_v54  ;;  %v871_v48 = vmul.f32 %v5212_v25, %v865_v46  ;;  %v895_v12 = vsel %vm725_vm5, %v5213_v31, %v894_v59  ;;  %v5214_v11 = vmov %v5213_v31  ;;  %s3800_s27 = sld [smem:[#allocation12 + $0xa]] }
 0x1f5   :  { %v868_v41 = vsel %vm164_vm3, %v866_v49, 0.0  ;;  %v896_v13 = vsel %vm725_vm5, %v894_v59, %v5214_v11  ;;  %v5216_v50 = vmov %v5212_v25  ;;  %v5218_v43 = vstv %s5205_s28  ;;  %s3802_s28 = sld [smem:[#allocation12 + $0x16]] }
 0x1f6   :  { %v872_v45 = vmul.f32 %v5216_v50, %v868_v41  ;;  %v877_v53 = vmul.f32 %v5218_v43, %v865_v46  ;;  %v5219_v21 = vmov %v5218_v43  ;;  %v5220_v35 = vstv %s5206_s4  ;;  %s3804_s4 = sld [smem:[#allocation12 + $0x22]] }
 0x1f7   :  { %v878_v10 = vmul.f32 %v5219_v21, %v868_v41  ;;  %v884_v0 = vmul.f32 %v5220_v35, %v868_v41  ;;  %v3521_v26 = vadd.f32 %v871_v48, %v843_v56  ;;  %v5221_v8 = vmov %v5220_v35 }
 0x1f8   :  { %v883_v47 = vmul.f32 %v5221_v8, %v865_v46  ;;  %v5223_v33 = vstv %s5207_s13  ;;  %v874_v38 = vadd.f32 %v872_v45, %v844_v58  ;;  %v879_v42 = vadd.f32 %v877_v53, %v849_v52  ;;  %s3806_s13 = sld [smem:[#allocation12 + $0x2e]] }
 0x1f9   :  { %v889_v23 = vmul.f32 %v5223_v33, %v865_v46  ;;  %v5224_v17 = vmov %v5223_v33  ;;  %v880_v59 = vadd.f32 %v878_v10, %v850_v63  ;;  %v886_v44 = vadd.f32 %v884_v0, %v856_v5 }
 0x1fa   :  { %v890_v7 = vmul.f32 %v5224_v17, %v868_v41  ;;  %v897_v49 = vsel %vm165_vm4, %v896_v13, 0.0  ;;  %v5225_v56 = vstv %s5215_s15  ;;  %v5226_v40 = vstv %s5217_s7  ;;  %s3808_s15 = sld [smem:[#allocation12 + $0x3]] }
 0x1fb   :  { %v902_v61 = vmul.f32 %v5225_v56, %v895_v12  ;;  %v908_v25 = vmul.f32 %v5226_v40, %v895_v12  ;;  %v3537_v46 = vadd.f32 %v883_v47, %v855_v39  ;;  %v3539_v58 = vadd.f32 %v889_v23, %v861_v20  ;;  %s3810_s7 = sld [smem:[#allocation12 + $0xf]] }
 0x1fc   :  { %v892_v54 = vadd.f32 %v890_v7, %v862_v32  ;;  %v5227_v52 = vmov %v5225_v56  ;;  %v5228_v5 = vstv %s5222_s21  ;;  %v5229_v48 = vmov %v5226_v40  ;;  %s3812_s21 = sld [smem:[#allocation12 + $0x1b]] }
 0x1fd   :  { %v901_v63 = vmul.f32 %v5227_v52, %v897_v49  ;;  %v914_v32 = vmul.f32 %v5228_v5, %v895_v12  ;;  %v904_v41 = vadd.f32 %v902_v61, %v874_v38  ;;  %v907_v31 = vmul.f32 %v5229_v48, %v897_v49 }
 0x1fe   :  { %v910_v11 = vadd.f32 %v908_v25, %v880_v59  ;;  %v5230_v13 = vstv %s3231_s17  ;;  %v5231_v45 = vmov %v5228_v5  ;;  %v5232_v43 = vstv %s5157_s20  ;;  %s5237_s17 = sld [smem:[#allocation51_spill]] }
 0x1ff   :  { %v920_v50 = vmul.f32 %v5230_v13, %v895_v12  ;;  %v913_v39 = vmul.f32 %v5231_v45, %v897_v49  ;;  %v916_v20 = vadd.f32 %v914_v32, %v886_v44  ;;  %v938_v53 = vmul.f32 %v5232_v43, %v3355_v3  ;;  %s3621_s20 = sld [smem:[#allocation9 + $0x23]] }
 0x200   :  { %v948_v21 = vrot.slane %v3355_v3, 1  ;;  %v5233_v10 = vmov %v5230_v13  ;;  %v5234_v0 = vstv %s5158_s3  ;;  %v978_v47 = vrot.slane %v3357_v30, 7  ;;  %s3778_s3 = sld [smem:[#allocation12 + $0xd]] }
 0x201   :  { %v3563_v35 = vmul.f32 %v5233_v10, %v897_v49  ;;  %v922_v12 = vadd.f32 %v920_v50, %v892_v54  ;;  %v944_v8 = vmul.f32 %v5234_v0, %v3355_v3  ;;  %v928_v33 = vadd.f32 %v926_v37, %v904_v41 }
 0x202   :  { %v934_v23 = vadd.f32 %v932_v27, %v910_v11  ;;  %v940_v17 = vadd.f32 %v938_v53, %v916_v20  ;;  %v5235_v7 = vrot.slane %v3221_v57, 1  ;;  %v5238_v37 = vrot.slane %v3223_v24, 7 }
 0x203   :  { %v5239_v54 = vstv %s5160_s22  ;;  %v946_v56 = vadd.f32 %v944_v8, %v922_v12  ;;  %v5240_v61 = vstv %s3253_s14  ;;  %v5241_v40 = vstv %s3267_s8  ;;  %s3611_s22 = sld [smem:[#allocation9 + $0x21]] }
 0x204   :  { %v950_v38 = vsel %vm780_vm6, %v948_v21, %v5235_v7  ;;  %v5236_v59 = vmov %v5235_v7  ;;  %v980_v27 = vsel %vm725_vm5, %v978_v47, %v5238_v37  ;;  %v1010_v49 = vmul.f32 %v5239_v54, %v3357_v30  ;;  %s3776_s8 = sld [smem:[#allocation12 + $0x1]] }
 0x205   :  { %v3577_v44 = vsel %vm780_vm6, %v5236_v59, %v948_v21  ;;  %v952_v3 = vsel %vm164_vm3, %v950_v38, 0.0  ;;  %v5242_v52 = vmov %v5238_v37  ;;  %v5243_v32 = vstv %s3281_s24 }
 0x206   :  { %v956_v57 = vmul.f32 %v5240_v61, %v952_v3  ;;  %v962_v25 = vmul.f32 %v5241_v40, %v952_v3  ;;  %v3596_v5 = vsel %vm725_vm5, %v5242_v52, %v978_v47  ;;  %v968_v41 = vmul.f32 %v5243_v32, %v952_v3 }
 0x207   :  { %v5244_v48 = vstv %s3303_s1  ;;  %v3604_v13 = vsel %vm165_vm4, %v980_v27, 0.0  ;;  %v5245_v50 = vstv %s5161_s30  ;;  %v5246_v53 = vstv %s5162_s23  ;;  %s3643_s30 = sld [smem:[#allocation9 + $0x2d]] }
 0x208   :  { %v974_v11 = vmul.f32 %v5244_v48, %v952_v3  ;;  %v3609_v45 = vmul.f32 %v5245_v50, %v3357_v30  ;;  %v958_v20 = vadd.f32 %v956_v57, %v928_v33  ;;  %v964_v43 = vadd.f32 %v962_v25, %v934_v23  ;;  %s3655_s23 = sld [smem:[#allocation9 + $0x2f]] }
 0x209   :  { %v1022_v21 = vmul.f32 %v5246_v53, %v3357_v30  ;;  %v5247_v10 = vstv %s5237_s17  ;;  %v970_v0 = vadd.f32 %v968_v41, %v940_v17  ;;  %v1032_v8 = vrot.slane %v3357_v30, 1 }
 0x20a   :  { %v3619_v12 = vmul.f32 %v5247_v10, %v3357_v30  ;;  %v984_v47 = vstv %s3535_s9  ;;  %v909_v7 = vadd.f32 %v907_v31, %v879_v42  ;;  %v1038_v59 = vstv %s3545_s0  ;;  %s3814_s9 = sld [smem:[#allocation12 + $0x27]] }
 0x20b   :  { %v986_v38 = vmul.f32 %v984_v47, %v3596_v5  ;;  %v990_v33 = vstv %s3551_s10  ;;  %v1044_v3 = vstv %s3559_s25  ;;  %v5248_v23 = vrot.slane %v3223_v24, 1  ;;  %s3816_s0 = sld [smem:[#allocation12 + $0x2]] }
 0x20c   :  { %v933_v30 = vadd.f32 %v3291_v60, %v909_v7  ;;  %v5250_v42 = vmov %v5241_v40  ;;  %v976_v54 = vadd.f32 %v974_v11, %v946_v56  ;;  %v903_v40 = vadd.f32 %v901_v63, %v3521_v26  ;;  %s3820_s10 = sld [smem:[#allocation12 + $0xe]] }
 0x20d   :  { %v3633_v37 = vsel %vm780_vm6, %v5248_v23, %v1032_v8  ;;  %v5249_v27 = vmov %v5248_v23  ;;  %v961_v31 = vmul.f32 %v5250_v42, %v3577_v44  ;;  %v988_v61 = vadd.f32 %v986_v38, %v958_v20  ;;  %s3822_s25 = sld [smem:[#allocation12 + $0x1a]] }
 0x20e   :  { %v1034_v17 = vsel %vm780_vm6, %v1032_v8, %v5249_v27  ;;  %v991_v32 = vmul.f32 %v990_v33, %v3604_v13  ;;  %v1045_v60 = vmul.f32 %v1044_v3, %v3633_v37  ;;  %v927_v48 = vadd.f32 %v3286_v22, %v903_v40 }
 0x20f   :  { %v1036_v57 = vsel %vm164_vm3, %v1034_v17, 0.0  ;;  %v963_v52 = vadd.f32 %v961_v31, %v933_v30  ;;  %v1012_v41 = vadd.f32 %v1010_v49, %v988_v61  ;;  %v5251_v50 = vstv %s3253_s14  ;;  %s5253_s14 = smov 32  }
 0x210   :  { %v1040_v25 = vmul.f32 %v1038_v59, %v1036_v57  ;;  %v955_v56 = vmul.f32 %v5251_v50, %v3577_v44  ;;  %v915_v11 = vadd.f32 %v913_v39, %v3537_v46  ;;  %v985_v26 = vmul.f32 %v984_v47, %v3604_v13 }
 0x211   :  { %v993_v20 = vadd.f32 %v991_v32, %v963_v52  ;;  %v5252_v63 = vstv %s3281_s24  ;;  %v996_v10 = vstv %s3611_s22  ;;  %v1050_v22 = vstv %s3621_s20  ;;  %s5257_s24 = smov 97   ;;  %s3826_s22 = sld [smem:[#allocation13]] }
 0x212   :  { %v967_v53 = vmul.f32 %v5252_v63, %v3577_v44  ;;  %v1042_v8 = vadd.f32 %v1040_v25, %v1012_v41  ;;  %v957_v7 = vadd.f32 %v955_v56, %v927_v48  ;;  %v939_v49 = vadd.f32 %v3296_v15, %v915_v11  ;;  %s3828_s20 = sld [smem:[#allocation13 + $0x1]] }
 0x213   :  { %v1017_v38 = vadd.f32 %v3333_v9, %v993_v20  ;;  %v1039_v23 = vmul.f32 %v1038_v59, %v3633_v37  ;;  %v997_v46 = vmul.f32 %v996_v10, %v3604_v13  ;;  %v998_v39 = vmul.f32 %v996_v10, %v3596_v5  ;;  %5258 = sst [smem:[#allocation41_spill]] %s3822_s25 }
 0x214   :  { %v1062_v27 = vmax.f32 %v1042_v8, 0.0  ;;  %v987_v47 = vadd.f32 %v985_v26, %v957_v7  ;;  %v969_v17 = vadd.f32 %v967_v53, %v939_v49  ;;  %v992_v30 = vmul.f32 %v990_v33, %v3596_v5  ;;  %s3854_s25 = sld [smem:[#allocation12 + $0x6]] }
 0x215   :  { %v1047_v42 = vadd.f32 %v1045_v60, %v1017_v38  ;;  %v1051_v31 = vmul.f32 %v1050_v22, %v3633_v37  ;;  %v1000_v61 = vadd.f32 %v998_v39, %v970_v0  ;;  %v1002_v15 = vstv %s3643_s30  ;;  %s3830_s30 = sld [smem:[#allocation13 + $0x2]] }
 0x216   :  { %v3671_v40 = vmin.f32 %v1062_v27, 6.0  ;;  %v1011_v9 = vadd.f32 %v3328_v62, %v987_v47  ;;  %v999_v59 = vadd.f32 %v997_v46, %v969_v17  ;;  %v994_v25 = vadd.f32 %v992_v30, %v964_v43 }
 0x217   :  { %v1065_v52 = vmax.f32 %v1047_v42, 0.0  ;;  %v1024_v32 = vadd.f32 %v1022_v21, %v1000_v61  ;;  %v1052_v41 = vmul.f32 %v1050_v22, %v1036_v57  ;;  %v1004_v48 = vmul.f32 %v1002_v15, %v3596_v5  ;;  %5260 = sst [smem:[#allocation32_spill]] %s3826_s22 }
 0x218   :  { %1088 = vrot.lane.b32.xlu0 %v3671_v40, %s5253_s14  ;;  %v1041_v33 = vadd.f32 %v1039_v23, %v1011_v9  ;;  %v1023_v60 = vadd.f32 %v3338_v1, %v999_v59  ;;  %v1018_v0 = vadd.f32 %v3609_v45, %v994_v25  ;;  %v1056_v50 = vstv %s3655_s23  ;;  %5261 = sst [smem:[#allocation42_spill]] %s3828_s20 }
 0x219   :  { %v3680_v56 = vmin.f32 %v1065_v52, 6.0  ;;  %v1054_v62 = vadd.f32 %v1052_v41, %v1024_v32  ;;  %v1006_v11 = vadd.f32 %v1004_v48, %v976_v54  ;;  %v921_v43 = vadd.f32 %v3563_v35, %v3539_v58  ;;  %s3832_s23 = sld [smem:[#allocation12]] }
 0x21a   :  { %v1061_v21 = vmax.f32 %v1041_v33, 0.0  ;;  %v1053_v20 = vadd.f32 %v1051_v31, %v1023_v60  ;;  %v1046_v5 = vmul.f32 %v1044_v3, %v1036_v57  ;;  %v5254_v45 = vstv %s3303_s1  ;;  %s5256_s1 = smov 127  }
 0x21b   :  { %1187 = vrot.lane.b32.xlu1 %v3680_v56, %s5253_s14  ;;  %v1030_v26 = vadd.f32 %v3619_v12, %v1006_v11  ;;  %v945_v1 = vadd.f32 %v3301_v16, %v921_v43  ;;  %v973_v63 = vmul.f32 %v5254_v45, %v3577_v44  ;;  %v1058_v8 = vmul.f32 %v1056_v50, %v1036_v57  ;;  %5262 = sst [smem:[#allocation45_spill]] %s3830_s30 }
 0x21c   :  { %v3691_v53 = vmin.f32 %v1061_v21, 6.0  ;;  %v1069_v54 = vmax.f32 %v1053_v20, 0.0  ;;  %v1048_v10 = vadd.f32 %v1046_v5, %v1018_v0  ;;  %v1070_v58 = vmax.f32 %v1054_v62, 0.0 }
 0x21d   :  { %v975_v35 = vadd.f32 %v973_v63, %v945_v1  ;;  %v1003_v7 = vmul.f32 %v1002_v15, %v3604_v13  ;;  %v1060_v12 = vadd.f32 %v1058_v8, %v1030_v26  ;;  %v5255_v16 = vstv %s5237_s17  ;;  %s3824_s17 = sld [smem:[#allocation12 + $0x26]] }
 0x21e   :  { %1085 = vrot.lane.b32.xlu2 %v3691_v53, %s5253_s14  ;;  %v3696_v3 = vmin.f32 %v1069_v54, 6.0  ;;  %v1027_v49 = vmul.f32 %v5255_v16, %v3223_v24  ;;  %v1066_v44 = vmax.f32 %v1048_v10, 0.0  ;;  %v3703_v38 = vmin.f32 %v1070_v58, 6.0 }
 0x21f   :  { %v1005_v22 = vadd.f32 %v1003_v7, %v975_v35  ;;  %v1074_v23 = vmax.f32 %v1060_v12, 0.0  ;;  %v1057_v13 = vmul.f32 %v1056_v50, %v3633_v37  ;;  %v1132_v7 = vstv %s3776_s8  ;;  %s3865_s8 = sld [smem:[#allocation12 + $0x12]] }
 0x220   :  { %1289 = vrot.lane.b32.xlu0 %v3696_v3, %s5253_s14  ;;  %v3708_v46 = vmin.f32 %v1066_v44, 6.0  ;;  %v1138_v12 = vstv %s3778_s3  ;;  %v1144_v16 = vstv %s3780_s19  ;;  %v1234_v44 = vstv %s3784_s2  ;;  %s3872_s3 = sld [smem:[#allocation12 + $0x1e]] }
 0x221   :  { %v1029_v57 = vadd.f32 %v1027_v49, %v1005_v22  ;;  %v3712_v24 = vmin.f32 %v1074_v23, 6.0  ;;  %v1150_v22 = vstv %s3782_s11  ;;  %v1246_v23 = vstv %s3788_s16  ;;  %s3883_s19 = sld [smem:[#allocation12 + $0x2a]] }
 0x222   :  { %s3897_s11 = sld [smem:[#allocation12 + $0x5]]  ;;  %v5277_v18 = vstv %s3810_s7  ;;  %v5321_v6 = vstv %s3832_s23 }
 0x223   :  { %1292 = vrot.lane.b32.xlu1 %v3703_v38, %s5253_s14  ;;  %v1059_v39 = vadd.f32 %v1057_v13, %v1029_v57  ;;  %5259 = sst [smem:[#allocation34_spill]] %s3824_s17  ;;  %v1240_v57 = vstv %s3786_s12  ;;  %v3852_v13 = vmul.f32 %v1132_v7, %v3671_v40 }
 0x224   :  { %s3845_s17 = sld [smem:[#allocation13 + $0x3]] }
 0x225   :  { %v1073_v27 = vmax.f32 %v1059_v39, 0.0  ;;  %v1252_v39 = vstv %s3790_s6  ;;  %s3915_s2 = sld [smem:[#allocation12 + $0x11]] }
 0x226   :  { %1190 = vrot.lane.b32.xlu2 %v3708_v46, %s5253_s14  ;;  %s3922_s12 = sld [smem:[#allocation12 + $0x1d]]  ;;  %v5317_v36 = vstv %s3872_s3 }
 0x227   :  { %v3716_v47 = vmin.f32 %v1073_v27, 6.0  ;;  %v1336_v27 = vstv %s3792_s18  ;;  %s3930_s16 = sld [smem:[#allocation12 + $0x29]] }
 0x228   :  { %1394 = vrot.lane.b32.xlu0 %v3712_v24, %s5253_s14  ;;  %s3944_s6 = sld [smem:[#allocation12 + $0x8]] }
 0x229   :  { %s3956_s18 = sld [smem:[#allocation12 + $0x14]] }
 0x22a   :  { %5263 = sst [smem:[#allocation46_spill]] %s3845_s17 }
 0x22c   :  { %v5010_v29 = vstv %s3922_s12 }
 0x22d   :  { %v5013_v28 = vstv %s3930_s16 }
 0x22e   :  { %1391 = vrot.lane.b32.xlu2 %v3716_v47, %s5253_s14 }
 0x278   :  { %v1086_v37 = vpop.permute.xlu2 %1085 }
 0x279   :  { %v1087_v17 = vsel %vm290_vm0, %v1086_v37, %v3691_v53  ;;  %v1342_v37 = vstv %s3794_s29  ;;  %s3960_s29 = sld [smem:[#allocation12 + $0x20]] }
 0x27a   :  { %1091 = vrot.lane.b32.xlu1 %v1087_v17, %s5253_s14  ;;  %v3860_v17 = vmul.f32 %v1138_v12, %v3671_v40 }
 0x280   :  { %v1191_v30 = vpop.permute.xlu2 %1190 }
 0x281   :  { %v1192_v42 = vsel %vm290_vm0, %v1191_v30, %v3708_v46  ;;  %v3863_v30 = vmul.f32 %v1144_v16, %v3671_v40 }
 0x282   :  { %1195 = vrot.lane.b32.xlu1 %v1192_v42, %s5253_s14  ;;  %v1348_v42 = vstv %s3796_s26  ;;  %s3968_s26 = sld [smem:[#allocation12 + $0x2c]] }
 0x288   :  { %v1392_v31 = vpop.permute.xlu2 %1391 }
 0x289   :  { %v1393_v61 = vsel %vm290_vm0, %v1392_v31, %v3716_v47  ;;  %v1354_v31 = vstv %s3798_s5  ;;  %s3986_s5 = sld [smem:[#allocation12 + $0xb]] }
 0x28a   :  { %1397 = vrot.lane.b32.xlu1 %v1393_v61, %s5253_s14  ;;  %v1089_v15 = vpop.permute.xlu0 %1088 }
 0x28b   :  { %v1090_v9 = vsel %vm290_vm0, %v1089_v15, %v3671_v40  ;;  %v3870_v15 = vmul.f32 %v1150_v22, %v3671_v40 }
 0x28c   :  { %1093 = vrot.lane.b32.xlu2 %v1090_v9, %s5253_s14  ;;  %v3875_v9 = vmul.f32 %v1234_v44, %v3708_v46 }
 0x28d   :  { %v1188_v59 = vpop.permute.xlu1 %1187 }
 0x28e   :  { %v1189_v25 = vsel %vm290_vm0, %v1188_v59, %v3680_v56  ;;  %v3878_v59 = vmul.f32 %v1240_v57, %v3708_v46 }
 0x28f   :  { %1193 = vrot.lane.b32.xlu0 %v1189_v25, %s5253_s14  ;;  %v3881_v25 = vmul.f32 %v1246_v23, %v3708_v46  ;;  %5264 = sst [smem:[#allocation47_spill]] %s3986_s5 }
 0x292   :  { %v1290_v52 = vpop.permute.xlu0 %1289 }
 0x293   :  { %v1291_v32 = vsel %vm290_vm0, %v1290_v52, %v3696_v3  ;;  %v3886_v52 = vmul.f32 %v1252_v39, %v3708_v46 }
 0x294   :  { %1295 = vrot.lane.b32.xlu2 %v1291_v32, %s5253_s14  ;;  %v3892_v32 = vmul.f32 %v1342_v37, %v3703_v38 }
 0x295   :  { %v1293_v41 = vpop.permute.xlu1 %1292 }
 0x296   :  { %v1294_v48 = vsel %vm290_vm0, %v1293_v41, %v3703_v38  ;;  %v3895_v41 = vmul.f32 %v1132_v7, %v3691_v53 }
 0x297   :  { %1297 = vrot.lane.b32.xlu0 %v1294_v48, %s5253_s14  ;;  %v3900_v48 = vmul.f32 %v1348_v42, %v3703_v38 }
 0x29a   :  { %v1395_v33 = vpop.permute.xlu0 %1394 }
 0x29b   :  { %v1396_v60 = vsel %vm290_vm0, %v1395_v33, %v3712_v24  ;;  %v3903_v33 = vmul.f32 %v1354_v31, %v3703_v38 }
 0x29c   :  { %1399 = vrot.lane.b32.xlu2 %v1396_v60, %s5253_s14  ;;  %s3834_s14 = sld [smem:[#allocation12 + $0xc]]  ;;  %v3909_v60 = vmul.f32 %v1144_v16, %v3691_v53  ;;  %v4990_v16 = vstv %s3830_s30 }
 0x29d   :  { %s4027_s30 = sld [smem:[#allocation12 + $0x9]] }
 0x2a2   :  { %v5322_v34 = vstv %s3834_s14 }
 0x2e6   :  { %v1094_v0 = vpop.permute.xlu2 %1093 }
 0x2e7   :  { %v1096_v50 = vsel %vm290_vm0, %v1094_v0, %v3671_v40  ;;  %v3889_v40 = vmul.f32 %v1336_v27, %v3703_v38  ;;  %v4991_v0 = vstv %s3832_s23  ;;  %s4259_s23 = sld [smem:[#allocation15 + $0x28]] }
 0x2e8   :  { %1157 = vrot.lane.b32.xlu0 %v1096_v50, %s5256_s1  ;;  %1101 = vrot.lane.b32.xlu1 %v1096_v50, %s5257_s24  ;;  %v4987_v50 = vstv %s3834_s14  ;;  %s4265_s14 = sld [smem:[#allocation15 + $0x5]] }
 0x2ec   :  { %v1092_v62 = vpop.permute.xlu1 %1091 }
 0x2ed   :  { %v1095_v21 = vsel %vm290_vm0, %v1092_v62, %v3691_v53 }
 0x2ee   :  { %v1296_v5 = vpop.permute.xlu2 %1295 }
 0x2ef   :  { %v1299_v1 = vsel %vm290_vm0, %v1296_v5, %v3696_v3  ;;  %v3936_v5 = vmul.f32 %v1252_v39, %v3680_v56  ;;  %v3974_v39 = vmul.f32 %v1354_v31, %v3696_v3 }
 0x2f4   :  { %v1196_v11 = vpop.permute.xlu1 %1195 }
 0x2f5   :  { %v1198_v43 = vsel %vm290_vm0, %v1196_v11, %v3708_v46  ;;  %v3906_v46 = vmul.f32 %v1138_v12, %v3691_v53 }
 0x2f6   :  { %1259 = vrot.lane.b32.xlu1 %v1198_v43, %s5256_s1  ;;  %1203 = vrot.lane.b32.xlu2 %v1198_v43, %s5257_s24  ;;  %v1400_v54 = vpop.permute.xlu2 %1399 }
 0x2f7   :  { %v1402_v8 = vsel %vm290_vm0, %v1400_v54, %v3712_v24  ;;  %v1450_v54 = vstv %s3804_s4  ;;  %s5269_s4 = sld [smem:[#allocation34_spill]] }
 0x2fc   :  { %v1398_v10 = vpop.permute.xlu1 %1397 }
 0x2fd   :  { %v1401_v58 = vsel %vm290_vm0, %v1398_v10, %v3716_v47  ;;  %v1456_v10 = vstv %s3806_s13  ;;  %s4008_s13 = sld [smem:[#allocation12 + $0x23]] }
 0x2fe   :  { %1155 = vrot.lane.b32.xlu2 %v1095_v21, %s5256_s1 }
 0x301   :  { %v1194_v20 = vpop.permute.xlu0 %1193 }
 0x302   :  { %v1197_v26 = vsel %vm290_vm0, %v1194_v20, %v3680_v56  ;;  %v3928_v20 = vmul.f32 %v1240_v57, %v3680_v56  ;;  %v3966_v57 = vmul.f32 %v1342_v37, %v3696_v3 }
 0x303   :  { %1201 = vrot.lane.b32.xlu1 %v1197_v26, %s5257_s24  ;;  %5270 = sst [smem:[#allocation49_spill]] %s4008_s13 }
 0x306   :  { %1303 = vrot.lane.b32.xlu2 %v1299_v1, %s5257_s24 }
 0x309   :  { %v1298_v45 = vpop.permute.xlu0 %1297 }
 0x30a   :  { %v1300_v63 = vsel %vm290_vm0, %v1298_v45, %v3703_v38  ;;  %v3918_v38 = vmul.f32 %v1150_v22, %v3691_v53  ;;  %v3933_v53 = vmul.f32 %v1246_v23, %v3680_v56  ;;  %v4988_v22 = vstv %s3845_s17  ;;  %s4021_s17 = sld [smem:[#allocation12 + $0x2f]] }
 0x30b   :  { %1359 = vrot.lane.b32.xlu1 %v1299_v1, %s5256_s1  ;;  %1305 = vrot.lane.b32.xlu0 %v1300_v63, %s5257_s24  ;;  %v1444_v1 = vstv %s3802_s28  ;;  %v3971_v23 = vmul.f32 %v1348_v42, %v3696_v3  ;;  %v3989_v42 = vmul.f32 %v1450_v54, %v3716_v47  ;;  %s3998_s28 = sld [smem:[#allocation12 + $0x17]] }
 0x30e   :  { %1361 = vrot.lane.b32.xlu2 %v1300_v63, %s5256_s1 }
 0x310   :  { %5273 = sst [smem:[#allocation50_spill]] %s4021_s17 }
 0x311   :  { %5266 = sst [smem:[#allocation48_spill]] %s3998_s28  ;;  %v5304_v55 = vstv %s3998_s28 }
 0x312   :  { %s5316_s28 = sld [smem:[#allocation42_spill]] }
 0x313   :  { %1407 = vrot.lane.b32.xlu1 %v1402_v8, %s5257_s24  ;;  %1099 = vrot.lane.b32.xlu0 %v1095_v21, %s5257_s24  ;;  %v3925_v21 = vmul.f32 %v1234_v44, %v3680_v56  ;;  %v3963_v44 = vmul.f32 %v1336_v27, %v3696_v3  ;;  %v3992_v3 = vmul.f32 %v1456_v10, %v3716_v47 }
 0x316   :  { %1461 = vrot.lane.b32.xlu2 %v1401_v58, %s5256_s1 }
 0x31b   :  { %1257 = vrot.lane.b32.xlu0 %v1197_v26, %s5256_s1  ;;  %v1438_v26 = vstv %s3800_s27  ;;  %s5265_s27 = sld [smem:[#allocation41_spill]] }
 0x323   :  { %1405 = vrot.lane.b32.xlu0 %v1401_v58, %s5257_s24  ;;  %s3839_s24 = sld [smem:[#allocation12 + $0x24]]  ;;  %v4985_v58 = vstv %s3828_s20 }
 0x324   :  { %s4051_s20 = sld [smem:[#allocation16 + $0x1]] }
 0x329   :  { %v4983_v43 = vstv %s3839_s24 }
 0x32a   :  { %5275 = sst [smem:[#allocation37_spill]] %s4051_s20 }
 0x32b   :  { %1463 = vrot.lane.b32.xlu0 %v1402_v8, %s5256_s1  ;;  %s3836_s1 = sld [smem:[#allocation12 + $0x18]]  ;;  %v4986_v8 = vstv %s3826_s22 }
 0x32c   :  { %s4059_s22 = sld [smem:[#allocation16 + $0x2]] }
 0x32d   :  { %s4069_s20 = sld [smem:[#allocation16 + $0x3]] }
 0x331   :  { %v4984_v11 = vstv %s3836_s1 }
 0x332   :  { %5278 = sst [smem:[#allocation38_spill]] %s4059_s22 }
 0x333   :  { %5281 = sst [smem:[#allocation52_spill]] %s4069_s20 }
 0x334   :  { %s4075_s22 = sld [smem:[#allocation15]] }
 0x335   :  { %s4087_s20 = sld [smem:[#allocation15 + $0x18]] }
 0x33a   :  { %5282 = sst [smem:[#allocation53_spill]] %s4075_s22 }
 0x33b   :  { %5284 = sst [smem:[#allocation43_spill]] %s4087_s20 }
 0x33c   :  { %s4111_s20 = sld [smem:[#allocation15 + $0x1]] }
 0x342   :  { %5289 = sst [smem:[#allocation44_spill]] %s4111_s20 }
 0x343   :  { %s4129_s20 = sld [smem:[#allocation15 + $0x19]] }
 0x349   :  { %5292 = sst [smem:[#allocation33_spill]] %s4129_s20 }
 0x34a   :  { %s4151_s20 = sld [smem:[#allocation15 + $0x2]] }
 0x350   :  { %v3818_v35 = vpop.permute.xlu2 %1203  ;;  %5297 = sst [smem:[#allocation40_spill]] %s4151_s20 }
 0x351   :  { %s4167_s20 = sld [smem:[#allocation15 + $0x1a]] }
 0x357   :  { %5301 = sst [smem:[#allocation57_spill]] %s4167_s20 }
 0x358   :  { %v3843_v49 = vpop.permute.xlu2 %1155 }
 0x35a   :  { %v1102_v61 = vpop.permute.xlu1 %1101 }
 0x35b   :  { %v1106_v62 = vsel %vm2641_vm1, %v1102_v61, 0.0  ;;  %v3977_v61 = vmul.f32 %v1438_v26, %v3716_v47 }
 0x35c   :  { %v1110_v45 = vmul.f32 %v4991_v0, %v1106_v62  ;;  %v1116_v63 = vmul.f32 %v4987_v50, %v1106_v62  ;;  %v1122_v7 = vmul.f32 %v4984_v11, %v1106_v62  ;;  %v1128_v12 = vmul.f32 %v4983_v43, %v1106_v62  ;;  %v1158_v43 = vpop.permute.xlu0 %1157 }
 0x35d   :  { %v3980_v62 = vmul.f32 %v1444_v1, %v3716_v47  ;;  %v4011_v47 = vmul.f32 %v1450_v54, %v3712_v24  ;;  %v1176_v0 = vstv %s5265_s27  ;;  %s4043_s27 = sld [smem:[#allocation12 + $0x2d]] }
 0x35e   :  { %v1112_v27 = vadd.f32 %v1110_v45, %v4986_v8  ;;  %v1118_v37 = vadd.f32 %v1116_v63, %v4985_v58  ;;  %v1124_v31 = vadd.f32 %v1122_v7, %v4990_v16  ;;  %v1130_v11 = vadd.f32 %v1128_v12, %v4988_v22 }
 0x35f   :  { %v4001_v45 = vmul.f32 %v1438_v26, %v3712_v24  ;;  %v4004_v63 = vmul.f32 %v1444_v1, %v3712_v24  ;;  %5271 = vst [vmem:[#allocation63_spill] sm:$0xff] %v4011_v47  ;;  %v4014_v7 = vmul.f32 %v1456_v10, %v3712_v24  ;;  %v1164_v26 = vstv %s3816_s0  ;;  %s4033_s0 = sld [smem:[#allocation12 + $0x15]] }
 0x360   :  { %v3954_v56 = vpop.permute.xlu2 %1303  ;;  %v1162_v1 = vsel %vm2663_vm2, %v1158_v43, 0.0  ;;  %v1170_v16 = vstv %s3820_s10  ;;  %v1136_v8 = vadd.f32 %v3852_v13, %v1112_v27  ;;  %v1142_v54 = vadd.f32 %v3860_v17, %v1118_v37  ;;  %s4037_s10 = sld [smem:[#allocation12 + $0x21]] }
 0x361   :  { %5267 = vst [vmem:[#allocation61_spill] sm:$0xff] %v4001_v45  ;;  %v1182_v24 = vstv %s5269_s4  ;;  %v1148_v10 = vadd.f32 %v3863_v30, %v1124_v31  ;;  %v1154_v22 = vadd.f32 %v3870_v15, %v1130_v11  ;;  %v1166_v43 = vmul.f32 %v1164_v26, %v1162_v1  ;;  %s4047_s4 = sld [smem:[#allocation16]] }
 0x362   :  { %5268 = vst [vmem:[#allocation62_spill] sm:$0xff] %v4004_v63  ;;  %v1172_v58 = vmul.f32 %v1170_v16, %v1162_v1  ;;  %v1208_v17 = vsel %vm2641_vm1, %v3818_v35, 0.0  ;;  %v1178_v30 = vmul.f32 %v1176_v0, %v1162_v1  ;;  %v1184_v15 = vmul.f32 %v1182_v24, %v1162_v1 }
 0x363   :  { %5272 = vst [vmem:[#allocation64_spill] sm:$0xff] %v4014_v7  ;;  %v1168_v37 = vadd.f32 %v1166_v43, %v1136_v8  ;;  %v5008_v13 = vstv %s3897_s11  ;;  %v5276_v1 = vstv %s3808_s15  ;;  %v1218_v51 = vmul.f32 %v5277_v18, %v1208_v17 }
 0x364   :  { %v1174_v31 = vadd.f32 %v1172_v58, %v1142_v54  ;;  %v1180_v35 = vadd.f32 %v1178_v30, %v1148_v10  ;;  %v1186_v12 = vadd.f32 %v1184_v15, %v1154_v22  ;;  %v1212_v11 = vmul.f32 %v5276_v1, %v1208_v17 }
 0x365   :  { %v5279_v43 = vstv %s3812_s21  ;;  %v5280_v10 = vstv %s3814_s9  ;;  %v1161_v30 = vsel %vm2663_vm2, %v3843_v49, 0.0  ;;  %v1309_v58 = vsel %vm2641_vm1, %v3954_v56, 0.0 }
 0x366   :  { %v1224_v4 = vmul.f32 %v5279_v43, %v1208_v17  ;;  %v1230_v22 = vmul.f32 %v5280_v10, %v1208_v17  ;;  %v1214_v18 = vadd.f32 %v1212_v11, %v1168_v37  ;;  %v1220_v1 = vadd.f32 %v1218_v51, %v1174_v31 }
 0x367   :  { %5274 = sst [smem:[#allocation36_spill]] %s4047_s4  ;;  %v5016_v8 = vstv %s3968_s26  ;;  %v4081_v15 = vmul.f32 %v1164_v26, %v1161_v30  ;;  %v4089_v31 = vmul.f32 %v1170_v16, %v1161_v30  ;;  %v5288_v56 = vstv %s3872_s3 }
 0x368   :  { %v1260_v50 = vpop.permute.xlu1 %1259  ;;  %v1362_v27 = vpop.permute.xlu2 %1361  ;;  %v1226_v17 = vadd.f32 %v1224_v4, %v1180_v35  ;;  %v1232_v43 = vadd.f32 %v1230_v22, %v1186_v12  ;;  %s4079_s4 = sld [smem:[#allocation15 + $0xc]]  ;;  %v4091_v4 = vmul.f32 %v1176_v0, %v1161_v30  ;;  %v4093_v12 = vmul.f32 %v1182_v24, %v1161_v30 }
 0x369   :  { %v1264_v51 = vsel %vm2663_vm2, %v1260_v50, 0.0  ;;  %v5285_v35 = vstv %s3854_s25  ;;  %v5287_v50 = vstv %s3865_s8  ;;  %v4107_v11 = vmul.f32 %v5288_v56, %v1309_v58  ;;  %s4223_s3 = sld [smem:[#allocation15 + $0x27]] }
 0x36a   :  { %v4097_v26 = vmul.f32 %v5285_v35, %v1309_v58  ;;  %v4103_v22 = vmul.f32 %v5287_v50, %v1309_v58  ;;  %v1238_v0 = vadd.f32 %v3875_v9, %v1214_v18  ;;  %v1244_v16 = vadd.f32 %v3878_v59, %v1220_v1 }
 0x36b   :  { %v1250_v24 = vadd.f32 %v3881_v25, %v1226_v17  ;;  %v1256_v30 = vadd.f32 %v3886_v52, %v1232_v43  ;;  %v1268_v35 = vmul.f32 %v5008_v13, %v1264_v51  ;;  %v1366_v56 = vsel %vm2663_vm2, %v1362_v27, 0.0 }
 0x36c   :  { %v5291_v9 = vstv %s3915_s2  ;;  %v1280_v18 = vmul.f32 %v5010_v29, %v1264_v51  ;;  %v1286_v25 = vmul.f32 %v5013_v28, %v1264_v51  ;;  %v5293_v1 = vstv %s3883_s19 }
 0x36d   :  { %v1274_v59 = vmul.f32 %v5291_v9, %v1264_v51  ;;  %v4133_v27 = vmul.f32 %v5293_v1, %v1309_v58  ;;  %v5295_v9 = vstv %s3944_s6  ;;  %v5296_v29 = vstv %s3956_s18 }
 0x36e   :  { %5283 = sst [smem:[#allocation54_spill]] %s4079_s4  ;;  %v4142_v49 = vmul.f32 %v5295_v9, %v1366_v56  ;;  %v4146_v10 = vmul.f32 %v5296_v29, %v1366_v56  ;;  %v5298_v1 = vstv %s3960_s29  ;;  %v4159_v9 = vmul.f32 %v5016_v8, %v1366_v56 }
 0x36f   :  { %s4099_s4 = sld [smem:[#allocation15 + $0x24]]  ;;  %v4155_v13 = vmul.f32 %v5298_v1, %v1366_v56  ;;  %v5299_v43 = vstv %s3854_s25  ;;  %v1270_v17 = vadd.f32 %v1268_v35, %v1238_v0  ;;  %v1276_v58 = vadd.f32 %v1274_v59, %v1244_v16 }
 0x370   :  { %v1462_v50 = vpop.permute.xlu2 %1461  ;;  %v1282_v28 = vadd.f32 %v1280_v18, %v1250_v24  ;;  %v1288_v19 = vadd.f32 %v1286_v25, %v1256_v30  ;;  %v5302_v56 = vstv %s3986_s5  ;;  %v5308_v16 = vstv %s3865_s8  ;;  %s4183_s25 = sld [smem:[#allocation15 + $0x26]] }
 0x371   :  { %v1467_v51 = vsel %vm2663_vm2, %v1462_v50, 0.0  ;;  %v5310_v30 = vstv %s4021_s17  ;;  %v5312_v59 = vstv %s3808_s15  ;;  %s5315_s8 = sld [smem:[#allocation32_spill]]  ;;  %v5323_v7 = vstv %s3836_s1 }
 0x372   :  { %v4171_v8 = vmul.f32 %v5302_v56, %v1467_v51  ;;  %v4187_v35 = vmul.f32 %v5310_v30, %v1467_v51  ;;  %v5314_v56 = vstv %s3810_s7  ;;  %s5318_s17 = sld [smem:[#allocation45_spill]]  ;;  %v5319_v30 = vstv %s3883_s19 }
 0x373   :  { %s5320_s15 = sld [smem:[#allocation46_spill]]  ;;  %v5324_v63 = vstv %s3839_s24 }
 0x374   :  { %5303 = vst [vmem:[#allocation65_spill] sm:$0xff] %v4171_v8  ;;  %s4203_s5 = sld [smem:[#allocation15 + $0xf]] }
 0x375   :  { %v1202_v54 = vpop.permute.xlu1 %1201  ;;  %5286 = sst [smem:[#allocation35_spill]] %s4099_s4  ;;  %5311 = vst [vmem:[#allocation68_spill] sm:$0xff] %v4187_v35  ;;  %v5328_v35 = vstv %s3944_s6 }
 0x376   :  { %s4119_s4 = sld [smem:[#allocation15 + $0xd]]  ;;  %v1207_v29 = vsel %vm2641_vm1, %v1202_v54, 0.0  ;;  %v4175_v54 = vmul.f32 %v5304_v55, %v1467_v51 }
 0x377   :  { %5309 = sst [smem:[#allocation58_spill]] %s4183_s25  ;;  %v1211_v18 = vmul.f32 %v5312_v59, %v1207_v29 }
 0x378   :  { %5305 = vst [vmem:[#allocation66_spill] sm:$0xff] %v4175_v54  ;;  %s4213_s7 = sld [smem:[#allocation15 + $0x1b]]  ;;  %v5331_v54 = vstv %s5316_s28  ;;  %v5332_v8 = vstv %s5318_s17 }
 0x379   :  { %5329 = sst [smem:[#allocation34_spill]] %s4223_s3 }
 0x37a   :  { %s4246_s17 = sld [smem:[#allocation15 + $0x1c]] }
 0x37b   :  { %s4272_s1 = sld [smem:[#allocation15 + $0x11]] }
 0x37c   :  { %5290 = sst [smem:[#allocation55_spill]] %s4119_s4 }
 0x37d   :  { %v1306_v37 = vpop.permute.xlu0 %1305  ;;  %s4138_s4 = sld [smem:[#allocation15 + $0x25]] }
 0x37e   :  { %v1310_v52 = vsel %vm2641_vm1, %v1306_v37, 0.0  ;;  %v1360_v37 = vpop.permute.xlu1 %1359  ;;  %5325 = sst [smem:[#allocation41_spill]] %s4213_s7 }
 0x37f   :  { %v1314_v50 = vmul.f32 %v5299_v43, %v1310_v52  ;;  %v5306_v43 = vstv %s4008_s13  ;;  %v1320_v24 = vmul.f32 %v5308_v16, %v1310_v52  ;;  %v1365_v55 = vsel %vm2663_vm2, %v1360_v37, 0.0  ;;  %s4195_s13 = sld [smem:[#allocation15 + $0x3]] }
 0x380   :  { %v4179_v0 = vmul.f32 %v5306_v43, %v1467_v51  ;;  %v1217_v43 = vmul.f32 %v5314_v56, %v1207_v29  ;;  %v1326_v51 = vmul.f32 %v5317_v36, %v1310_v52  ;;  %v1332_v59 = vmul.f32 %v5319_v30, %v1310_v52  ;;  %s4274_s24 = sld [smem:[#allocation15 + $0x1d]] }
 0x381   :  { %v1316_v16 = vadd.f32 %v1314_v50, %v1270_v17  ;;  %v5326_v17 = vstv %s3812_s21  ;;  %v5327_v56 = vstv %s3814_s9  ;;  %v1322_v52 = vadd.f32 %v1320_v24, %v1276_v58  ;;  %s4233_s21 = sld [smem:[#allocation15 + $0x4]] }
 0x382   :  { %5307 = vst [vmem:[#allocation67_spill] sm:$0xff] %v4179_v0  ;;  %v1223_v50 = vmul.f32 %v5326_v17, %v1207_v29  ;;  %v1229_v36 = vmul.f32 %v5327_v56, %v1207_v29  ;;  %v4221_v0 = vmul.f32 %v5328_v35, %v1365_v55  ;;  %v5330_v30 = vstv %s5315_s8  ;;  %s4240_s9 = sld [smem:[#allocation15 + $0x10]] }
 0x383   :  { %5294 = sst [smem:[#allocation39_spill]] %s4138_s4  ;;  %v5334_v17 = vstv %s3956_s18  ;;  %v1328_v35 = vadd.f32 %v1326_v51, %v1282_v28  ;;  %v1334_v56 = vadd.f32 %v1332_v59, %v1288_v19  ;;  %v1340_v58 = vadd.f32 %v3889_v40, %v1316_v16 }
 0x384   :  { %s4165_s4 = sld [smem:[#allocation15 + $0xe]]  ;;  %v4237_v29 = vmul.f32 %v5334_v17, %v1365_v55  ;;  %v5336_v19 = vstv %s3968_s26  ;;  %v1346_v40 = vadd.f32 %v3892_v32, %v1322_v52 }
 0x385   :  { %v1100_v1 = vpop.permute.xlu0 %1099  ;;  %5313 = sst [smem:[#allocation51_spill]] %s4195_s13  ;;  %v4254_v28 = vmul.f32 %v5336_v19, %v1365_v55  ;;  %v1352_v32 = vadd.f32 %v3900_v48, %v1328_v35  ;;  %v1358_v16 = vadd.f32 %v3903_v33, %v1334_v56  ;;  %v1372_v51 = vadd.f32 %v4142_v49, %v1340_v58 }
 0x386   :  { %v1105_v25 = vsel %vm2641_vm1, %v1100_v1, 0.0  ;;  %v1408_v24 = vpop.permute.xlu1 %1407  ;;  %v5337_v48 = vstv %s3897_s11  ;;  %v5338_v33 = vstv %s3915_s2  ;;  %v5339_v49 = vstv %s3922_s12  ;;  %s4284_s19 = sld [smem:[#allocation15 + $0x29]] }
 0x387   :  { %v1109_v37 = vmul.f32 %v5321_v6, %v1105_v25  ;;  %v1115_v1 = vmul.f32 %v5322_v34, %v1105_v25  ;;  %v1121_v47 = vmul.f32 %v5323_v7, %v1105_v25  ;;  %v1127_v45 = vmul.f32 %v5324_v63, %v1105_v25  ;;  %s4290_s6 = sld [smem:[#allocation15 + $0x6]] }
 0x388   :  { %v5333_v63 = vstv %s5320_s15  ;;  %v5342_v35 = vstv %s4033_s0  ;;  %v5343_v58 = vstv %s4037_s10  ;;  %s4300_s11 = sld [smem:[#allocation15 + $0x12]] }
 0x389   :  { %v1111_v6 = vadd.f32 %v1109_v37, %v5330_v30  ;;  %v1117_v34 = vadd.f32 %v1115_v1, %v5331_v54  ;;  %v1123_v7 = vadd.f32 %v1121_v47, %v5332_v8  ;;  %v1129_v25 = vadd.f32 %v1127_v45, %v5333_v63  ;;  %s4302_s2 = sld [smem:[#allocation15 + $0x1e]] }
 0x38a   :  { %5300 = sst [smem:[#allocation56_spill]] %s4165_s4  ;;  %v5335_v1 = vstv %s3960_s29 }
 0x38b   :  { %v1135_v54 = vadd.f32 %v3895_v41, %v1111_v6  ;;  %v1141_v37 = vadd.f32 %v3906_v46, %v1117_v34  ;;  %v1147_v47 = vadd.f32 %v3909_v60, %v1123_v7  ;;  %v1153_v45 = vadd.f32 %v3918_v38, %v1129_v25  ;;  %s4309_s12 = sld [smem:[#allocation15 + $0x2a]] }
 0x38c   :  { %v4250_v30 = vmul.f32 %v5335_v1, %v1365_v55  ;;  %v5340_v7 = vstv %s3930_s16  ;;  %v5341_v25 = vstv %s4027_s30  ;;  %v1390_v1 = vadd.f32 %v4159_v9, %v1358_v16  ;;  %s4315_s16 = sld [smem:[#allocation15 + $0x7]] }
 0x38d   :  { %v1258_v8 = vpop.permute.xlu0 %1257  ;;  %v1167_v46 = vadd.f32 %v4081_v15, %v1135_v54  ;;  %v1173_v60 = vadd.f32 %v4089_v31, %v1141_v37  ;;  %v1179_v38 = vadd.f32 %v4091_v4, %v1147_v47  ;;  %v1185_v55 = vadd.f32 %v4093_v12, %v1153_v45  ;;  %s4325_s18 = sld [smem:[#allocation15 + $0x13]] }
 0x38e   :  { %v1263_v41 = vsel %vm2663_vm2, %v1258_v8, 0.0  ;;  %v1412_v15 = vsel %vm2641_vm1, %v1408_v24, 0.0  ;;  %v5344_v54 = vstv %s4043_s27  ;;  %5345 = sst [smem:[#allocation32_spill]] %s4300_s11 }
 0x38f   :  { %v1213_v31 = vadd.f32 %v1211_v18, %v1167_v46  ;;  %v1219_v4 = vadd.f32 %v1217_v43, %v1173_v60  ;;  %v1225_v59 = vadd.f32 %v1223_v50, %v1179_v38  ;;  %v1231_v12 = vadd.f32 %v1229_v36, %v1185_v55  ;;  %5346 = sst [smem:[#allocation42_spill]] %s4302_s2 }
 0x390   :  { %v1267_v52 = vmul.f32 %v5337_v48, %v1263_v41  ;;  %v1273_v6 = vmul.f32 %v5338_v33, %v1263_v41  ;;  %v1279_v34 = vmul.f32 %v5339_v49, %v1263_v41  ;;  %v1285_v63 = vmul.f32 %v5340_v7, %v1263_v41  ;;  %s5350_s29 = sld [smem:[#allocation36_spill]] }
 0x391   :  { %v1237_v18 = vadd.f32 %v3925_v21, %v1213_v31  ;;  %v1243_v43 = vadd.f32 %v3928_v20, %v1219_v4  ;;  %v1249_v50 = vadd.f32 %v3933_v53, %v1225_v59  ;;  %v1255_v36 = vadd.f32 %v3936_v5, %v1231_v12  ;;  %5347 = sst [smem:[#allocation45_spill]] %s4309_s12 }
 0x392   :  { %v1416_v17 = vmul.f32 %v5341_v25, %v1412_v15  ;;  %v1422_v56 = vmul.f32 %v5342_v35, %v1412_v15  ;;  %v1428_v24 = vmul.f32 %v5343_v58, %v1412_v15  ;;  %v1434_v37 = vmul.f32 %v5344_v54, %v1412_v15  ;;  %5348 = sst [smem:[#allocation46_spill]] %s4315_s16 }
 0x393   :  { %v1269_v47 = vadd.f32 %v1267_v52, %v1237_v18  ;;  %v1275_v21 = vadd.f32 %v1273_v6, %v1243_v43  ;;  %v1281_v45 = vadd.f32 %v1279_v34, %v1249_v50  ;;  %v1287_v20 = vadd.f32 %v1285_v63, %v1255_v36  ;;  %5349 = sst [smem:[#allocation69_spill]] %s4325_s18 }
 0x394   :  { %v1378_v53 = vadd.f32 %v4146_v10, %v1346_v40  ;;  %v1384_v5 = vadd.f32 %v4155_v13, %v1352_v32  ;;  %v4317_v13 = vadd.f32 %v1416_v17, %v1372_v51  ;;  %v4323_v40 = vadd.f32 %v1434_v37, %v1390_v1  ;;  %s5351_s26 = sld [smem:[#allocation37_spill]] }
 0x395   :  { %v1406_v8 = vpop.permute.xlu0 %1405  ;;  %v1315_v41 = vadd.f32 %v4097_v26, %v1269_v47  ;;  %v1321_v46 = vadd.f32 %v4103_v22, %v1275_v21  ;;  %v1327_v60 = vadd.f32 %v4107_v11, %v1281_v45  ;;  %v1333_v10 = vadd.f32 %v4133_v27, %v1287_v20  ;;  %s5352_s28 = sld [smem:[#allocation38_spill]] }
 0x396   :  { %v1411_v19 = vsel %vm2641_vm1, %v1406_v8, 0.0  ;;  %v4319_v14 = vadd.f32 %v1422_v56, %v1378_v53  ;;  %v4321_v9 = vadd.f32 %v1428_v24, %v1384_v5  ;;  %s5353_s8 = sld [smem:[#allocation52_spill]]  ;;  %v5355_v38 = vmov %v5341_v25  ;;  %v5373_v56 = vld [vmem:[#allocation67_spill] sm:$0xff]  ;;  %v5374_v24 = vld [vmem:[#allocation68_spill] sm:$0xff] }
 0x397   :  { %v1339_v26 = vadd.f32 %v3963_v44, %v1315_v41  ;;  %v1345_v11 = vadd.f32 %v3966_v57, %v1321_v46  ;;  %v1351_v22 = vadd.f32 %v3971_v23, %v1327_v60  ;;  %v1357_v27 = vadd.f32 %v3974_v39, %v1333_v10  ;;  %s4331_s15 = sld [smem:[#allocation15 + $0x1f]] }
 0x398   :  { %v1415_v55 = vmul.f32 %v5355_v38, %v1411_v19  ;;  %v5356_v32 = vmov %v5342_v35  ;;  %v5357_v51 = vmov %v5343_v58  ;;  %v5358_v31 = vmov %v5344_v54  ;;  %s4341_s18 = sld [smem:[#allocation15 + $0x2b]]  ;;  %v5372_v35 = vld [vmem:[#allocation66_spill] sm:$0xff] }
 0x399   :  { %v1421_v16 = vmul.f32 %v5356_v32, %v1411_v19  ;;  %v1427_v15 = vmul.f32 %v5357_v51, %v1411_v19  ;;  %v1433_v4 = vmul.f32 %v5358_v31, %v1411_v19  ;;  %v1371_v44 = vadd.f32 %v4221_v0, %v1339_v26  ;;  %s5360_s16 = sld [smem:[#allocation54_spill]] }
 0x39a   :  { %v1377_v57 = vadd.f32 %v4237_v29, %v1345_v11  ;;  %s5361_s12 = sld [smem:[#allocation43_spill]]  ;;  %v1383_v23 = vadd.f32 %v4250_v30, %v1351_v22  ;;  %v1389_v39 = vadd.f32 %v4254_v28, %v1357_v27  ;;  %v1510_v59 = vstv %s5350_s29 }
 0x39b   :  { %s5362_s30 = sld [smem:[#allocation35_spill]]  ;;  %v1512_v12 = vstv %s5351_s26  ;;  %v1514_v48 = vstv %s5352_s28  ;;  %v1417_v33 = vadd.f32 %v1415_v55, %v1371_v44  ;;  %v1524_v30 = vstv %s4075_s22 }
 0x39c   :  { %s4347_s0 = sld [smem:[#allocation15 + $0x8]]  ;;  %v1516_v52 = vstv %s5353_s8  ;;  %v1423_v0 = vadd.f32 %v1421_v16, %v1377_v57  ;;  %v1429_v29 = vadd.f32 %v1427_v15, %v1383_v23  ;;  %v1435_v6 = vadd.f32 %v1433_v4, %v1389_v39 }
 0x39d   :  { %5354 = sst [smem:[#allocation70_spill]] %s4331_s15  ;;  %v1441_v7 = vadd.f32 %v3977_v61, %v1417_v33  ;;  %v5371_v61 = vld [vmem:[#allocation65_spill] sm:$0xff]  ;;  %v1584_v37 = vstv %s4165_s4  ;;  %v1590_v47 = vstv %s4167_s20  ;;  %v1596_v21 = vstv %s4183_s25  ;;  %v5393_v33 = vld [vmem:[#allocation64_spill] sm:$0xff] }
 0x39e   :  { %5359 = sst [smem:[#allocation71_spill]] %s4341_s18  ;;  %v1447_v63 = vadd.f32 %v3980_v62, %v1423_v0  ;;  %v1453_v18 = vadd.f32 %v3989_v42, %v1429_v29  ;;  %v1459_v43 = vadd.f32 %v3992_v3, %v1435_v6  ;;  %v1608_v45 = vstv %s4195_s13  ;;  %v5392_v6 = vld [vmem:[#allocation63_spill] sm:$0xff] }
 0x39f   :  { %s4353_s10 = sld [smem:[#allocation15 + $0x14]]  ;;  %v1530_v28 = vstv %s5360_s16  ;;  %v1473_v62 = vadd.f32 %v5371_v61, %v1441_v7  ;;  %v1614_v20 = vstv %s4203_s5  ;;  %v1632_v1 = vstv %s4233_s21 }
 0x3a0   :  { %s5365_s27 = sld [smem:[#allocation44_spill]]  ;;  %v1536_v49 = vstv %s5361_s12  ;;  %v1479_v42 = vadd.f32 %v5372_v35, %v1447_v63  ;;  %v1485_v3 = vadd.f32 %v5373_v56, %v1453_v18  ;;  %v1491_v54 = vadd.f32 %v5374_v24, %v1459_v43  ;;  %v5390_v43 = vld [vmem:[#allocation61_spill] sm:$0xff]  ;;  %v5391_v63 = vld [vmem:[#allocation62_spill] sm:$0xff] }
 0x3a1   :  { %s5366_s18 = sld [smem:[#allocation55_spill]]  ;;  %v1542_v34 = vstv %s5362_s30  ;;  %v1493_v5 = vmax.f32 %v1473_v62, 0.0  ;;  %v1638_v19 = vstv %s4240_s9  ;;  %v1644_v41 = vstv %s4246_s17 }
 0x3a2   :  { %5363 = sst [smem:[#allocation72_spill]] %s4347_s0  ;;  %v1497_v46 = vmax.f32 %v1479_v42, 0.0  ;;  %v1501_v60 = vmax.f32 %v1485_v3, 0.0  ;;  %v5064_v10 = vstv %s4259_s23  ;;  %v1505_v11 = vmax.f32 %v1491_v54, 0.0  ;;  %v1464_v3 = vpop.permute.xlu0 %1463 }
 0x3a3   :  { %s5367_s15 = sld [smem:[#allocation33_spill]]  ;;  %v4407_v15 = vmin.f32 %v1493_v5, 6.0  ;;  %v1442_v18 = vadd.f32 %v5390_v43, %v4317_v13  ;;  %v1448_v7 = vadd.f32 %v5391_v63, %v4319_v14  ;;  %v1454_v29 = vadd.f32 %v5392_v6, %v4321_v9 }
 0x3a4   :  { %s5368_s2 = sld [smem:[#allocation39_spill]]  ;;  %v4412_v57 = vmin.f32 %v1497_v46, 6.0  ;;  %v4414_v23 = vmin.f32 %v1501_v60, 6.0  ;;  %v4418_v0 = vmin.f32 %v1505_v11, 6.0  ;;  %v1460_v60 = vadd.f32 %v5393_v33, %v4323_v40 }
 0x3a5   :  { %5364 = sst [smem:[#allocation73_spill]] %s4353_s10  ;;  %v1517_v62 = vrot.slane %v4407_v15, 7  ;;  %v1571_v35 = vrot.slane %v4407_v15, 1  ;;  %v1468_v11 = vsel %vm2663_vm2, %v1464_v3, 0.0 }
 0x3a6   :  { %s4355_s11 = sld [smem:[#allocation15 + $0x20]]  ;;  %v1548_v50 = vstv %s5365_s27  ;;  %v1601_v24 = vrot.slane %v4412_v57, 7  ;;  %v4476_v33 = vmul.f32 %v1632_v1, %v4412_v57 }
 0x3a7   :  { %s5369_s0 = sld [smem:[#allocation40_spill]]  ;;  %v1554_v36 = vstv %s5366_s18  ;;  %v4444_v61 = vmul.f32 %v1548_v50, %v4407_v15 }
 0x3a8   :  { %s4361_s26 = sld [smem:[#allocation15 + $0x2c]]  ;;  %v1555_v9 = vmul.f32 %v1554_v36, %v4407_v15 }
 0x3a9   :  { %s4367_s8 = sld [smem:[#allocation15 + $0x9]]  ;;  %v1560_v25 = vstv %s5367_s15 }
 0x3aa   :  { %v1566_v17 = vstv %s5368_s2  ;;  %s4373_s28 = sld [smem:[#allocation15 + $0x15]]  ;;  %v1561_v40 = vmul.f32 %v1560_v25, %v4407_v15 }
 0x3ab   :  { %s4379_s29 = sld [smem:[#allocation15 + $0x21]]  ;;  %v1567_v2 = vmul.f32 %v1566_v17, %v4407_v15 }
 0x3ac   :  { %s4385_s30 = sld [smem:[#allocation15 + $0x2d]] }
 0x3ad   :  { %v1578_v58 = vstv %s5369_s0  ;;  %s4391_s12 = sld [smem:[#allocation15 + $0xa]] }
 0x3ae   :  { %5370 = sst [smem:[#allocation44_spill]] %s4361_s26 }
 0x3af   :  { %s5378_s20 = sld [smem:[#allocation46_spill]] }
 0x3b0   :  { %s5379_s25 = sld [smem:[#allocation69_spill]] }
 0x3b1   :  { %s4396_s22 = sld [smem:[#allocation15 + $0x16]] }
 0x3b2   :  { %s5381_s13 = sld [smem:[#allocation70_spill]] }
 0x3b3   :  { %s5382_s7 = sld [smem:[#allocation71_spill]]  ;;  %v5055_v42 = vstv %s4391_s12 }
 0x3b4   :  { %s4423_s4 = sld [smem:[#allocation15 + $0x22]] }
 0x3b5   :  { %v5063_v31 = vstv %s5378_s20  ;;  %s4429_s16 = sld [smem:[#allocation15 + $0x2e]] }
 0x3b6   :  { %v5058_v4 = vstv %s5379_s25  ;;  %s5386_s0 = sld [smem:[#allocation47_spill]] }
 0x3b7   :  { %5380 = sst [smem:[#allocation55_spill]] %s4396_s22  ;;  %v5056_v56 = vstv %s4396_s22 }
 0x3b8   :  { %v5053_v44 = vstv %s5381_s13  ;;  %s5387_s3 = sld [smem:[#allocation48_spill]] }
 0x3b9   :  { %v5054_v39 = vstv %s5382_s7  ;;  %s5388_s10 = sld [smem:[#allocation49_spill]] }
 0x3ba   :  { %5384 = sst [smem:[#allocation33_spill]] %s4423_s4 }
 0x3bb   :  { %5385 = sst [smem:[#allocation39_spill]] %s4429_s16  ;;  %v5060_v55 = vstv %s4429_s16 }
 0x3bc   :  { %s5389_s26 = sld [smem:[#allocation50_spill]]  ;;  %v5394_v46 = vstv %s5386_s0 }
 0x3bd   :  { %v1472_v51 = vmul.f32 %v5394_v46, %v1468_v11  ;;  %s5413_s17 = sld [smem:[#allocation41_spill]] }
 0x3be   :  { %v5395_v16 = vstv %s5387_s3  ;;  %s5414_s16 = sld [smem:[#allocation34_spill]] }
 0x3bf   :  { %v1478_v13 = vmul.f32 %v5395_v16, %v1468_v11  ;;  %v5396_v43 = vstv %s5388_s10  ;;  %v1474_v16 = vadd.f32 %v1472_v51, %v1442_v18  ;;  %s4668_s5 = sld [smem:[#allocation15 + $0xb]] }
 0x3c0   :  { %v1484_v32 = vmul.f32 %v5396_v43, %v1468_v11  ;;  %v4486_v43 = vmul.f32 %v1644_v41, %v4412_v57  ;;  %s5429_s15 = sld [smem:[#allocation32_spill]] }
 0x3c1   :  { %v1480_v6 = vadd.f32 %v1478_v13, %v1448_v7  ;;  %v1494_v38 = vmax.f32 %v1474_v16, 0.0  ;;  %v4508_v13 = vmul.f32 %v5053_v44, %v4414_v23  ;;  %v4518_v16 = vmul.f32 %v5055_v42, %v4418_v0  ;;  %s5433_s27 = sld [smem:[#allocation42_spill]] }
 0x3c2   :  { %v5397_v14 = vstv %s5389_s26  ;;  %v1486_v3 = vadd.f32 %v1484_v32, %v1454_v29  ;;  %v4493_v32 = vmul.f32 %v5064_v10, %v4412_v57  ;;  %v4498_v29 = vmul.f32 %v5063_v31, %v4414_v23  ;;  %s5435_s3 = sld [smem:[#allocation45_spill]] }
 0x3c3   :  { %v1490_v63 = vmul.f32 %v5397_v14, %v1468_v11  ;;  %v4481_v11 = vmul.f32 %v1638_v19, %v4412_v57  ;;  %v5057_v14 = vstv %s4423_s4  ;;  %v1498_v51 = vmax.f32 %v1480_v6, 0.0 }
 0x3c4   :  { %v1502_v18 = vmax.f32 %v1486_v3, 0.0  ;;  %v1496_v6 = vmin.f32 %v1494_v38, 6.0  ;;  %v4530_v44 = vmul.f32 %v5057_v14, %v4418_v0 }
 0x3c5   :  { %v1492_v46 = vadd.f32 %v1490_v63, %v1460_v60  ;;  %v4503_v60 = vmul.f32 %v5058_v4, %v4414_v23  ;;  %v4513_v63 = vmul.f32 %v5054_v39, %v4414_v23  ;;  %v4520_v3 = vmin.f32 %v1498_v51, 6.0 }
 0x3c6   :  { %v4535_v39 = vmul.f32 %v5060_v55, %v4418_v0  ;;  %v4537_v42 = vmin.f32 %v1502_v18, 6.0  ;;  %v1518_v51 = vrot.slane %v1496_v6, 7  ;;  %v1556_v14 = vmul.f32 %v1554_v36, %v1496_v6 }
 0x3c7   :  { %v1506_v7 = vmax.f32 %v1492_v46, 0.0  ;;  %v4525_v46 = vmul.f32 %v5056_v56, %v4418_v0  ;;  %v1550_v56 = vmul.f32 %v1548_v50, %v1496_v6  ;;  %v1562_v4 = vmul.f32 %v1560_v25, %v1496_v6 }
 0x3c8   :  { %v1568_v55 = vmul.f32 %v1566_v17, %v1496_v6  ;;  %v1572_v18 = vrot.slane %v1496_v6, 1  ;;  %v1519_v22 = vsel %vm725_vm5, %v1517_v62, %v1518_v51  ;;  %v1520_v50 = vsel %vm725_vm5, %v1518_v51, %v1517_v62 }
 0x3c9   :  { %v4539_v38 = vmin.f32 %v1506_v7, 6.0  ;;  %v1602_v7 = vrot.slane %v4520_v3, 7  ;;  %v4557_v36 = vmul.f32 %v1632_v1, %v4520_v3  ;;  %v4562_v25 = vmul.f32 %v1638_v19, %v4520_v3 }
 0x3ca   :  { %v1521_v17 = vsel %vm165_vm4, %v1520_v50, 0.0  ;;  %v1526_v6 = vmul.f32 %v1524_v30, %v1519_v22  ;;  %v1532_v26 = vmul.f32 %v1530_v28, %v1519_v22  ;;  %v1538_v62 = vmul.f32 %v1536_v49, %v1519_v22 }
 0x3cb   :  { %v1525_v1 = vmul.f32 %v1524_v30, %v1521_v17  ;;  %v1531_v51 = vmul.f32 %v1530_v28, %v1521_v17  ;;  %v1537_v5 = vmul.f32 %v1536_v49, %v1521_v17  ;;  %v1543_v19 = vmul.f32 %v1542_v34, %v1521_v17 }
 0x3cc   :  { %v1528_v54 = vadd.f32 %v1526_v6, %v1510_v59  ;;  %v1534_v50 = vadd.f32 %v1532_v26, %v1512_v12  ;;  %v1540_v31 = vadd.f32 %v1538_v62, %v1514_v48  ;;  %v1544_v10 = vmul.f32 %v1542_v34, %v1519_v22 }
 0x3cd   :  { %v1527_v53 = vadd.f32 %v1525_v1, %v1510_v59  ;;  %v1533_v8 = vadd.f32 %v1531_v51, %v1512_v12  ;;  %v1539_v30 = vadd.f32 %v1537_v5, %v1514_v48  ;;  %v1545_v28 = vadd.f32 %v1543_v19, %v1516_v52 }
 0x3ce   :  { %v1546_v49 = vadd.f32 %v1544_v10, %v1516_v52  ;;  %v1552_v17 = vadd.f32 %v1550_v56, %v1528_v54  ;;  %v1558_v26 = vadd.f32 %v1556_v14, %v1534_v50  ;;  %v1646_v34 = vmul.f32 %v1644_v41, %v4520_v3 }
 0x3cf   :  { %v1551_v59 = vadd.f32 %v4444_v61, %v1527_v53  ;;  %v1557_v12 = vadd.f32 %v1555_v9, %v1533_v8  ;;  %v1563_v22 = vadd.f32 %v1561_v40, %v1539_v30  ;;  %v1564_v48 = vadd.f32 %v1562_v4, %v1540_v31 }
 0x3d0   :  { %v1569_v5 = vadd.f32 %v1567_v2, %v1545_v28  ;;  %v1570_v6 = vadd.f32 %v1568_v55, %v1546_v49  ;;  %v1573_v52 = vsel %vm780_vm6, %v1571_v35, %v1572_v18  ;;  %v1574_v41 = vsel %vm780_vm6, %v1572_v18, %v1571_v35 }
 0x3d1   :  { %v1576_v53 = vsel %vm164_vm3, %v1574_v41, 0.0  ;;  %v1579_v8 = vmul.f32 %v1578_v58, %v1573_v52  ;;  %v1585_v31 = vmul.f32 %v1584_v37, %v1573_v52  ;;  %v1603_v55 = vsel %vm725_vm5, %v1601_v24, %v1602_v7 }
 0x3d2   :  { %v1580_v4 = vmul.f32 %v1578_v58, %v1576_v53  ;;  %v1586_v15 = vmul.f32 %v1584_v37, %v1576_v53  ;;  %v1591_v61 = vmul.f32 %v1590_v47, %v1573_v52  ;;  %v1592_v35 = vmul.f32 %v1590_v47, %v1576_v53 }
 0x3d3   :  { %v1581_v56 = vadd.f32 %v1579_v8, %v1551_v59  ;;  %v1587_v54 = vadd.f32 %v1585_v31, %v1557_v12  ;;  %v1597_v9 = vmul.f32 %v1596_v21, %v1573_v52  ;;  %v1598_v40 = vmul.f32 %v1596_v21, %v1576_v53 }
 0x3d4   :  { %v1582_v2 = vadd.f32 %v1580_v4, %v1552_v17  ;;  %v1588_v14 = vadd.f32 %v1586_v15, %v1558_v26  ;;  %v1593_v58 = vadd.f32 %v1591_v61, %v1563_v22  ;;  %v1594_v37 = vadd.f32 %v1592_v35, %v1564_v48 }
 0x3d5   :  { %v1600_v18 = vadd.f32 %v1598_v40, %v1570_v6  ;;  %v1604_v47 = vsel %vm725_vm5, %v1602_v7, %v1601_v24  ;;  %v1610_v62 = vmul.f32 %v1608_v45, %v1603_v55  ;;  %v1616_v1 = vmul.f32 %v1614_v20, %v1603_v55 }
 0x3d6   :  { %v1599_v51 = vadd.f32 %v1597_v9, %v1569_v5  ;;  %v1605_v21 = vsel %vm165_vm4, %v1604_v47, 0.0  ;;  %v5415_v19 = vstv %s5413_s17  ;;  %v5416_v30 = vstv %s5414_s16 }
 0x3d7   :  { %v1622_v50 = vmul.f32 %v5415_v19, %v1603_v55  ;;  %v1628_v28 = vmul.f32 %v5416_v30, %v1603_v55  ;;  %v1609_v49 = vmul.f32 %v1608_v45, %v1605_v21  ;;  %v1612_v17 = vadd.f32 %v1610_v62, %v1582_v2 }
 0x3d8   :  { %v1615_v26 = vmul.f32 %v1614_v20, %v1605_v21  ;;  %v1618_v59 = vadd.f32 %v1616_v1, %v1588_v14  ;;  %v5417_v24 = vmov %v5415_v19  ;;  %v5418_v22 = vmov %v5416_v30 }
 0x3d9   :  { %v1621_v7 = vmul.f32 %v5417_v24, %v1605_v21  ;;  %v1624_v12 = vadd.f32 %v1622_v50, %v1594_v37  ;;  %v1627_v48 = vmul.f32 %v5418_v22, %v1605_v21  ;;  %v1630_v6 = vadd.f32 %v1628_v28, %v1600_v18 }
 0x3da   :  { %v1611_v5 = vadd.f32 %v1609_v49, %v1581_v56  ;;  %v1617_v52 = vadd.f32 %v1615_v26, %v1587_v54  ;;  %v1636_v41 = vadd.f32 %v4557_v36, %v1612_v17  ;;  %v5419_v53 = vstv %s4259_s23  ;;  %s4696_s23 = sld [smem:[#allocation15 + $0x23]] }
 0x3db   :  { %v1652_v8 = vmul.f32 %v5419_v53, %v4520_v3  ;;  %v1623_v31 = vadd.f32 %v1621_v7, %v1593_v58  ;;  %v1629_v45 = vadd.f32 %v1627_v48, %v1599_v51  ;;  %v1642_v55 = vadd.f32 %v4562_v25, %v1618_v59 }
 0x3dc   :  { %v1648_v20 = vadd.f32 %v1646_v34, %v1624_v12  ;;  %v1635_v4 = vadd.f32 %v4476_v33, %v1611_v5  ;;  %v1656_v61 = vrot.slane %v4520_v3, 1  ;;  %v1686_v35 = vrot.slane %v4537_v42, 7 }
 0x3dd   :  { %v1654_v15 = vadd.f32 %v1652_v8, %v1630_v6  ;;  %v1641_v36 = vadd.f32 %v4481_v11, %v1617_v52  ;;  %v1647_v56 = vadd.f32 %v4486_v43, %v1623_v31  ;;  %v1653_v25 = vadd.f32 %v4493_v32, %v1629_v45 }
 0x3de   :  { %v5420_v34 = vstv %s5378_s20  ;;  %v5421_v54 = vrot.slane %v4412_v57, 1  ;;  %v5423_v43 = vrot.slane %v4414_v23, 7  ;;  %s4686_s20 = sld [smem:[#allocation15 + $0x17]]  ;;  %v5425_v57 = vstv %s4265_s14 }
 0x3df   :  { %v1718_v33 = vmul.f32 %v5420_v34, %v4537_v42  ;;  %v5426_v37 = vstv %s4272_s1  ;;  %v5427_v47 = vstv %s4274_s24  ;;  %v5428_v1 = vmov %v5425_v57  ;;  %s5445_s14 = sld [smem:[#allocation72_spill]] }
 0x3e0   :  { %v1657_v3 = vsel %vm780_vm6, %v5421_v54, %v1656_v61  ;;  %v5422_v9 = vmov %v5421_v54  ;;  %v1687_v32 = vsel %vm725_vm5, %v5423_v43, %v1686_v35  ;;  %v5424_v40 = vmov %v5423_v43  ;;  %s5446_s1 = sld [smem:[#allocation73_spill]] }
 0x3e1   :  { %v1658_v11 = vsel %vm780_vm6, %v1656_v61, %v5422_v9  ;;  %v1688_v2 = vsel %vm725_vm5, %v1686_v35, %v5424_v40  ;;  %v1663_v58 = vmul.f32 %v5425_v57, %v1657_v3  ;;  %v1669_v18 = vmul.f32 %v5426_v37, %v1657_v3  ;;  %s5468_s24 = sld [smem:[#allocation33_spill]] }
 0x3e2   :  { %v1660_v14 = vsel %vm164_vm3, %v1658_v11, 0.0  ;;  %v1675_v62 = vmul.f32 %v5427_v47, %v1657_v3  ;;  %v5430_v21 = vmov %v5426_v37  ;;  %v5431_v50 = vmov %v5427_v47 }
 0x3e3   :  { %v1664_v51 = vmul.f32 %v5428_v1, %v1660_v14  ;;  %v1670_v19 = vmul.f32 %v5430_v21, %v1660_v14  ;;  %v1676_v30 = vmul.f32 %v5431_v50, %v1660_v14  ;;  %v5432_v28 = vstv %s4284_s19  ;;  %s5470_s19 = sld [smem:[#allocation39_spill]] }
 0x3e4   :  { %v1681_v49 = vmul.f32 %v5432_v28, %v1657_v3  ;;  %v1665_v17 = vadd.f32 %v1663_v58, %v1635_v4  ;;  %v1671_v26 = vadd.f32 %v1669_v18, %v1641_v36  ;;  %v1677_v59 = vadd.f32 %v1675_v62, %v1647_v56 }
 0x3e5   :  { %v5434_v24 = vmov %v5432_v28  ;;  %v1666_v12 = vadd.f32 %v1664_v51, %v1636_v41  ;;  %v1672_v22 = vadd.f32 %v1670_v19, %v1642_v55  ;;  %v1678_v48 = vadd.f32 %v1676_v30, %v1648_v20 }
 0x3e6   :  { %v1682_v7 = vmul.f32 %v5434_v24, %v1660_v14  ;;  %v1683_v6 = vadd.f32 %v1681_v49, %v1653_v25  ;;  %v1689_v52 = vsel %vm165_vm4, %v1688_v2, 0.0  ;;  %v5436_v53 = vstv %s4290_s6 }
 0x3e7   :  { %v1694_v8 = vmul.f32 %v5436_v53, %v1687_v32  ;;  %v5437_v31 = vstv %s5429_s15  ;;  %v5438_v4 = vmov %v5436_v53  ;;  %v5440_v56 = vstv %s5433_s27 }
 0x3e8   :  { %v1684_v5 = vadd.f32 %v1682_v7, %v1654_v15  ;;  %v1700_v45 = vmul.f32 %v5437_v31, %v1687_v32  ;;  %v1693_v61 = vmul.f32 %v5438_v4, %v1689_v52  ;;  %v5439_v35 = vmov %v5437_v31 }
 0x3e9   :  { %v1699_v36 = vmul.f32 %v5439_v35, %v1689_v52  ;;  %v1705_v41 = vmul.f32 %v5440_v56, %v1689_v52  ;;  %v5441_v55 = vmov %v5440_v56  ;;  %v1696_v25 = vadd.f32 %v1694_v8, %v1666_v12 }
 0x3ea   :  { %v1706_v20 = vmul.f32 %v5441_v55, %v1687_v32  ;;  %v1702_v15 = vadd.f32 %v1700_v45, %v1672_v22  ;;  %v5442_v34 = vstv %s5435_s3  ;;  %v1695_v11 = vadd.f32 %v1693_v61, %v1665_v17 }
 0x3eb   :  { %v1711_v54 = vmul.f32 %v5442_v34, %v1689_v52  ;;  %v5443_v3 = vmov %v5442_v34  ;;  %v1701_v43 = vadd.f32 %v1699_v36, %v1671_v26  ;;  %v1707_v40 = vadd.f32 %v1705_v41, %v1677_v59 }
 0x3ec   :  { %v1712_v9 = vmul.f32 %v5443_v3, %v1687_v32  ;;  %v5444_v2 = vstv %s5379_s25  ;;  %v1830_v57 = vstv %s4668_s5  ;;  %v1708_v58 = vadd.f32 %v1706_v20, %v1678_v48  ;;  %s4762_s25 = sld [smem:[#allocation15 + $0x2f]] }
 0x3ed   :  { %v1724_v14 = vmul.f32 %v5444_v2, %v4537_v42  ;;  %v1713_v37 = vadd.f32 %v1711_v54, %v1683_v6  ;;  %v1836_v47 = vstv %s4686_s20  ;;  %v1842_v62 = vstv %s4696_s23 }
 0x3ee   :  { %v1714_v18 = vadd.f32 %v1712_v9, %v1684_v5  ;;  %v1720_v1 = vadd.f32 %v1718_v33, %v1696_v25  ;;  %v5447_v21 = vstv %s5381_s13  ;;  %v5448_v32 = vstv %s5382_s7  ;;  %s5449_s13 = sld [smem:[#allocation44_spill]] }
 0x3ef   :  { %v1726_v51 = vadd.f32 %v1724_v14, %v1702_v15  ;;  %v1730_v19 = vmul.f32 %v5447_v21, %v4537_v42  ;;  %v1736_v50 = vmul.f32 %v5448_v32, %v4537_v42  ;;  %v1740_v30 = vrot.slane %v4537_v42, 1  ;;  %s5464_s7 = sld [smem:[#allocation55_spill]] }
 0x3f0   :  { %v1770_v28 = vrot.slane %v4539_v38, 7  ;;  %v1719_v49 = vadd.f32 %v4498_v29, %v1695_v11  ;;  %v1725_v33 = vadd.f32 %v4503_v60, %v1701_v43  ;;  %v1731_v17 = vadd.f32 %v4508_v13, %v1707_v40 }
 0x3f1   :  { %v1737_v26 = vadd.f32 %v4513_v63, %v1713_v37  ;;  %v1732_v59 = vadd.f32 %v1730_v19, %v1708_v58  ;;  %v1738_v24 = vadd.f32 %v1736_v50, %v1714_v18  ;;  %v5450_v7 = vrot.slane %v4414_v23, 1 }
 0x3f2   :  { %v5452_v13 = vstv %s5445_s14  ;;  %v5453_v63 = vstv %s5446_s1  ;;  %v5454_v6 = vrot.slane %v4418_v0, 7  ;;  %v5457_v31 = vstv %s4355_s11 }
 0x3f3   :  { %v1741_v42 = vsel %vm780_vm6, %v5450_v7, %v1740_v30  ;;  %v5451_v12 = vmov %v5450_v7  ;;  %v5455_v52 = vmov %v5452_v13  ;;  %v5456_v53 = vmov %v5453_v63 }
 0x3f4   :  { %v1742_v29 = vsel %vm780_vm6, %v1740_v30, %v5451_v12  ;;  %v1747_v22 = vmul.f32 %v5452_v13, %v1741_v42  ;;  %v1753_v48 = vmul.f32 %v5453_v63, %v1741_v42  ;;  %v1771_v5 = vsel %vm725_vm5, %v5454_v6, %v1770_v28 }
 0x3f5   :  { %v1744_v60 = vsel %vm164_vm3, %v1742_v29, 0.0  ;;  %v1759_v45 = vmul.f32 %v5457_v31, %v1741_v42  ;;  %v5458_v4 = vmov %v5457_v31  ;;  %v5459_v56 = vstv %s5449_s13 }
 0x3f6   :  { %v1748_v23 = vmul.f32 %v5455_v52, %v1744_v60  ;;  %v1754_v8 = vmul.f32 %v5456_v53, %v1744_v60  ;;  %v1760_v61 = vmul.f32 %v5458_v4, %v1744_v60  ;;  %v1749_v35 = vadd.f32 %v1747_v22, %v1719_v49 }
 0x3f7   :  { %v1755_v36 = vadd.f32 %v1753_v48, %v1725_v33  ;;  %v1765_v41 = vmul.f32 %v5459_v56, %v1741_v42  ;;  %v5460_v55 = vmov %v5459_v56  ;;  %v1761_v34 = vadd.f32 %v1759_v45, %v1731_v17 }
 0x3f8   :  { %v1766_v20 = vmul.f32 %v5460_v55, %v1744_v60  ;;  %v1750_v25 = vadd.f32 %v1748_v23, %v1720_v1  ;;  %v1756_v15 = vadd.f32 %v1754_v8, %v1726_v51  ;;  %v1762_v54 = vadd.f32 %v1760_v61, %v1732_v59 }
 0x3f9   :  { %v5461_v9 = vmov %v5454_v6  ;;  %v5462_v43 = vstv %s4367_s8  ;;  %v5463_v2 = vstv %s4373_s28  ;;  %v1767_v58 = vadd.f32 %v1765_v41, %v1737_v26 }
 0x3fa   :  { %v1768_v3 = vadd.f32 %v1766_v20, %v1738_v24  ;;  %v1772_v11 = vsel %vm725_vm5, %v1770_v28, %v5461_v9  ;;  %v1778_v40 = vmul.f32 %v5462_v43, %v1771_v5  ;;  %v1784_v14 = vmul.f32 %v5463_v2, %v1771_v5 }
 0x3fb   :  { %v1773_v37 = vsel %vm165_vm4, %v1772_v11, 0.0  ;;  %v5465_v18 = vstv %s4379_s29  ;;  %v5466_v51 = vstv %s4385_s30  ;;  %v5467_v19 = vmov %v5462_v43 }
 0x3fc   :  { %v1790_v1 = vmul.f32 %v5465_v18, %v1771_v5  ;;  %v1796_v21 = vmul.f32 %v5466_v51, %v1771_v5  ;;  %v1777_v32 = vmul.f32 %v5467_v19, %v1773_v37  ;;  %v1780_v50 = vadd.f32 %v1778_v40, %v1750_v25 }
 0x3fd   :  { %v5469_v30 = vmov %v5463_v2  ;;  %v1786_v49 = vadd.f32 %v1784_v14, %v1756_v15  ;;  %v5471_v33 = vmov %v5465_v18  ;;  %v5472_v26 = vmov %v5466_v51 }
 0x3fe   :  { %v1783_v28 = vmul.f32 %v5469_v30, %v1773_v37  ;;  %v1789_v17 = vmul.f32 %v5471_v33, %v1773_v37  ;;  %v1792_v59 = vadd.f32 %v1790_v1, %v1762_v54  ;;  %v1795_v24 = vmul.f32 %v5472_v26, %v1773_v37  ;;  %v5480_v26 = vld [vmem:[#allocation26_spill] sm:$0xff] }
 0x3ff   :  { %v5473_v7 = vstv %s4391_s12  ;;  %v1779_v12 = vadd.f32 %v1777_v32, %v1749_v35  ;;  %v1798_v60 = vadd.f32 %v1796_v21, %v1768_v3  ;;  %v5474_v13 = vstv %s5464_s7  ;;  %s5487_s12 = sld [smem:[#allocation74_spill]] }
 0x400   :  { %v1802_v42 = vmul.f32 %v5473_v7, %v4539_v38  ;;  %v1785_v29 = vadd.f32 %v1783_v28, %v1755_v36  ;;  %v1808_v22 = vmul.f32 %v5474_v13, %v4539_v38  ;;  %v1848_v63 = vstv %s4762_s25  ;;  %v5481_v7 = vld [vmem:[#allocation28_spill] sm:$0xff] }
 0x401   :  { %v1791_v48 = vadd.f32 %v1789_v17, %v1761_v34  ;;  %v1797_v6 = vadd.f32 %v1795_v24, %v1767_v58  ;;  %v5475_v5 = vstv %s5468_s24  ;;  %v5476_v8 = vstv %s5470_s19  ;;  %v5479_v17 = vld [vmem:[#allocation24_spill] sm:$0xff] }
 0x402   :  { %v1814_v52 = vmul.f32 %v5475_v5, %v4539_v38  ;;  %v1804_v23 = vadd.f32 %v1802_v42, %v1780_v50  ;;  %v1810_v53 = vadd.f32 %v1808_v22, %v1786_v49  ;;  %v1820_v31 = vmul.f32 %v5476_v8, %v4539_v38  ;;  %v5484_v22 = vld [vmem:[#allocation29_spill] sm:$0xff]  ;;  %v5485_v5 = vld [vmem:[#allocation30_spill] sm:$0xff]  ;;  %v5486_v8 = vld [vmem:[#allocation31_spill] sm:$0xff] }
 0x403   :  { %v1824_v45 = vrot.slane %v4539_v38, 1  ;;  %v1803_v4 = vadd.f32 %v4518_v16, %v1779_v12  ;;  %v1809_v61 = vadd.f32 %v4525_v46, %v1785_v29  ;;  %v1815_v35 = vadd.f32 %v4530_v44, %v1791_v48  ;;  %v5482_v12 = vld [vmem:[#allocation25_spill] sm:$0xff] }
 0x404   :  { %v1816_v36 = vadd.f32 %v1814_v52, %v1792_v59  ;;  %v1821_v56 = vadd.f32 %v4535_v39, %v1797_v6  ;;  %v1822_v41 = vadd.f32 %v1820_v31, %v1798_v60  ;;  %v5477_v55 = vrot.slane %v4418_v0, 1  ;;  %v5483_v60 = vld [vmem:[#allocation27_spill] sm:$0xff] }
 0x406   :  { %v1825_v20 = vsel %vm780_vm6, %v5477_v55, %v1824_v45  ;;  %v5478_v25 = vmov %v5477_v55 }
 0x407   :  { %v1826_v38 = vsel %vm780_vm6, %v1824_v45, %v5478_v25  ;;  %v1831_v46 = vmul.f32 %v1830_v57, %v1825_v20  ;;  %v1837_v44 = vmul.f32 %v1836_v47, %v1825_v20  ;;  %v1843_v39 = vmul.f32 %v1842_v62, %v1825_v20 }
 0x408   :  { %v1828_v16 = vsel %vm164_vm3, %v1826_v38, 0.0  ;;  %v1849_v3 = vmul.f32 %v1848_v63, %v1825_v20 }
 0x409   :  { %v1832_v15 = vmul.f32 %v1830_v57, %v1828_v16  ;;  %v1838_v34 = vmul.f32 %v1836_v47, %v1828_v16  ;;  %v1844_v54 = vmul.f32 %v1842_v62, %v1828_v16  ;;  %v1833_v0 = vadd.f32 %v1831_v46, %v1803_v4 }
 0x40a   :  { %v1839_v9 = vadd.f32 %v1837_v44, %v1809_v61  ;;  %v1845_v27 = vadd.f32 %v1843_v39, %v1815_v35  ;;  %v1850_v11 = vmul.f32 %v1848_v63, %v1828_v16  ;;  %v1851_v2 = vadd.f32 %v1849_v3, %v1821_v56 }
 0x40b   :  { %v1834_v43 = vadd.f32 %v1832_v15, %v1804_v23  ;;  %v1840_v10 = vadd.f32 %v1838_v34, %v1810_v53  ;;  %v1846_v40 = vadd.f32 %v1844_v54, %v1816_v36  ;;  %v1853_v58 = vmax.f32 %v1833_v0, 0.0 }
 0x40c   :  { %v1852_v14 = vadd.f32 %v1850_v11, %v1822_v41  ;;  %v1857_v37 = vmax.f32 %v1839_v9, 0.0  ;;  %v1861_v18 = vmax.f32 %v1845_v27, 0.0  ;;  %v1865_v21 = vmax.f32 %v1851_v2, 0.0 }
 0x40d   :  { %v1854_v1 = vmax.f32 %v1834_v43, 0.0  ;;  %v1858_v51 = vmax.f32 %v1840_v10, 0.0  ;;  %v1862_v57 = vmax.f32 %v1846_v40, 0.0  ;;  %v1855_v47 = vmin.f32 %v1853_v58, 6.0 }
 0x40e   :  { %v1859_v19 = vmin.f32 %v1857_v37, 6.0  ;;  %v1863_v62 = vmin.f32 %v1861_v18, 6.0  ;;  %v1866_v32 = vmax.f32 %v1852_v14, 0.0  ;;  %v1867_v49 = vmin.f32 %v1865_v21, 6.0 }
 0x40f   :  { %v1856_v50 = vmin.f32 %v1854_v1, 6.0  ;;  %v1860_v30 = vmin.f32 %v1858_v51, 6.0  ;;  %v1864_v28 = vmin.f32 %v1862_v57, 6.0  ;;  %v1869_v59 = vadd.f32 %v1855_v47, %v5479_v17 }
 0x410   :  { %v1868_v33 = vmin.f32 %v1866_v32, 6.0  ;;  %v1873_v24 = vadd.f32 %v1859_v19, %v5480_v26  ;;  %v1877_v42 = vadd.f32 %v1863_v62, %v5481_v7  ;;  %v1881_v52 = vadd.f32 %v1867_v49, %v5485_v5 }
 0x411   :  { %v1870_v29 = vadd.f32 %v1856_v50, %v5482_v12  ;;  %v1874_v13 = vadd.f32 %v1860_v30, %v5483_v60  ;;  %v1878_v63 = vadd.f32 %v1864_v28, %v5484_v22  ;;  %v1871_v48 = vmax.f32 %v1869_v59, 0.0 }
 0x412   :  { %v1875_v6 = vmax.f32 %v1873_v24, 0.0  ;;  %v1882_v31 = vadd.f32 %v1868_v33, %v5486_v8  ;;  %v1879_v45 = vmax.f32 %v1877_v42, 0.0  ;;  %v1883_v61 = vmax.f32 %v1881_v52, 0.0 }
 0x413   :  { %v1872_v23 = vmax.f32 %v1870_v29, 0.0  ;;  %v1876_v53 = vmax.f32 %v1874_v13, 0.0  ;;  %1886 = vst.msk [vmem:[%s5487_s12] sm:$0xff] %vm1885_vm7, %v1871_v48  ;;  %v1880_v4 = vmax.f32 %v1878_v63, 0.0 }
 0x414   :  { %1888 = vst.msk [vmem:[%s5487_s12 + $0x10] sm:$0xff] %vm1885_vm7, %v1875_v6  ;;  %v1884_v35 = vmax.f32 %v1882_v31, 0.0 }
 0x415   :  { %1887 = vst.msk [vmem:[%s5487_s12 + $0x8] sm:$0xff] %vm1885_vm7, %v1872_v23 }
 0x416   :  { %1889 = vst.msk [vmem:[%s5487_s12 + $0x18] sm:$0xff] %vm1885_vm7, %v1876_v53 }
 0x417   :  { %1890 = vst.msk [vmem:[%s5487_s12 + $0x20] sm:$0xff] %vm1885_vm7, %v1879_v45 }
 0x418   :  { %1891 = vst.msk [vmem:[%s5487_s12 + $0x28] sm:$0xff] %vm1885_vm7, %v1880_v4 }
 0x419   :  { %1892 = vst.msk [vmem:[%s5487_s12 + $0x30] sm:$0xff] %vm1885_vm7, %v1883_v61 }
 0x41a   :  { %1893 = vst.msk [vmem:[%s5487_s12 + $0x38] sm:$0xff] %vm1885_vm7, %v1884_v35 }
 0x41b   :  { %1898 = vsyncpa [#allocation3], 1 }
 0x41c   :  { %1899 = vsyncpa [#allocation5], 1 }
 0x41d   :  { %1900 = vsyncpa [#allocation8], 1 }
 0x41e   :  { %1901 = vsyncpa [#allocation11], 1 }
 0x41f   :  { %1902 = vsyncpa [#allocation14], 1 }
 0x420   :  { %1903 = vsyncpa [#allocation17], 1 }

</bundles_post_ra>
